<compile_context>
chip_gen: v6e
topology: v6e:2x2x1
jax: 0.10.0
libtpu: 0.0.40
codegen_flags: <defaults>
</compile_context>

<pallas_src>
import functools
from typing import NamedTuple

import jax
import jax.numpy as jnp
from jax.experimental import pallas as pl
from jax.experimental.pallas import tpu as pltpu

EPS = 1e-5
C_OUT = 128          # all in-kernel activations use a dense 128-lane channel dim
sample_rate = 100


def _round_up(x, m):
    return -(-x // m) * m


class BranchCfg(NamedTuple):
    kernel: int        # layer-1 conv kernel size
    stride: int        # layer-1 conv stride
    pool1: int         # first MaxPool kernel == stride
    k: int             # layers 2-4 conv kernel (stride 1, pad k//2)
    pool2: int         # final MaxPool kernel == stride
    pad1: int          # layer-1 conv padding
    pad: int           # layers 2-4 conv padding
    l1p: int           # sequence length after the first pool
    l1p_pad: int       # l1p rounded up to a sublane multiple (8)
    k1_pad: int        # layer-1 im2col K rounded up to a lane multiple (128)
    lout4: int         # sequence length after conv4 (= l1p + 3)
    t_out: int         # final feature length (after the second pool)
    scratch_rows: int  # rows of the padded-activation VMEM scratch


def make_cfg(sr, conv_type, length):
    assert conv_type in (1, 2)
    if conv_type == 1:
        kernel, stride, (p0, k, p2) = sr // 2, sr // 16, (8, 8, 4)
    else:
        kernel, stride, (p0, k, p2) = sr * 4, sr // 2, (4, 6, 2)
    pad1 = kernel // 2
    lout1 = (length + 2 * pad1 - kernel) // stride + 1
    l1p = lout1 // p0                 # MaxPool1d(p0, p0)
    lout4 = l1p + 3                   # each same-pad stride-1 conv adds 1 (even k)
    t_out = lout4 // p2               # MaxPool1d(p2, p2)
    pad = k // 2
    return BranchCfg(
        kernel=kernel, stride=stride, pool1=p0, k=k, pool2=p2,
        pad1=pad1, pad=pad, l1p=l1p,
        l1p_pad=_round_up(l1p, 8), k1_pad=_round_up(kernel, 128),
        lout4=lout4, t_out=t_out,
        scratch_rows=_round_up(l1p + 2 + 2 * pad, 8))


# ----------------------------- Pallas kernel --------------------------------

def _branch_body(cfg, p_ref, w0_ref, w1_ref, w2_ref, w3_ref, o_ref, xpad, l1buf):
    p0, k, pad, p2 = cfg.pool1, cfg.k, cfg.pad, cfg.pool2
    l1p, l1p_pad, t_out = cfg.l1p, cfg.l1p_pad, cfg.t_out

    # Scratch hygiene: rows [0, pad) must be zero (left conv padding) and the
    # rows past the layer-1 activation hold stale data from the previous
    # element's layer-3/4 staging.  Zero only those few rows each step
    # (unconditional, so it is also correct when the "parallel" batch axis is
    # split across TensorCores and a core never sees program_id == 0).
    xpad[pl.ds(0, pad), :] = jnp.zeros((pad, C_OUT), jnp.float32)
    tail = cfg.scratch_rows - pad - l1p
    xpad[pl.ds(pad + l1p, tail), :] = jnp.zeros((tail, C_OUT), jnp.float32)

    # ---- layer 1: conv(+folded BN) as ONE MXU matmul over all pool1*l1p_pad
    #      windows (phase-major slabs), then MaxPool(pool1)+ReLU as pure-VPU
    #      slab maxima (max and ReLU commute).
    l1buf[...] = jnp.dot(p_ref[0], w0_ref[...],
                         preferred_element_type=jnp.float32)   # (p0*l1p_pad, 128)
    h = l1buf[pl.ds(0, l1p_pad), :]
    for j in range(1, p0):
        h = jnp.maximum(h, l1buf[pl.ds(j * l1p_pad, l1p_pad), :])
    h = jnp.maximum(h, 0.0)                                    # (l1p_pad, 128) f32
    # Dropout(0.5): identity in eval mode.
    xpad[pl.ds(pad, l1p), :] = h[0:l1p]

    # ---- layers 2-4: stride-1 same-pad conv(+folded BN)+ReLU, each as ONE
    #      deep-K matmul: lane-concatenate the k shifted slices of the padded
    #      f32 activation (cast to bf16 at the operand) against the flattened
    #      (k*128, 128) weight.
    lin = l1p
    act = h
    for li, w_ref in enumerate((w1_ref, w2_ref, w3_ref)):
        lout = lin + 1
        cols = jnp.concatenate(
            [xpad[pl.ds(t, lout), :].astype(jnp.bfloat16) for t in range(k)],
            axis=1)                                            # (lout, k*128) bf16
        act = jnp.maximum(
            jnp.dot(cols, w_ref[...], preferred_element_type=jnp.float32), 0.0)
        lin = lout
        if li < 2:                        # stage next layer's padded input (f32)
            xpad[pl.ds(pad, lin), :] = act

    # ---- final MaxPool(pool2): build the whole (t_out, 128) block in
    #      registers, single lane-dense store.
    pooled = jnp.concatenate(
        [jnp.max(act[i * p2:(i + 1) * p2, :], axis=0, keepdims=True)
         for i in range(t_out)], axis=0)                       # (t_out, 128) f32
    o_ref[0] = pooled.astype(o_ref.dtype)
    # Dropout(0.5): identity in eval mode.


def _fe_kernel(p1_ref, a0_ref, a1_ref, a2_ref, a3_ref,
               p2_ref, b0_ref, b1_ref, b2_ref, b3_ref,
               o1_ref, o2_ref,
               xpad1, l1buf1, xpad2, l1buf2, *, cfg1, cfg2):
    _branch_body(cfg1, p1_ref, a0_ref, a1_ref, a2_ref, a3_ref, o1_ref, xpad1, l1buf1)
    _branch_body(cfg2, p2_ref, b0_ref, b1_ref, b2_ref, b3_ref, o2_ref, xpad2, l1buf2)


def run_feature_extraction(cfg1, cfg2, patches1, weights1, patches2, weights2):
    n = patches1.shape[0]
    kern = functools.partial(_fe_kernel, cfg1=cfg1, cfg2=cfg2)

    wspec = lambda w: pl.BlockSpec(w.shape, lambda b: (0, 0))   # full-extent weight
    m1, k1p = cfg1.pool1 * cfg1.l1p_pad, cfg1.k1_pad
    m2, k2p = cfg2.pool1 * cfg2.l1p_pad, cfg2.k1_pad

    in_specs = ([pl.BlockSpec((1, m1, k1p), lambda b: (b, 0, 0))]
                + [wspec(w) for w in weights1]
                + [pl.BlockSpec((1, m2, k2p), lambda b: (b, 0, 0))]
                + [wspec(w) for w in weights2])

    out_shape = (jax.ShapeDtypeStruct((n, cfg1.t_out, C_OUT), jnp.float32),
                 jax.ShapeDtypeStruct((n, cfg2.t_out, C_OUT), jnp.float32))
    out_specs = (pl.BlockSpec((1, cfg1.t_out, C_OUT), lambda b: (b, 0, 0)),
                 pl.BlockSpec((1, cfg2.t_out, C_OUT), lambda b: (b, 0, 0)))

    return pl.pallas_call(
        kern,
        out_shape=out_shape,
        grid=(n,),
        in_specs=in_specs,
        out_specs=out_specs,
        scratch_shapes=[
            pltpu.VMEM((cfg1.scratch_rows, C_OUT), jnp.float32),
            pltpu.VMEM((m1, C_OUT), jnp.float32),
            pltpu.VMEM((cfg2.scratch_rows, C_OUT), jnp.float32),
            pltpu.VMEM((m2, C_OUT), jnp.float32),
        ],
        compiler_params=pltpu.CompilerParams(dimension_semantics=("parallel",)),
    )(patches1, *weights1, patches2, *weights2)


# ------------------------------ JAX glue -------------------------------------

def build_l1_patches(x, cfg):
    """x: (N, L) f32 -> (N, pool1*l1p_pad, k1_pad) bf16.

    Conv-1 windows are extracted with conv_general_dilated_patches (no XLA
    gather), grouped phase-major (slab j = output positions j, p0+j, 2*p0+j,
    ...) and zero-padded to sublane/lane-aligned sizes.
    """
    n = x.shape[0]
    p = jax.lax.conv_general_dilated_patches(
        x[:, None, :].astype(jnp.bfloat16),           # (N, 1, L)
        filter_shape=(cfg.kernel,),
        window_strides=(cfg.stride,),
        padding=((cfg.pad1, cfg.pad1),))              # (N, kernel, lout1)
    p = p[:, :, :cfg.pool1 * cfg.l1p]                 # positions kept by the pool
    p = jnp.transpose(p, (0, 2, 1))                   # (N, p0*l1p, kernel)
    p = p.reshape(n, cfg.l1p, cfg.pool1, cfg.kernel)  # pos = i*p0 + j -> [i, j]
    p = jnp.transpose(p, (0, 2, 1, 3))                # (N, p0, l1p, kernel)
    p = jnp.pad(p, ((0, 0), (0, 0),
                    (0, cfg.l1p_pad - cfg.l1p),
                    (0, cfg.k1_pad - cfg.kernel)))
    return p.reshape(n, cfg.pool1 * cfg.l1p_pad, cfg.k1_pad).astype(jnp.bfloat16)


def xavier_uniform(key, cout, cin, k):
    fan_in, fan_out = cin * k, cout * k
    bound = (6.0 / (fan_in + fan_out)) ** 0.5
    return jax.random.uniform(key, (cout, cin, k), jnp.float32, -bound, bound)


def make_branch_weights(key, cfg):
    """Xavier-init Conv1d weights (PyTorch layout), fold eval-mode BN, reshape
    to the kernel's matmul layouts, cast bf16."""
    k0, k1, k2, k3 = jax.random.split(key, 4)
    bn_scale = 1.0 / (1.0 + EPS) ** 0.5              # gamma=1, beta=0, mean=0, var=1

    w0 = xavier_uniform(k0, 64, 1, cfg.kernel)       # (64, 1, K1)
    w1 = xavier_uniform(k1, 128, 64, cfg.k)          # (128, 64, k)
    w2 = xavier_uniform(k2, 128, 128, cfg.k)
    w3 = xavier_uniform(k3, 128, 128, cfg.k)

    w0m = jnp.transpose(w0[:, 0, :], (1, 0)) * bn_scale              # (K1, 64)
    w0m = jnp.pad(w0m, ((0, cfg.k1_pad - cfg.kernel), (0, C_OUT - 64)))

    def flat_taps(w, cin):
        m = jnp.transpose(w, (2, 1, 0)) * bn_scale                   # (k, Cin, 128)
        if cin < C_OUT:
            m = jnp.pad(m, ((0, 0), (0, C_OUT - cin), (0, 0)))       # Cin -> 128
        return m.reshape(cfg.k * C_OUT, C_OUT).astype(jnp.bfloat16)  # (k*128, 128)

    return (w0m.astype(jnp.bfloat16), flat_taps(w1, 64),
            flat_taps(w2, 128), flat_taps(w3, 128))


def feature_extraction(cfg1, cfg2, weights1, weights2, X):
    """X: (N, 1, L) PyTorch NCL -> F: (N, 128, T1 + T2) NCL."""
    x = X[:, 0, :].astype(jnp.float32)               # (N, L) single-channel signal
    patches1 = build_l1_patches(x, cfg1)
    patches2 = build_l1_patches(x, cfg2)
    f1, f2 = run_feature_extraction(cfg1, cfg2, patches1, weights1,
                                    patches2, weights2)
    f = jnp.concatenate([f1, f2], axis=1)            # (N, T1+T2, 128), lane-dense
    # Tiny final transpose only to restore the PyTorch (N, C, T) convention;
    # downstream consumers could keep the lane-dense (N, T, 128) layout.
    return jnp.transpose(f, (0, 2, 1))


# -------------------------------- main ---------------------------------------

if __name__ == "__main__":
    N, L = 2, 3000   # 30-second signal at 100 Hz

    root = jax.random.PRNGKey(0)
    kx, k1, k2 = jax.random.split(root, 3)

    cfg1 = make_cfg(sample_rate, 1, L)
    cfg2 = make_cfg(sample_rate, 2, L)
    weights1 = make_branch_weights(k1, cfg1)
    weights2 = make_branch_weights(k2, cfg2)

    X = jax.random.normal(kx, (N, 1, L), jnp.float32)

    fwd = jax.jit(functools.partial(feature_extraction, cfg1, cfg2))
    F = jax.block_until_ready(fwd(weights1, weights2, X))

    # Expected lengths: branch1 -> 16, branch2 -> 9 (same as the PyTorch module)
    assert (cfg1.t_out, cfg2.t_out) == (16, 9), (cfg1.t_out, cfg2.t_out)
    assert F.shape == (N, 128, 25), F.shape
    assert bool(jnp.all(jnp.isfinite(F)))

    print("KERNEL_OK")
</pallas_src>

<mosaic_0001>
module attributes {stable_mosaic.version = 11 : i64} {
  func.func @_fe_kernel(%arg0: i32, %arg1: memref<1x512x128xbf16, #tpu.memory_space<vmem>>, %arg2: memref<128x128xbf16, #tpu.memory_space<vmem>>, %arg3: memref<1024x128xbf16, #tpu.memory_space<vmem>>, %arg4: memref<1024x128xbf16, #tpu.memory_space<vmem>>, %arg5: memref<1024x128xbf16, #tpu.memory_space<vmem>>, %arg6: memref<1x64x512xbf16, #tpu.memory_space<vmem>>, %arg7: memref<512x128xbf16, #tpu.memory_space<vmem>>, %arg8: memref<768x128xbf16, #tpu.memory_space<vmem>>, %arg9: memref<768x128xbf16, #tpu.memory_space<vmem>>, %arg10: memref<768x128xbf16, #tpu.memory_space<vmem>>, %arg11: memref<1x16x128xf32, #tpu.memory_space<vmem>>, %arg12: memref<1x9x128xf32, #tpu.memory_space<vmem>>, %arg13: memref<72x128xf32, #tpu.memory_space<vmem>>, %arg14: memref<512x128xf32, #tpu.memory_space<vmem>>, %arg15: memref<24x128xf32, #tpu.memory_space<vmem>>, %arg16: memref<64x128xf32, #tpu.memory_space<vmem>>) attributes {dimension_semantics = [#tpu.dimension_semantics<parallel>], iteration_bounds = array<i64: 2>, scalar_prefetch = 0 : i64, scratch_operands = 4 : i64, tpu.core_type = #tpu.core_type<tc>, window_params = [{transform_indices = @transform_0, window_bounds = array<i64: 1, 512, 128>}, {pipeline_mode = #tpu.pipeline_mode<synchronous>, transform_indices = @transform_1, window_bounds = array<i64: 128, 128>}, {pipeline_mode = #tpu.pipeline_mode<synchronous>, transform_indices = @transform_2, window_bounds = array<i64: 1024, 128>}, {pipeline_mode = #tpu.pipeline_mode<synchronous>, transform_indices = @transform_3, window_bounds = array<i64: 1024, 128>}, {pipeline_mode = #tpu.pipeline_mode<synchronous>, transform_indices = @transform_4, window_bounds = array<i64: 1024, 128>}, {transform_indices = @transform_5, window_bounds = array<i64: 1, 64, 512>}, {pipeline_mode = #tpu.pipeline_mode<synchronous>, transform_indices = @transform_6, window_bounds = array<i64: 512, 128>}, {pipeline_mode = #tpu.pipeline_mode<synchronous>, transform_indices = @transform_7, window_bounds = array<i64: 768, 128>}, {pipeline_mode = #tpu.pipeline_mode<synchronous>, transform_indices = @transform_8, window_bounds = array<i64: 768, 128>}, {pipeline_mode = #tpu.pipeline_mode<synchronous>, transform_indices = @transform_9, window_bounds = array<i64: 768, 128>}, {transform_indices = @transform_10, window_bounds = array<i64: 1, 16, 128>}, {transform_indices = @transform_11, window_bounds = array<i64: 1, 9, 128>}]} {
    %cst = arith.constant 0.000000e+00 : f32
    %0 = vector.broadcast %cst : f32 to vector<4x128xf32>
    %c0 = arith.constant 0 : index
    %c0_0 = arith.constant 0 : index
    %1 = vector.load %arg13[%c0, %c0_0] : memref<72x128xf32, #tpu.memory_space<vmem>>, vector<4x128xf32>
    tpu.vector_store %arg13[%c0, %c0_0], %0 {strides = array<i32>} : memref<72x128xf32, #tpu.memory_space<vmem>>, vector<4x128xf32>,
    %cst_1 = arith.constant 0.000000e+00 : f32
    %2 = vector.broadcast %cst_1 : f32 to vector<6x128xf32>
    %c66 = arith.constant 66 : index
    %c0_2 = arith.constant 0 : index
    %3 = vector.load %arg13[%c66, %c0_2] : memref<72x128xf32, #tpu.memory_space<vmem>>, vector<6x128xf32>
    tpu.vector_store %arg13[%c66, %c0_2], %2 {strides = array<i32>} : memref<72x128xf32, #tpu.memory_space<vmem>>, vector<6x128xf32>,
    %c0_3 = arith.constant 0 : index
    %c0_4 = arith.constant 0 : index
    %c0_5 = arith.constant 0 : index
    %4 = vector.load %arg1[%c0_3, %c0_4, %c0_5] : memref<1x512x128xbf16, #tpu.memory_space<vmem>>, vector<1x512x128xbf16>
    %5 = vector.shape_cast %4 : vector<1x512x128xbf16> to vector<512x128xbf16>
    %c0_6 = arith.constant 0 : index
    %c0_7 = arith.constant 0 : index
    %6 = vector.load %arg2[%c0_6, %c0_7] : memref<128x128xbf16, #tpu.memory_space<vmem>>, vector<128x128xbf16>
    %cst_8 = arith.constant dense<0.000000e+00> : vector<512x128xf32>
    %7 = tpu.matmul %5, %6, %cst_8 {dimension_numbers = #tpu.dot_dimension_numbers<[1], [0], [0], [1], [0, 0, 1, 1], [], []>} : vector<512x128xbf16>, vector<128x128xbf16>, vector<512x128xf32> -> vector<512x128xf32>
    %c0_9 = arith.constant 0 : index
    %c0_10 = arith.constant 0 : index
    %8 = vector.load %arg14[%c0_9, %c0_10] : memref<512x128xf32, #tpu.memory_space<vmem>>, vector<512x128xf32>
    tpu.vector_store %arg14[%c0_9, %c0_10], %7 {strides = array<i32>} : memref<512x128xf32, #tpu.memory_space<vmem>>, vector<512x128xf32>,
    %c0_11 = arith.constant 0 : index
    %c0_12 = arith.constant 0 : index
    %9 = vector.load %arg14[%c0_11, %c0_12] : memref<512x128xf32, #tpu.memory_space<vmem>>, vector<64x128xf32>
    %c64 = arith.constant 64 : index
    %c0_13 = arith.constant 0 : index
    %10 = vector.load %arg14[%c64, %c0_13] : memref<512x128xf32, #tpu.memory_space<vmem>>, vector<64x128xf32>
    %11 = arith.maximumf %9, %10 : vector<64x128xf32>
    %c128 = arith.constant 128 : index
    %c0_14 = arith.constant 0 : index
    %12 = vector.load %arg14[%c128, %c0_14] : memref<512x128xf32, #tpu.memory_space<vmem>>, vector<64x128xf32>
    %13 = arith.maximumf %11, %12 : vector<64x128xf32>
    %c192 = arith.constant 192 : index
    %c0_15 = arith.constant 0 : index
    %14 = vector.load %arg14[%c192, %c0_15] : memref<512x128xf32, #tpu.memory_space<vmem>>, vector<64x128xf32>
    %15 = arith.maximumf %13, %14 : vector<64x128xf32>
    %c256 = arith.constant 256 : index
    %c0_16 = arith.constant 0 : index
    %16 = vector.load %arg14[%c256, %c0_16] : memref<512x128xf32, #tpu.memory_space<vmem>>, vector<64x128xf32>
    %17 = arith.maximumf %15, %16 : vector<64x128xf32>
    %c320 = arith.constant 320 : index
    %c0_17 = arith.constant 0 : index
    %18 = vector.load %arg14[%c320, %c0_17] : memref<512x128xf32, #tpu.memory_space<vmem>>, vector<64x128xf32>
    %19 = arith.maximumf %17, %18 : vector<64x128xf32>
    %c384 = arith.constant 384 : index
    %c0_18 = arith.constant 0 : index
    %20 = vector.load %arg14[%c384, %c0_18] : memref<512x128xf32, #tpu.memory_space<vmem>>, vector<64x128xf32>
    %21 = arith.maximumf %19, %20 : vector<64x128xf32>
    %c448 = arith.constant 448 : index
    %c0_19 = arith.constant 0 : index
    %22 = vector.load %arg14[%c448, %c0_19] : memref<512x128xf32, #tpu.memory_space<vmem>>, vector<64x128xf32>
    %23 = arith.maximumf %21, %22 : vector<64x128xf32>
    %cst_20 = arith.constant 0.000000e+00 : f32
    %24 = vector.broadcast %cst_20 : f32 to vector<64x128xf32>
    %25 = arith.maximumf %23, %24 : vector<64x128xf32>
    %26 = vector.extract_strided_slice %25 {offsets = [0, 0], sizes = [62, 128], strides = [1, 1]} : vector<64x128xf32> to vector<62x128xf32>
    %c4 = arith.constant 4 : index
    %c0_21 = arith.constant 0 : index
    %27 = vector.load %arg13[%c4, %c0_21] : memref<72x128xf32, #tpu.memory_space<vmem>>, vector<62x128xf32>
    tpu.vector_store %arg13[%c4, %c0_21], %26 {strides = array<i32>} : memref<72x128xf32, #tpu.memory_space<vmem>>, vector<62x128xf32>,
    %c0_22 = arith.constant 0 : index
    %c0_23 = arith.constant 0 : index
    %28 = vector.load %arg13[%c0_22, %c0_23] : memref<72x128xf32, #tpu.memory_space<vmem>>, vector<63x128xf32>
    %29 = arith.truncf %28 : vector<63x128xf32> to vector<63x128xbf16>
    %c1 = arith.constant 1 : index
    %c0_24 = arith.constant 0 : index
    %30 = vector.load %arg13[%c1, %c0_24] : memref<72x128xf32, #tpu.memory_space<vmem>>, vector<63x128xf32>
    %31 = arith.truncf %30 : vector<63x128xf32> to vector<63x128xbf16>
    %c2 = arith.constant 2 : index
    %c0_25 = arith.constant 0 : index
    %32 = vector.load %arg13[%c2, %c0_25] : memref<72x128xf32, #tpu.memory_space<vmem>>, vector<63x128xf32>
    %33 = arith.truncf %32 : vector<63x128xf32> to vector<63x128xbf16>
    %c3 = arith.constant 3 : index
    %c0_26 = arith.constant 0 : index
    %34 = vector.load %arg13[%c3, %c0_26] : memref<72x128xf32, #tpu.memory_space<vmem>>, vector<63x128xf32>
    %35 = arith.truncf %34 : vector<63x128xf32> to vector<63x128xbf16>
    %c4_27 = arith.constant 4 : index
    %c0_28 = arith.constant 0 : index
    %36 = vector.load %arg13[%c4_27, %c0_28] : memref<72x128xf32, #tpu.memory_space<vmem>>, vector<63x128xf32>
    %37 = arith.truncf %36 : vector<63x128xf32> to vector<63x128xbf16>
    %c5 = arith.constant 5 : index
    %c0_29 = arith.constant 0 : index
    %38 = vector.load %arg13[%c5, %c0_29] : memref<72x128xf32, #tpu.memory_space<vmem>>, vector<63x128xf32>
    %39 = arith.truncf %38 : vector<63x128xf32> to vector<63x128xbf16>
    %c6 = arith.constant 6 : index
    %c0_30 = arith.constant 0 : index
    %40 = vector.load %arg13[%c6, %c0_30] : memref<72x128xf32, #tpu.memory_space<vmem>>, vector<63x128xf32>
    %41 = arith.truncf %40 : vector<63x128xf32> to vector<63x128xbf16>
    %c7 = arith.constant 7 : index
    %c0_31 = arith.constant 0 : index
    %42 = vector.load %arg13[%c7, %c0_31] : memref<72x128xf32, #tpu.memory_space<vmem>>, vector<63x128xf32>
    %43 = arith.truncf %42 : vector<63x128xf32> to vector<63x128xbf16>
    %44 = tpu.concatenate %29, %31, %33, %35, %37, %39, %41, %43 in 1 : vector<63x128xbf16>, vector<63x128xbf16>, vector<63x128xbf16>, vector<63x128xbf16>, vector<63x128xbf16>, vector<63x128xbf16>, vector<63x128xbf16>, vector<63x128xbf16> -> vector<63x1024xbf16>
    %c0_32 = arith.constant 0 : index
    %c0_33 = arith.constant 0 : index
    %45 = vector.load %arg3[%c0_32, %c0_33] : memref<1024x128xbf16, #tpu.memory_space<vmem>>, vector<1024x128xbf16>
    %cst_34 = arith.constant dense<0.000000e+00> : vector<63x128xf32>
    %46 = tpu.matmul %44, %45, %cst_34 {dimension_numbers = #tpu.dot_dimension_numbers<[1], [0], [0], [1], [0, 0, 1, 1], [], []>} : vector<63x1024xbf16>, vector<1024x128xbf16>, vector<63x128xf32> -> vector<63x128xf32>
    %cst_35 = arith.constant 0.000000e+00 : f32
    %47 = vector.broadcast %cst_35 : f32 to vector<63x128xf32>
    %48 = arith.maximumf %46, %47 : vector<63x128xf32>
    %c4_36 = arith.constant 4 : index
    %c0_37 = arith.constant 0 : index
    %49 = vector.load %arg13[%c4_36, %c0_37] : memref<72x128xf32, #tpu.memory_space<vmem>>, vector<63x128xf32>
    tpu.vector_store %arg13[%c4_36, %c0_37], %48 {strides = array<i32>} : memref<72x128xf32, #tpu.memory_space<vmem>>, vector<63x128xf32>,
    %c0_38 = arith.constant 0 : index
    %c0_39 = arith.constant 0 : index
    %50 = vector.load %arg13[%c0_38, %c0_39] : memref<72x128xf32, #tpu.memory_space<vmem>>, vector<64x128xf32>
    %51 = arith.truncf %50 : vector<64x128xf32> to vector<64x128xbf16>
    %c1_40 = arith.constant 1 : index
    %c0_41 = arith.constant 0 : index
    %52 = vector.load %arg13[%c1_40, %c0_41] : memref<72x128xf32, #tpu.memory_space<vmem>>, vector<64x128xf32>
    %53 = arith.truncf %52 : vector<64x128xf32> to vector<64x128xbf16>
    %c2_42 = arith.constant 2 : index
    %c0_43 = arith.constant 0 : index
    %54 = vector.load %arg13[%c2_42, %c0_43] : memref<72x128xf32, #tpu.memory_space<vmem>>, vector<64x128xf32>
    %55 = arith.truncf %54 : vector<64x128xf32> to vector<64x128xbf16>
    %c3_44 = arith.constant 3 : index
    %c0_45 = arith.constant 0 : index
    %56 = vector.load %arg13[%c3_44, %c0_45] : memref<72x128xf32, #tpu.memory_space<vmem>>, vector<64x128xf32>
    %57 = arith.truncf %56 : vector<64x128xf32> to vector<64x128xbf16>
    %c4_46 = arith.constant 4 : index
    %c0_47 = arith.constant 0 : index
    %58 = vector.load %arg13[%c4_46, %c0_47] : memref<72x128xf32, #tpu.memory_space<vmem>>, vector<64x128xf32>
    %59 = arith.truncf %58 : vector<64x128xf32> to vector<64x128xbf16>
    %c5_48 = arith.constant 5 : index
    %c0_49 = arith.constant 0 : index
    %60 = vector.load %arg13[%c5_48, %c0_49] : memref<72x128xf32, #tpu.memory_space<vmem>>, vector<64x128xf32>
    %61 = arith.truncf %60 : vector<64x128xf32> to vector<64x128xbf16>
    %c6_50 = arith.constant 6 : index
    %c0_51 = arith.constant 0 : index
    %62 = vector.load %arg13[%c6_50, %c0_51] : memref<72x128xf32, #tpu.memory_space<vmem>>, vector<64x128xf32>
    %63 = arith.truncf %62 : vector<64x128xf32> to vector<64x128xbf16>
    %c7_52 = arith.constant 7 : index
    %c0_53 = arith.constant 0 : index
    %64 = vector.load %arg13[%c7_52, %c0_53] : memref<72x128xf32, #tpu.memory_space<vmem>>, vector<64x128xf32>
    %65 = arith.truncf %64 : vector<64x128xf32> to vector<64x128xbf16>
    %66 = tpu.concatenate %51, %53, %55, %57, %59, %61, %63, %65 in 1 : vector<64x128xbf16>, vector<64x128xbf16>, vector<64x128xbf16>, vector<64x128xbf16>, vector<64x128xbf16>, vector<64x128xbf16>, vector<64x128xbf16>, vector<64x128xbf16> -> vector<64x1024xbf16>
    %c0_54 = arith.constant 0 : index
    %c0_55 = arith.constant 0 : index
    %67 = vector.load %arg4[%c0_54, %c0_55] : memref<1024x128xbf16, #tpu.memory_space<vmem>>, vector<1024x128xbf16>
    %cst_56 = arith.constant dense<0.000000e+00> : vector<64x128xf32>
    %68 = tpu.matmul %66, %67, %cst_56 {dimension_numbers = #tpu.dot_dimension_numbers<[1], [0], [0], [1], [0, 0, 1, 1], [], []>} : vector<64x1024xbf16>, vector<1024x128xbf16>, vector<64x128xf32> -> vector<64x128xf32>
    %cst_57 = arith.constant 0.000000e+00 : f32
    %69 = vector.broadcast %cst_57 : f32 to vector<64x128xf32>
    %70 = arith.maximumf %68, %69 : vector<64x128xf32>
    %c4_58 = arith.constant 4 : index
    %c0_59 = arith.constant 0 : index
    %71 = vector.load %arg13[%c4_58, %c0_59] : memref<72x128xf32, #tpu.memory_space<vmem>>, vector<64x128xf32>
    tpu.vector_store %arg13[%c4_58, %c0_59], %70 {strides = array<i32>} : memref<72x128xf32, #tpu.memory_space<vmem>>, vector<64x128xf32>,
    %c0_60 = arith.constant 0 : index
    %c0_61 = arith.constant 0 : index
    %72 = vector.load %arg13[%c0_60, %c0_61] : memref<72x128xf32, #tpu.memory_space<vmem>>, vector<65x128xf32>
    %73 = arith.truncf %72 : vector<65x128xf32> to vector<65x128xbf16>
    %c1_62 = arith.constant 1 : index
    %c0_63 = arith.constant 0 : index
    %74 = vector.load %arg13[%c1_62, %c0_63] : memref<72x128xf32, #tpu.memory_space<vmem>>, vector<65x128xf32>
    %75 = arith.truncf %74 : vector<65x128xf32> to vector<65x128xbf16>
    %c2_64 = arith.constant 2 : index
    %c0_65 = arith.constant 0 : index
    %76 = vector.load %arg13[%c2_64, %c0_65] : memref<72x128xf32, #tpu.memory_space<vmem>>, vector<65x128xf32>
    %77 = arith.truncf %76 : vector<65x128xf32> to vector<65x128xbf16>
    %c3_66 = arith.constant 3 : index
    %c0_67 = arith.constant 0 : index
    %78 = vector.load %arg13[%c3_66, %c0_67] : memref<72x128xf32, #tpu.memory_space<vmem>>, vector<65x128xf32>
    %79 = arith.truncf %78 : vector<65x128xf32> to vector<65x128xbf16>
    %c4_68 = arith.constant 4 : index
    %c0_69 = arith.constant 0 : index
    %80 = vector.load %arg13[%c4_68, %c0_69] : memref<72x128xf32, #tpu.memory_space<vmem>>, vector<65x128xf32>
    %81 = arith.truncf %80 : vector<65x128xf32> to vector<65x128xbf16>
    %c5_70 = arith.constant 5 : index
    %c0_71 = arith.constant 0 : index
    %82 = vector.load %arg13[%c5_70, %c0_71] : memref<72x128xf32, #tpu.memory_space<vmem>>, vector<65x128xf32>
    %83 = arith.truncf %82 : vector<65x128xf32> to vector<65x128xbf16>
    %c6_72 = arith.constant 6 : index
    %c0_73 = arith.constant 0 : index
    %84 = vector.load %arg13[%c6_72, %c0_73] : memref<72x128xf32, #tpu.memory_space<vmem>>, vector<65x128xf32>
    %85 = arith.truncf %84 : vector<65x128xf32> to vector<65x128xbf16>
    %c7_74 = arith.constant 7 : index
    %c0_75 = arith.constant 0 : index
    %86 = vector.load %arg13[%c7_74, %c0_75] : memref<72x128xf32, #tpu.memory_space<vmem>>, vector<65x128xf32>
    %87 = arith.truncf %86 : vector<65x128xf32> to vector<65x128xbf16>
    %88 = tpu.concatenate %73, %75, %77, %79, %81, %83, %85, %87 in 1 : vector<65x128xbf16>, vector<65x128xbf16>, vector<65x128xbf16>, vector<65x128xbf16>, vector<65x128xbf16>, vector<65x128xbf16>, vector<65x128xbf16>, vector<65x128xbf16> -> vector<65x1024xbf16>
    %c0_76 = arith.constant 0 : index
    %c0_77 = arith.constant 0 : index
    %89 = vector.load %arg5[%c0_76, %c0_77] : memref<1024x128xbf16, #tpu.memory_space<vmem>>, vector<1024x128xbf16>
    %cst_78 = arith.constant dense<0.000000e+00> : vector<65x128xf32>
    %90 = tpu.matmul %88, %89, %cst_78 {dimension_numbers = #tpu.dot_dimension_numbers<[1], [0], [0], [1], [0, 0, 1, 1], [], []>} : vector<65x1024xbf16>, vector<1024x128xbf16>, vector<65x128xf32> -> vector<65x128xf32>
    %cst_79 = arith.constant 0.000000e+00 : f32
    %91 = vector.broadcast %cst_79 : f32 to vector<65x128xf32>
    %92 = arith.maximumf %90, %91 : vector<65x128xf32>
    %93 = vector.extract_strided_slice %92 {offsets = [0, 0], sizes = [4, 128], strides = [1, 1]} : vector<65x128xf32> to vector<4x128xf32>
    %cst_80 = arith.constant dense<0xFF800000> : vector<128xf32>
    %94 = vector.multi_reduction <maximumf>, %93, %cst_80 [0] : vector<4x128xf32> to vector<128xf32>
    %95 = vector.shape_cast %94 : vector<128xf32> to vector<1x128xf32>
    %96 = vector.extract_strided_slice %92 {offsets = [4, 0], sizes = [4, 128], strides = [1, 1]} : vector<65x128xf32> to vector<4x128xf32>
    %cst_81 = arith.constant dense<0xFF800000> : vector<128xf32>
    %97 = vector.multi_reduction <maximumf>, %96, %cst_81 [0] : vector<4x128xf32> to vector<128xf32>
    %98 = vector.shape_cast %97 : vector<128xf32> to vector<1x128xf32>
    %99 = vector.extract_strided_slice %92 {offsets = [8, 0], sizes = [4, 128], strides = [1, 1]} : vector<65x128xf32> to vector<4x128xf32>
    %cst_82 = arith.constant dense<0xFF800000> : vector<128xf32>
    %100 = vector.multi_reduction <maximumf>, %99, %cst_82 [0] : vector<4x128xf32> to vector<128xf32>
    %101 = vector.shape_cast %100 : vector<128xf32> to vector<1x128xf32>
    %102 = vector.extract_strided_slice %92 {offsets = [12, 0], sizes = [4, 128], strides = [1, 1]} : vector<65x128xf32> to vector<4x128xf32>
    %cst_83 = arith.constant dense<0xFF800000> : vector<128xf32>
    %103 = vector.multi_reduction <maximumf>, %102, %cst_83 [0] : vector<4x128xf32> to vector<128xf32>
    %104 = vector.shape_cast %103 : vector<128xf32> to vector<1x128xf32>
    %105 = vector.extract_strided_slice %92 {offsets = [16, 0], sizes = [4, 128], strides = [1, 1]} : vector<65x128xf32> to vector<4x128xf32>
    %cst_84 = arith.constant dense<0xFF800000> : vector<128xf32>
    %106 = vector.multi_reduction <maximumf>, %105, %cst_84 [0] : vector<4x128xf32> to vector<128xf32>
    %107 = vector.shape_cast %106 : vector<128xf32> to vector<1x128xf32>
    %108 = vector.extract_strided_slice %92 {offsets = [20, 0], sizes = [4, 128], strides = [1, 1]} : vector<65x128xf32> to vector<4x128xf32>
    %cst_85 = arith.constant dense<0xFF800000> : vector<128xf32>
    %109 = vector.multi_reduction <maximumf>, %108, %cst_85 [0] : vector<4x128xf32> to vector<128xf32>
    %110 = vector.shape_cast %109 : vector<128xf32> to vector<1x128xf32>
    %111 = vector.extract_strided_slice %92 {offsets = [24, 0], sizes = [4, 128], strides = [1, 1]} : vector<65x128xf32> to vector<4x128xf32>
    %cst_86 = arith.constant dense<0xFF800000> : vector<128xf32>
    %112 = vector.multi_reduction <maximumf>, %111, %cst_86 [0] : vector<4x128xf32> to vector<128xf32>
    %113 = vector.shape_cast %112 : vector<128xf32> to vector<1x128xf32>
    %114 = vector.extract_strided_slice %92 {offsets = [28, 0], sizes = [4, 128], strides = [1, 1]} : vector<65x128xf32> to vector<4x128xf32>
    %cst_87 = arith.constant dense<0xFF800000> : vector<128xf32>
    %115 = vector.multi_reduction <maximumf>, %114, %cst_87 [0] : vector<4x128xf32> to vector<128xf32>
    %116 = vector.shape_cast %115 : vector<128xf32> to vector<1x128xf32>
    %117 = vector.extract_strided_slice %92 {offsets = [32, 0], sizes = [4, 128], strides = [1, 1]} : vector<65x128xf32> to vector<4x128xf32>
    %cst_88 = arith.constant dense<0xFF800000> : vector<128xf32>
    %118 = vector.multi_reduction <maximumf>, %117, %cst_88 [0] : vector<4x128xf32> to vector<128xf32>
    %119 = vector.shape_cast %118 : vector<128xf32> to vector<1x128xf32>
    %120 = vector.extract_strided_slice %92 {offsets = [36, 0], sizes = [4, 128], strides = [1, 1]} : vector<65x128xf32> to vector<4x128xf32>
    %cst_89 = arith.constant dense<0xFF800000> : vector<128xf32>
    %121 = vector.multi_reduction <maximumf>, %120, %cst_89 [0] : vector<4x128xf32> to vector<128xf32>
    %122 = vector.shape_cast %121 : vector<128xf32> to vector<1x128xf32>
    %123 = vector.extract_strided_slice %92 {offsets = [40, 0], sizes = [4, 128], strides = [1, 1]} : vector<65x128xf32> to vector<4x128xf32>
    %cst_90 = arith.constant dense<0xFF800000> : vector<128xf32>
    %124 = vector.multi_reduction <maximumf>, %123, %cst_90 [0] : vector<4x128xf32> to vector<128xf32>
    %125 = vector.shape_cast %124 : vector<128xf32> to vector<1x128xf32>
    %126 = vector.extract_strided_slice %92 {offsets = [44, 0], sizes = [4, 128], strides = [1, 1]} : vector<65x128xf32> to vector<4x128xf32>
    %cst_91 = arith.constant dense<0xFF800000> : vector<128xf32>
    %127 = vector.multi_reduction <maximumf>, %126, %cst_91 [0] : vector<4x128xf32> to vector<128xf32>
    %128 = vector.shape_cast %127 : vector<128xf32> to vector<1x128xf32>
    %129 = vector.extract_strided_slice %92 {offsets = [48, 0], sizes = [4, 128], strides = [1, 1]} : vector<65x128xf32> to vector<4x128xf32>
    %cst_92 = arith.constant dense<0xFF800000> : vector<128xf32>
    %130 = vector.multi_reduction <maximumf>, %129, %cst_92 [0] : vector<4x128xf32> to vector<128xf32>
    %131 = vector.shape_cast %130 : vector<128xf32> to vector<1x128xf32>
    %132 = vector.extract_strided_slice %92 {offsets = [52, 0], sizes = [4, 128], strides = [1, 1]} : vector<65x128xf32> to vector<4x128xf32>
    %cst_93 = arith.constant dense<0xFF800000> : vector<128xf32>
    %133 = vector.multi_reduction <maximumf>, %132, %cst_93 [0] : vector<4x128xf32> to vector<128xf32>
    %134 = vector.shape_cast %133 : vector<128xf32> to vector<1x128xf32>
    %135 = vector.extract_strided_slice %92 {offsets = [56, 0], sizes = [4, 128], strides = [1, 1]} : vector<65x128xf32> to vector<4x128xf32>
    %cst_94 = arith.constant dense<0xFF800000> : vector<128xf32>
    %136 = vector.multi_reduction <maximumf>, %135, %cst_94 [0] : vector<4x128xf32> to vector<128xf32>
    %137 = vector.shape_cast %136 : vector<128xf32> to vector<1x128xf32>
    %138 = vector.extract_strided_slice %92 {offsets = [60, 0], sizes = [4, 128], strides = [1, 1]} : vector<65x128xf32> to vector<4x128xf32>
    %cst_95 = arith.constant dense<0xFF800000> : vector<128xf32>
    %139 = vector.multi_reduction <maximumf>, %138, %cst_95 [0] : vector<4x128xf32> to vector<128xf32>
    %140 = vector.shape_cast %139 : vector<128xf32> to vector<1x128xf32>
    %141 = tpu.concatenate %95, %98, %101, %104, %107, %110, %113, %116, %119, %122, %125, %128, %131, %134, %137, %140 in 0 : vector<1x128xf32>, vector<1x128xf32>, vector<1x128xf32>, vector<1x128xf32>, vector<1x128xf32>, vector<1x128xf32>, vector<1x128xf32>, vector<1x128xf32>, vector<1x128xf32>, vector<1x128xf32>, vector<1x128xf32>, vector<1x128xf32>, vector<1x128xf32>, vector<1x128xf32>, vector<1x128xf32>, vector<1x128xf32> -> vector<16x128xf32>
    %c0_96 = arith.constant 0 : index
    %c0_97 = arith.constant 0 : index
    %c0_98 = arith.constant 0 : index
    %142 = vector.load %arg11[%c0_96, %c0_97, %c0_98] : memref<1x16x128xf32, #tpu.memory_space<vmem>>, vector<1x16x128xf32>
    %143 = vector.shape_cast %142 : vector<1x16x128xf32> to vector<16x128xf32>
    %144 = vector.shape_cast %141 : vector<16x128xf32> to vector<1x16x128xf32>
    tpu.vector_store %arg11[%c0_96, %c0_97, %c0_98], %144 {strides = array<i32>} : memref<1x16x128xf32, #tpu.memory_space<vmem>>, vector<1x16x128xf32>,
    %cst_99 = arith.constant 0.000000e+00 : f32
    %145 = vector.broadcast %cst_99 : f32 to vector<3x128xf32>
    %c0_100 = arith.constant 0 : index
    %c0_101 = arith.constant 0 : index
    %146 = vector.load %arg15[%c0_100, %c0_101] : memref<24x128xf32, #tpu.memory_space<vmem>>, vector<3x128xf32>
    tpu.vector_store %arg15[%c0_100, %c0_101], %145 {strides = array<i32>} : memref<24x128xf32, #tpu.memory_space<vmem>>, vector<3x128xf32>,
    %cst_102 = arith.constant 0.000000e+00 : f32
    %147 = vector.broadcast %cst_102 : f32 to vector<6x128xf32>
    %c18 = arith.constant 18 : index
    %c0_103 = arith.constant 0 : index
    %148 = vector.load %arg15[%c18, %c0_103] : memref<24x128xf32, #tpu.memory_space<vmem>>, vector<6x128xf32>
    tpu.vector_store %arg15[%c18, %c0_103], %147 {strides = array<i32>} : memref<24x128xf32, #tpu.memory_space<vmem>>, vector<6x128xf32>,
    %c0_104 = arith.constant 0 : index
    %c0_105 = arith.constant 0 : index
    %c0_106 = arith.constant 0 : index
    %149 = vector.load %arg6[%c0_104, %c0_105, %c0_106] : memref<1x64x512xbf16, #tpu.memory_space<vmem>>, vector<1x64x512xbf16>
    %150 = vector.shape_cast %149 : vector<1x64x512xbf16> to vector<64x512xbf16>
    %c0_107 = arith.constant 0 : index
    %c0_108 = arith.constant 0 : index
    %151 = vector.load %arg7[%c0_107, %c0_108] : memref<512x128xbf16, #tpu.memory_space<vmem>>, vector<512x128xbf16>
    %cst_109 = arith.constant dense<0.000000e+00> : vector<64x128xf32>
    %152 = tpu.matmul %150, %151, %cst_109 {dimension_numbers = #tpu.dot_dimension_numbers<[1], [0], [0], [1], [0, 0, 1, 1], [], []>} : vector<64x512xbf16>, vector<512x128xbf16>, vector<64x128xf32> -> vector<64x128xf32>
    %c0_110 = arith.constant 0 : index
    %c0_111 = arith.constant 0 : index
    %153 = vector.load %arg16[%c0_110, %c0_111] : memref<64x128xf32, #tpu.memory_space<vmem>>, vector<64x128xf32>
    tpu.vector_store %arg16[%c0_110, %c0_111], %152 {strides = array<i32>} : memref<64x128xf32, #tpu.memory_space<vmem>>, vector<64x128xf32>,
    %c0_112 = arith.constant 0 : index
    %c0_113 = arith.constant 0 : index
    %154 = vector.load %arg16[%c0_112, %c0_113] : memref<64x128xf32, #tpu.memory_space<vmem>>, vector<16x128xf32>
    %c16 = arith.constant 16 : index
    %c0_114 = arith.constant 0 : index
    %155 = vector.load %arg16[%c16, %c0_114] : memref<64x128xf32, #tpu.memory_space<vmem>>, vector<16x128xf32>
    %156 = arith.maximumf %154, %155 : vector<16x128xf32>
    %c32 = arith.constant 32 : index
    %c0_115 = arith.constant 0 : index
    %157 = vector.load %arg16[%c32, %c0_115] : memref<64x128xf32, #tpu.memory_space<vmem>>, vector<16x128xf32>
    %158 = arith.maximumf %156, %157 : vector<16x128xf32>
    %c48 = arith.constant 48 : index
    %c0_116 = arith.constant 0 : index
    %159 = vector.load %arg16[%c48, %c0_116] : memref<64x128xf32, #tpu.memory_space<vmem>>, vector<16x128xf32>
    %160 = arith.maximumf %158, %159 : vector<16x128xf32>
    %cst_117 = arith.constant 0.000000e+00 : f32
    %161 = vector.broadcast %cst_117 : f32 to vector<16x128xf32>
    %162 = arith.maximumf %160, %161 : vector<16x128xf32>
    %163 = vector.extract_strided_slice %162 {offsets = [0, 0], sizes = [15, 128], strides = [1, 1]} : vector<16x128xf32> to vector<15x128xf32>
    %c3_118 = arith.constant 3 : index
    %c0_119 = arith.constant 0 : index
    %164 = vector.load %arg15[%c3_118, %c0_119] : memref<24x128xf32, #tpu.memory_space<vmem>>, vector<15x128xf32>
    tpu.vector_store %arg15[%c3_118, %c0_119], %163 {strides = array<i32>} : memref<24x128xf32, #tpu.memory_space<vmem>>, vector<15x128xf32>,
    %c0_120 = arith.constant 0 : index
    %c0_121 = arith.constant 0 : index
    %165 = vector.load %arg15[%c0_120, %c0_121] : memref<24x128xf32, #tpu.memory_space<vmem>>, vector<16x128xf32>
    %166 = arith.truncf %165 : vector<16x128xf32> to vector<16x128xbf16>
    %c1_122 = arith.constant 1 : index
    %c0_123 = arith.constant 0 : index
    %167 = vector.load %arg15[%c1_122, %c0_123] : memref<24x128xf32, #tpu.memory_space<vmem>>, vector<16x128xf32>
    %168 = arith.truncf %167 : vector<16x128xf32> to vector<16x128xbf16>
    %c2_124 = arith.constant 2 : index
    %c0_125 = arith.constant 0 : index
    %169 = vector.load %arg15[%c2_124, %c0_125] : memref<24x128xf32, #tpu.memory_space<vmem>>, vector<16x128xf32>
    %170 = arith.truncf %169 : vector<16x128xf32> to vector<16x128xbf16>
    %c3_126 = arith.constant 3 : index
    %c0_127 = arith.constant 0 : index
    %171 = vector.load %arg15[%c3_126, %c0_127] : memref<24x128xf32, #tpu.memory_space<vmem>>, vector<16x128xf32>
    %172 = arith.truncf %171 : vector<16x128xf32> to vector<16x128xbf16>
    %c4_128 = arith.constant 4 : index
    %c0_129 = arith.constant 0 : index
    %173 = vector.load %arg15[%c4_128, %c0_129] : memref<24x128xf32, #tpu.memory_space<vmem>>, vector<16x128xf32>
    %174 = arith.truncf %173 : vector<16x128xf32> to vector<16x128xbf16>
    %c5_130 = arith.constant 5 : index
    %c0_131 = arith.constant 0 : index
    %175 = vector.load %arg15[%c5_130, %c0_131] : memref<24x128xf32, #tpu.memory_space<vmem>>, vector<16x128xf32>
    %176 = arith.truncf %175 : vector<16x128xf32> to vector<16x128xbf16>
    %177 = tpu.concatenate %166, %168, %170, %172, %174, %176 in 1 : vector<16x128xbf16>, vector<16x128xbf16>, vector<16x128xbf16>, vector<16x128xbf16>, vector<16x128xbf16>, vector<16x128xbf16> -> vector<16x768xbf16>
    %c0_132 = arith.constant 0 : index
    %c0_133 = arith.constant 0 : index
    %178 = vector.load %arg8[%c0_132, %c0_133] : memref<768x128xbf16, #tpu.memory_space<vmem>>, vector<768x128xbf16>
    %cst_134 = arith.constant dense<0.000000e+00> : vector<16x128xf32>
    %179 = tpu.matmul %177, %178, %cst_134 {dimension_numbers = #tpu.dot_dimension_numbers<[1], [0], [0], [1], [0, 0, 1, 1], [], []>} : vector<16x768xbf16>, vector<768x128xbf16>, vector<16x128xf32> -> vector<16x128xf32>
    %cst_135 = arith.constant 0.000000e+00 : f32
    %180 = vector.broadcast %cst_135 : f32 to vector<16x128xf32>
    %181 = arith.maximumf %179, %180 : vector<16x128xf32>
    %c3_136 = arith.constant 3 : index
    %c0_137 = arith.constant 0 : index
    %182 = vector.load %arg15[%c3_136, %c0_137] : memref<24x128xf32, #tpu.memory_space<vmem>>, vector<16x128xf32>
    tpu.vector_store %arg15[%c3_136, %c0_137], %181 {strides = array<i32>} : memref<24x128xf32, #tpu.memory_space<vmem>>, vector<16x128xf32>,
    %c0_138 = arith.constant 0 : index
    %c0_139 = arith.constant 0 : index
    %183 = vector.load %arg15[%c0_138, %c0_139] : memref<24x128xf32, #tpu.memory_space<vmem>>, vector<17x128xf32>
    %184 = arith.truncf %183 : vector<17x128xf32> to vector<17x128xbf16>
    %c1_140 = arith.constant 1 : index
    %c0_141 = arith.constant 0 : index
    %185 = vector.load %arg15[%c1_140, %c0_141] : memref<24x128xf32, #tpu.memory_space<vmem>>, vector<17x128xf32>
    %186 = arith.truncf %185 : vector<17x128xf32> to vector<17x128xbf16>
    %c2_142 = arith.constant 2 : index
    %c0_143 = arith.constant 0 : index
    %187 = vector.load %arg15[%c2_142, %c0_143] : memref<24x128xf32, #tpu.memory_space<vmem>>, vector<17x128xf32>
    %188 = arith.truncf %187 : vector<17x128xf32> to vector<17x128xbf16>
    %c3_144 = arith.constant 3 : index
    %c0_145 = arith.constant 0 : index
    %189 = vector.load %arg15[%c3_144, %c0_145] : memref<24x128xf32, #tpu.memory_space<vmem>>, vector<17x128xf32>
    %190 = arith.truncf %189 : vector<17x128xf32> to vector<17x128xbf16>
    %c4_146 = arith.constant 4 : index
    %c0_147 = arith.constant 0 : index
    %191 = vector.load %arg15[%c4_146, %c0_147] : memref<24x128xf32, #tpu.memory_space<vmem>>, vector<17x128xf32>
    %192 = arith.truncf %191 : vector<17x128xf32> to vector<17x128xbf16>
    %c5_148 = arith.constant 5 : index
    %c0_149 = arith.constant 0 : index
    %193 = vector.load %arg15[%c5_148, %c0_149] : memref<24x128xf32, #tpu.memory_space<vmem>>, vector<17x128xf32>
    %194 = arith.truncf %193 : vector<17x128xf32> to vector<17x128xbf16>
    %195 = tpu.concatenate %184, %186, %188, %190, %192, %194 in 1 : vector<17x128xbf16>, vector<17x128xbf16>, vector<17x128xbf16>, vector<17x128xbf16>, vector<17x128xbf16>, vector<17x128xbf16> -> vector<17x768xbf16>
    %c0_150 = arith.constant 0 : index
    %c0_151 = arith.constant 0 : index
    %196 = vector.load %arg9[%c0_150, %c0_151] : memref<768x128xbf16, #tpu.memory_space<vmem>>, vector<768x128xbf16>
    %cst_152 = arith.constant dense<0.000000e+00> : vector<17x128xf32>
    %197 = tpu.matmul %195, %196, %cst_152 {dimension_numbers = #tpu.dot_dimension_numbers<[1], [0], [0], [1], [0, 0, 1, 1], [], []>} : vector<17x768xbf16>, vector<768x128xbf16>, vector<17x128xf32> -> vector<17x128xf32>
    %cst_153 = arith.constant 0.000000e+00 : f32
    %198 = vector.broadcast %cst_153 : f32 to vector<17x128xf32>
    %199 = arith.maximumf %197, %198 : vector<17x128xf32>
    %c3_154 = arith.constant 3 : index
    %c0_155 = arith.constant 0 : index
    %200 = vector.load %arg15[%c3_154, %c0_155] : memref<24x128xf32, #tpu.memory_space<vmem>>, vector<17x128xf32>
    tpu.vector_store %arg15[%c3_154, %c0_155], %199 {strides = array<i32>} : memref<24x128xf32, #tpu.memory_space<vmem>>, vector<17x128xf32>,
    %c0_156 = arith.constant 0 : index
    %c0_157 = arith.constant 0 : index
    %201 = vector.load %arg15[%c0_156, %c0_157] : memref<24x128xf32, #tpu.memory_space<vmem>>, vector<18x128xf32>
    %202 = arith.truncf %201 : vector<18x128xf32> to vector<18x128xbf16>
    %c1_158 = arith.constant 1 : index
    %c0_159 = arith.constant 0 : index
    %203 = vector.load %arg15[%c1_158, %c0_159] : memref<24x128xf32, #tpu.memory_space<vmem>>, vector<18x128xf32>
    %204 = arith.truncf %203 : vector<18x128xf32> to vector<18x128xbf16>
    %c2_160 = arith.constant 2 : index
    %c0_161 = arith.constant 0 : index
    %205 = vector.load %arg15[%c2_160, %c0_161] : memref<24x128xf32, #tpu.memory_space<vmem>>, vector<18x128xf32>
    %206 = arith.truncf %205 : vector<18x128xf32> to vector<18x128xbf16>
    %c3_162 = arith.constant 3 : index
    %c0_163 = arith.constant 0 : index
    %207 = vector.load %arg15[%c3_162, %c0_163] : memref<24x128xf32, #tpu.memory_space<vmem>>, vector<18x128xf32>
    %208 = arith.truncf %207 : vector<18x128xf32> to vector<18x128xbf16>
    %c4_164 = arith.constant 4 : index
    %c0_165 = arith.constant 0 : index
    %209 = vector.load %arg15[%c4_164, %c0_165] : memref<24x128xf32, #tpu.memory_space<vmem>>, vector<18x128xf32>
    %210 = arith.truncf %209 : vector<18x128xf32> to vector<18x128xbf16>
    %c5_166 = arith.constant 5 : index
    %c0_167 = arith.constant 0 : index
    %211 = vector.load %arg15[%c5_166, %c0_167] : memref<24x128xf32, #tpu.memory_space<vmem>>, vector<18x128xf32>
    %212 = arith.truncf %211 : vector<18x128xf32> to vector<18x128xbf16>
    %213 = tpu.concatenate %202, %204, %206, %208, %210, %212 in 1 : vector<18x128xbf16>, vector<18x128xbf16>, vector<18x128xbf16>, vector<18x128xbf16>, vector<18x128xbf16>, vector<18x128xbf16> -> vector<18x768xbf16>
    %c0_168 = arith.constant 0 : index
    %c0_169 = arith.constant 0 : index
    %214 = vector.load %arg10[%c0_168, %c0_169] : memref<768x128xbf16, #tpu.memory_space<vmem>>, vector<768x128xbf16>
    %cst_170 = arith.constant dense<0.000000e+00> : vector<18x128xf32>
    %215 = tpu.matmul %213, %214, %cst_170 {dimension_numbers = #tpu.dot_dimension_numbers<[1], [0], [0], [1], [0, 0, 1, 1], [], []>} : vector<18x768xbf16>, vector<768x128xbf16>, vector<18x128xf32> -> vector<18x128xf32>
    %cst_171 = arith.constant 0.000000e+00 : f32
    %216 = vector.broadcast %cst_171 : f32 to vector<18x128xf32>
    %217 = arith.maximumf %215, %216 : vector<18x128xf32>
    %218 = vector.extract_strided_slice %217 {offsets = [0, 0], sizes = [2, 128], strides = [1, 1]} : vector<18x128xf32> to vector<2x128xf32>
    %cst_172 = arith.constant dense<0xFF800000> : vector<128xf32>
    %219 = vector.multi_reduction <maximumf>, %218, %cst_172 [0] : vector<2x128xf32> to vector<128xf32>
    %220 = vector.shape_cast %219 : vector<128xf32> to vector<1x128xf32>
    %221 = vector.extract_strided_slice %217 {offsets = [2, 0], sizes = [2, 128], strides = [1, 1]} : vector<18x128xf32> to vector<2x128xf32>
    %cst_173 = arith.constant dense<0xFF800000> : vector<128xf32>
    %222 = vector.multi_reduction <maximumf>, %221, %cst_173 [0] : vector<2x128xf32> to vector<128xf32>
    %223 = vector.shape_cast %222 : vector<128xf32> to vector<1x128xf32>
    %224 = vector.extract_strided_slice %217 {offsets = [4, 0], sizes = [2, 128], strides = [1, 1]} : vector<18x128xf32> to vector<2x128xf32>
    %cst_174 = arith.constant dense<0xFF800000> : vector<128xf32>
    %225 = vector.multi_reduction <maximumf>, %224, %cst_174 [0] : vector<2x128xf32> to vector<128xf32>
    %226 = vector.shape_cast %225 : vector<128xf32> to vector<1x128xf32>
    %227 = vector.extract_strided_slice %217 {offsets = [6, 0], sizes = [2, 128], strides = [1, 1]} : vector<18x128xf32> to vector<2x128xf32>
    %cst_175 = arith.constant dense<0xFF800000> : vector<128xf32>
    %228 = vector.multi_reduction <maximumf>, %227, %cst_175 [0] : vector<2x128xf32> to vector<128xf32>
    %229 = vector.shape_cast %228 : vector<128xf32> to vector<1x128xf32>
    %230 = vector.extract_strided_slice %217 {offsets = [8, 0], sizes = [2, 128], strides = [1, 1]} : vector<18x128xf32> to vector<2x128xf32>
    %cst_176 = arith.constant dense<0xFF800000> : vector<128xf32>
    %231 = vector.multi_reduction <maximumf>, %230, %cst_176 [0] : vector<2x128xf32> to vector<128xf32>
    %232 = vector.shape_cast %231 : vector<128xf32> to vector<1x128xf32>
    %233 = vector.extract_strided_slice %217 {offsets = [10, 0], sizes = [2, 128], strides = [1, 1]} : vector<18x128xf32> to vector<2x128xf32>
    %cst_177 = arith.constant dense<0xFF800000> : vector<128xf32>
    %234 = vector.multi_reduction <maximumf>, %233, %cst_177 [0] : vector<2x128xf32> to vector<128xf32>
    %235 = vector.shape_cast %234 : vector<128xf32> to vector<1x128xf32>
    %236 = vector.extract_strided_slice %217 {offsets = [12, 0], sizes = [2, 128], strides = [1, 1]} : vector<18x128xf32> to vector<2x128xf32>
    %cst_178 = arith.constant dense<0xFF800000> : vector<128xf32>
    %237 = vector.multi_reduction <maximumf>, %236, %cst_178 [0] : vector<2x128xf32> to vector<128xf32>
    %238 = vector.shape_cast %237 : vector<128xf32> to vector<1x128xf32>
    %239 = vector.extract_strided_slice %217 {offsets = [14, 0], sizes = [2, 128], strides = [1, 1]} : vector<18x128xf32> to vector<2x128xf32>
    %cst_179 = arith.constant dense<0xFF800000> : vector<128xf32>
    %240 = vector.multi_reduction <maximumf>, %239, %cst_179 [0] : vector<2x128xf32> to vector<128xf32>
    %241 = vector.shape_cast %240 : vector<128xf32> to vector<1x128xf32>
    %242 = vector.extract_strided_slice %217 {offsets = [16, 0], sizes = [2, 128], strides = [1, 1]} : vector<18x128xf32> to vector<2x128xf32>
    %cst_180 = arith.constant dense<0xFF800000> : vector<128xf32>
    %243 = vector.multi_reduction <maximumf>, %242, %cst_180 [0] : vector<2x128xf32> to vector<128xf32>
    %244 = vector.shape_cast %243 : vector<128xf32> to vector<1x128xf32>
    %245 = tpu.concatenate %220, %223, %226, %229, %232, %235, %238, %241, %244 in 0 : vector<1x128xf32>, vector<1x128xf32>, vector<1x128xf32>, vector<1x128xf32>, vector<1x128xf32>, vector<1x128xf32>, vector<1x128xf32>, vector<1x128xf32>, vector<1x128xf32> -> vector<9x128xf32>
    %c0_181 = arith.constant 0 : index
    %c0_182 = arith.constant 0 : index
    %c0_183 = arith.constant 0 : index
    %246 = vector.load %arg12[%c0_181, %c0_182, %c0_183] : memref<1x9x128xf32, #tpu.memory_space<vmem>>, vector<1x9x128xf32>
    %247 = vector.shape_cast %246 : vector<1x9x128xf32> to vector<9x128xf32>
    %248 = vector.shape_cast %245 : vector<9x128xf32> to vector<1x9x128xf32>
    tpu.vector_store %arg12[%c0_181, %c0_182, %c0_183], %248 {strides = array<i32>} : memref<1x9x128xf32, #tpu.memory_space<vmem>>, vector<1x9x128xf32>,
    return
  }
  func.func @transform_0(%arg0: i32) -> (i32, i32, i32) {
    %c0_i32 = arith.constant 0 : i32
    %c0_i32_0 = arith.constant 0 : i32
    %c0_i32_1 = arith.constant 0 : i32
    return %arg0, %c0_i32, %c0_i32_0 : i32, i32, i32
  }
  func.func @transform_1(%arg0: i32) -> (i32, i32) {
    %c0_i32 = arith.constant 0 : i32
    %c0_i32_0 = arith.constant 0 : i32
    %c0_i32_1 = arith.constant 0 : i32
    return %c0_i32, %c0_i32_0 : i32, i32
  }
  func.func @transform_2(%arg0: i32) -> (i32, i32) {
    %c0_i32 = arith.constant 0 : i32
    %c0_i32_0 = arith.constant 0 : i32
    %c0_i32_1 = arith.constant 0 : i32
    return %c0_i32, %c0_i32_0 : i32, i32
  }
  func.func @transform_3(%arg0: i32) -> (i32, i32) {
    %c0_i32 = arith.constant 0 : i32
    %c0_i32_0 = arith.constant 0 : i32
    %c0_i32_1 = arith.constant 0 : i32
    return %c0_i32, %c0_i32_0 : i32, i32
  }
  func.func @transform_4(%arg0: i32) -> (i32, i32) {
    %c0_i32 = arith.constant 0 : i32
    %c0_i32_0 = arith.constant 0 : i32
    %c0_i32_1 = arith.constant 0 : i32
    return %c0_i32, %c0_i32_0 : i32, i32
  }
  func.func @transform_5(%arg0: i32) -> (i32, i32, i32) {
    %c0_i32 = arith.constant 0 : i32
    %c0_i32_0 = arith.constant 0 : i32
    %c0_i32_1 = arith.constant 0 : i32
    return %arg0, %c0_i32, %c0_i32_0 : i32, i32, i32
  }
  func.func @transform_6(%arg0: i32) -> (i32, i32) {
    %c0_i32 = arith.constant 0 : i32
    %c0_i32_0 = arith.constant 0 : i32
    %c0_i32_1 = arith.constant 0 : i32
    return %c0_i32, %c0_i32_0 : i32, i32
  }
  func.func @transform_7(%arg0: i32) -> (i32, i32) {
    %c0_i32 = arith.constant 0 : i32
    %c0_i32_0 = arith.constant 0 : i32
    %c0_i32_1 = arith.constant 0 : i32
    return %c0_i32, %c0_i32_0 : i32, i32
  }
  func.func @transform_8(%arg0: i32) -> (i32, i32) {
    %c0_i32 = arith.constant 0 : i32
    %c0_i32_0 = arith.constant 0 : i32
    %c0_i32_1 = arith.constant 0 : i32
    return %c0_i32, %c0_i32_0 : i32, i32
  }
  func.func @transform_9(%arg0: i32) -> (i32, i32) {
    %c0_i32 = arith.constant 0 : i32
    %c0_i32_0 = arith.constant 0 : i32
    %c0_i32_1 = arith.constant 0 : i32
    return %c0_i32, %c0_i32_0 : i32, i32
  }
  func.func @transform_10(%arg0: i32) -> (i32, i32, i32) {
    %c0_i32 = arith.constant 0 : i32
    %c0_i32_0 = arith.constant 0 : i32
    %c0_i32_1 = arith.constant 0 : i32
    return %arg0, %c0_i32, %c0_i32_0 : i32, i32, i32
  }
  func.func @transform_11(%arg0: i32) -> (i32, i32, i32) {
    %c0_i32 = arith.constant 0 : i32
    %c0_i32_0 = arith.constant 0 : i32
    %c0_i32_1 = arith.constant 0 : i32
    return %arg0, %c0_i32, %c0_i32_0 : i32, i32, i32
  }
}

</mosaic_0001>

<bundles_post_ra>
// kernel: feature_extraction.1
= control target key start
LH: loop header
LB: loop body
LE: loop exit
PB: predicated region body
PF: predicated region fallthrough
CT: control target
= control target key end

     0   :  { %s8298_s17 = smov 0   ;;  %s9844_s0 = inlined_call_operand.vmem [shape: bf16[2,512,128], index: 0, kind: input, shape index: {}]   ;;  %s9845_s1 = inlined_call_operand.vmem [shape: bf16[128,128], index: 1, kind: input, shape index: {}]   ;;  %s9846_s2 = inlined_call_operand.vmem [shape: bf16[1024,128], index: 2, kind: input, shape index: {}]   ;;  %s9847_s3 = inlined_call_operand.vmem [shape: bf16[1024,128], index: 3, kind: input, shape index: {}]   ;;  %s9848_s4 = inlined_call_operand.vmem [shape: bf16[1024,128], index: 4, kind: input, shape index: {}]   ;;  %s9849_s5 = inlined_call_operand.vmem [shape: bf16[2,64,512], index: 5, kind: input, shape index: {}]   ;;  %s9850_s6 = inlined_call_operand.vmem [shape: bf16[512,128], index: 6, kind: input, shape index: {}]   ;;  %s9851_s7 = inlined_call_operand.vmem [shape: bf16[768,128], index: 7, kind: input, shape index: {}]   ;;  %s9852_s8 = inlined_call_operand.vmem [shape: bf16[768,128], index: 8, kind: input, shape index: {}]   ;;  %s9853_s9 = inlined_call_operand.vmem [shape: bf16[768,128], index: 9, kind: input, shape index: {}]   ;;  %s9854_s10 = inlined_call_operand.vmem [shape: f32[2,16,128], index: 10, kind: output, shape index: {0}]   ;;  %s9855_s11 = inlined_call_operand.vmem [shape: f32[2,9,128], index: 11, kind: output, shape index: {1}]  }
   0x1 LB: > { %s6391_s18 = sadd.s32 4294967295, %s8235_s17   ;;  %p6395_p0 = scmp.ge.s32.totalorder %s8235_s17, 1  ;;  %s8235_s17 = sphi %s8298_s17, %s22_s17  }
   0x2   : > { %p350_p1 = scmp.lt.s32.totalorder %s8235_s17, 3 }
   0x4   : > { %p351_p2 = pnand %p6395_p0, %p350_p1 }
   0x5   : > { %p400_p3 = scmp.lt.s32.totalorder (!%p351_p2), %s6391_s18, 1 }
   0x6   : > { %354 = sbr.rel (%p351_p2) target bundleno = 2014 (0x7de), region = 60 }
   0xb   : > { %v7797_v0 = vld [vmem:[%s9845_s1 + $0x38] sm:$0xff]   ;;  %v7798_v1 = vld [vmem:[%s9845_s1 + $0x30] sm:$0xff]   ;;  %s9857_s18 = smov (!%p400_p3, %s6391_s18), 1  ;;  %v7799_v2 = vld [vmem:[%s9845_s1 + $0x28] sm:$0xff]   ;;  %v8237_v50 = vmov 0.0   ;;  %vm3916_vm0 = vcmask 1043456  }
   0xc   : > { %7692 = vmatprep.subr.bf16.mxu0 %v7797_v0  ;;  %s6830_s25 = sshll.u32 %s9857_s18, 8  ;;  %v7800_v3 = vld [vmem:[%s9845_s1 + $0x20] sm:$0xff]   ;;  %v7801_v5 = vld [vmem:[%s9845_s1 + $0x18] sm:$0xff]   ;;  %v7802_v6 = vld [vmem:[%s9845_s1 + $0x10] sm:$0xff]   ;;  %421 = vst [vmem:[#allocation2] sm:$0xf] %v8237_v50 }
   0xd   : > { %7693 = vmatpush3.bf16.msra.mxu0 %v7797_v0  ;;  %s8321_s28 = scalar_lea.vmem %s9844_s0, %s6830_s25  ;;  %v7803_v7 = vld [vmem:[%s9845_s1 + $0x8] sm:$0xff]   ;;  %v7804_v8 = vld [vmem:[%s9845_s1] sm:$0xff]   ;;  %v7837_v40 = vld [vmem:[%s9846_s2 + $0x78] sm:$0xff]   ;;  %422 = vst [vmem:[#allocation2 + $0x42] sm:$0x3f] %v8237_v50  ;;  %s6831_s23 = sshll.u32 %s9857_s18, 7 }
   0xe   : > { %7694 = vmatprep.subr.bf16.mxu0 %v7798_v1  ;;  %v7805_v4 = vld [vmem:[%s8321_s28] sm:$0xff]   ;;  %v7806_v9 = vld [vmem:[%s8321_s28 + $0x8] sm:$0xff]   ;;  %v7807_v10 = vld [vmem:[%s8321_s28 + $0x10] sm:$0xff]   ;;  %6874 = vmatprep.subr.bf16.mxu1 %v7837_v40  ;;  %4052 = vst [vmem:[#allocation4] sm:$0x7] %v8237_v50  ;;  %s8997_s26 = scalar_lea.vmem %s9849_s5, %s6831_s23  ;;  %vm3924_vm1 = vcmask 1047556  }
   0xf   : > { %7708 = vmatprep.mubr.bf16.mxu0 %v7805_v4  ;;  %v7808_v11 = vld [vmem:[%s8321_s28 + $0x18] sm:$0xff]   ;;  %v7809_v12 = vld [vmem:[%s8321_s28 + $0x20] sm:$0xff]   ;;  %v7810_v13 = vld [vmem:[%s8321_s28 + $0x28] sm:$0xff]   ;;  %4053 = vst [vmem:[#allocation4 + $0x12] sm:$0x3f] %v8237_v50  ;;  %vm4030_vm2 = vcmask 1040384  }
  0x10   : > { %v7811_v14 = vld [vmem:[%s8321_s28 + $0x30] sm:$0xff]   ;;  %v7812_v15 = vld [vmem:[%s8321_s28 + $0x38] sm:$0xff]   ;;  %v7813_v16 = vld [vmem:[%s8321_s28 + $0x40] sm:$0xff]   ;;  %vm4032_vm3 = vcmask 1041408   ;;  %vm4034_vm4 = vcmask 1042432   ;;  %vm4037_vm5 = vcmask 1044480  }
  0x11   : > { %7695 = vmatpush3.bf16.msra.mxu0 %v7798_v1  ;;  %v7814_v17 = vld [vmem:[%s8321_s28 + $0x48] sm:$0xff]   ;;  %v7815_v18 = vld [vmem:[%s8321_s28 + $0x50] sm:$0xff]   ;;  %v7816_v19 = vld [vmem:[%s8321_s28 + $0x58] sm:$0xff]   ;;  %vm4039_vm6 = vcmask 1045504   ;;  %vm4041_vm7 = vcmask 1046528   ;;  %s6832_s20 = sshll.u32 %s9857_s18, 4 }
  0x12   : > { %7696 = vmatprep.subr.bf16.mxu0 %v7799_v2  ;;  %v7817_v20 = vld [vmem:[%s8321_s28 + $0x60] sm:$0xff]   ;;  %v7818_v21 = vld [vmem:[%s8321_s28 + $0x68] sm:$0xff]   ;;  %v7819_v22 = vld [vmem:[%s8321_s28 + $0x70] sm:$0xff]   ;;  %s414_s23 = scalar_lea.vmem %s9854_s10, %s6832_s20  ;;  %vm6223_vm8 = vcmask 1043458   ;;  %vm6231_vm9 = vcmask 1045508   ;;  %vm6239_vm10 = vcmask 1047558   ;;  %s419_s24 = scalar_lea.vmem %s9855_s11, %s6832_s20 }
  0x13   : > { %v7820_v23 = vld [vmem:[%s8321_s28 + $0x78] sm:$0xff]   ;;  %v7821_v24 = vld [vmem:[%s8321_s28 + $0x80] sm:$0xff]   ;;  %v7822_v25 = vld [vmem:[%s8321_s28 + $0x88] sm:$0xff]  }
  0x14   : > { %v7823_v26 = vld [vmem:[%s8321_s28 + $0x90] sm:$0xff]   ;;  %v7824_v27 = vld [vmem:[%s8321_s28 + $0x98] sm:$0xff]   ;;  %v7825_v28 = vld [vmem:[%s8321_s28 + $0xa0] sm:$0xff]  }
  0x15   : > { %7697 = vmatpush3.bf16.msra.mxu0 %v7799_v2  ;;  %v7826_v29 = vld [vmem:[%s8321_s28 + $0xa8] sm:$0xff]   ;;  %v7827_v30 = vld [vmem:[%s8321_s28 + $0xb0] sm:$0xff]   ;;  %v7828_v31 = vld [vmem:[%s8321_s28 + $0xb8] sm:$0xff]  }
  0x16   : > { %7698 = vmatprep.subr.bf16.mxu0 %v7800_v3  ;;  %v7829_v32 = vld [vmem:[%s8321_s28 + $0xc0] sm:$0xff]   ;;  %v7830_v33 = vld [vmem:[%s8321_s28 + $0xc8] sm:$0xff]   ;;  %v7831_v34 = vld [vmem:[%s8321_s28 + $0xd0] sm:$0xff]  }
  0x17   : > { %v7832_v35 = vld [vmem:[%s8321_s28 + $0xd8] sm:$0xff]   ;;  %v7833_v36 = vld [vmem:[%s8321_s28 + $0xe0] sm:$0xff]   ;;  %v7834_v37 = vld [vmem:[%s8321_s28 + $0xe8] sm:$0xff]  }
  0x18   : > { %v7835_v38 = vld [vmem:[%s8321_s28 + $0xf0] sm:$0xff]   ;;  %v7836_v39 = vld [vmem:[%s8321_s28 + $0xf8] sm:$0xff]   ;;  %v7841_v44 = vld [vmem:[%s9846_s2 + $0x68] sm:$0xff]  }
  0x19   : > { %7699 = vmatpush3.bf16.msra.mxu0 %v7800_v3  ;;  %v7838_v41 = vld [vmem:[%s9846_s2 + $0x38] sm:$0xff]   ;;  %v7839_v42 = vld [vmem:[%s9846_s2 + $0x70] sm:$0xff]   ;;  %v7842_v45 = vld [vmem:[%s9846_s2 + $0x28] sm:$0xff]  }
  0x1a   : > { %7700 = vmatprep.subr.bf16.mxu0 %v7801_v5  ;;  %6875 = vmatpush3.bf16.msra.mxu1 %v7838_v41  ;;  %v7840_v43 = vld [vmem:[%s9846_s2 + $0x30] sm:$0xff]   ;;  %v7843_v46 = vld [vmem:[%s9846_s2 + $0x60] sm:$0xff]   ;;  %v7845_v48 = vld [vmem:[%s9846_s2 + $0x58] sm:$0xff]  }
  0x1b   : > { %6876 = vmatprep.subr.bf16.mxu1 %v7839_v42  ;;  %v7844_v47 = vld [vmem:[%s9846_s2 + $0x20] sm:$0xff]   ;;  %v7846_v49 = vld [vmem:[%s9846_s2 + $0x18] sm:$0xff]   ;;  %v7847_v51 = vld [vmem:[%s9846_s2 + $0x50] sm:$0xff]  }
  0x1c   : > { %v7848_v52 = vld [vmem:[%s9846_s2 + $0x10] sm:$0xff]   ;;  %v7849_v53 = vld [vmem:[%s9846_s2 + $0x48] sm:$0xff]   ;;  %v7851_v56 = vld [vmem:[%s9846_s2 + $0x40] sm:$0xff]  }
  0x1d   : > { %7701 = vmatpush3.bf16.msra.mxu0 %v7801_v5  ;;  %v7850_v54 = vld [vmem:[%s9846_s2 + $0x8] sm:$0xff]   ;;  %v7852_v57 = vld [vmem:[%s9846_s2] sm:$0xff]   ;;  %v7853_v60 = vld [vmem:[%s9846_s2 + $0xf8] sm:$0xff]  }
  0x1e   : > { %7702 = vmatprep.subr.bf16.mxu0 %v7802_v6  ;;  %6877 = vmatpush3.bf16.msra.mxu1 %v7840_v43 }
  0x1f   : > { %6878 = vmatprep.subr.bf16.mxu1 %v7841_v44 }
  0x21   : > { %7703 = vmatpush3.bf16.msra.mxu0 %v7802_v6 }
  0x22   : > { %7704 = vmatprep.subr.bf16.mxu0 %v7803_v7  ;;  %6879 = vmatpush3.bf16.msra.mxu1 %v7842_v45 }
  0x23   : > { %6880 = vmatprep.subr.bf16.mxu1 %v7843_v46 }
  0x25   : > { %7705 = vmatpush3.bf16.msra.mxu0 %v7803_v7 }
  0x26   : > { %7706 = vmatprep.subr.bf16.mxu0 %v7804_v8  ;;  %6881 = vmatpush3.bf16.msra.mxu1 %v7844_v47 }
  0x27   : > { %6882 = vmatprep.subr.bf16.mxu1 %v7845_v48 }
  0x29   : > { %7707 = vmatpush3.bf16.msra.mxu0 %v7804_v8 }
  0x2a   : > { %6883 = vmatpush3.bf16.msra.mxu1 %v7846_v49 }
  0x2b   : > { %6884 = vmatprep.subr.bf16.mxu1 %v7847_v51 }
  0x2c   : > { %7709 = vmatmul.mubr.bf16.vlgmr.msra.gmra.mxu0 %v7806_v9 }
  0x2d   : > { %7712 = vmatprep.mubr.bf16.mxu0 %v7807_v10 }
  0x2e   : > { %6885 = vmatpush3.bf16.msra.mxu1 %v7848_v52 }
  0x2f   : > { %6886 = vmatprep.subr.bf16.mxu1 %v7849_v53 }
  0x32   : > { %6887 = vmatpush3.bf16.msra.mxu1 %v7850_v54 }
  0x33   : > { %6888 = vmatprep.subr.bf16.mxu1 %v7851_v56 }
  0x34   : > { %7713 = vmatmul.mubr.bf16.gmra.mxu0 %v7808_v11 }
  0x35   : > { %7716 = vmatprep.mubr.bf16.mxu0 %v7809_v12 }
  0x36   : > { %6889 = vmatpush3.bf16.msra.mxu1 %v7852_v57 }
  0x37   : > { %6914 = vmatprep.subr.bf16.mxu1 %v7853_v60 }
  0x3c   : > { %7717 = vmatmul.mubr.bf16.gmra.mxu0 %v7810_v13 }
  0x3d   : > { %7720 = vmatprep.mubr.bf16.mxu0 %v7811_v14 }
  0x44   : > { %7721 = vmatmul.mubr.bf16.gmra.mxu0 %v7812_v15 }
  0x45   : > { %7724 = vmatprep.mubr.bf16.mxu0 %v7813_v16 }
  0x4c   : > { %7725 = vmatmul.mubr.bf16.gmra.mxu0 %v7814_v17 }
  0x4d   : > { %7728 = vmatprep.mubr.bf16.mxu0 %v7815_v18 }
  0x54   : > { %7729 = vmatmul.mubr.bf16.gmra.mxu0 %v7816_v19 }
  0x55   : > { %7732 = vmatprep.mubr.bf16.mxu0 %v7817_v20 }
  0x5c   : > { %7733 = vmatmul.mubr.bf16.gmra.mxu0 %v7818_v21 }
  0x5d   : > { %7736 = vmatprep.mubr.bf16.mxu0 %v7819_v22 }
  0x64   : > { %7737 = vmatmul.mubr.bf16.gmra.mxu0 %v7820_v23 }
  0x65   : > { %7740 = vmatprep.mubr.bf16.mxu0 %v7821_v24 }
  0x6c   : > { %7741 = vmatmul.mubr.bf16.gmra.mxu0 %v7822_v25 }
  0x6d   : > { %7744 = vmatprep.mubr.bf16.mxu0 %v7823_v26 }
  0x74   : > { %7745 = vmatmul.mubr.bf16.gmra.mxu0 %v7824_v27 }
  0x75   : > { %7748 = vmatprep.mubr.bf16.mxu0 %v7825_v28 }
  0x7c   : > { %7749 = vmatmul.mubr.bf16.gmra.mxu0 %v7826_v29 }
  0x7d   : > { %7752 = vmatprep.mubr.bf16.mxu0 %v7827_v30 }
  0x84   : > { %7753 = vmatmul.mubr.bf16.gmra.mxu0 %v7828_v31 }
  0x85   : > { %7756 = vmatprep.mubr.bf16.mxu0 %v7829_v32 }
  0x8c   : > { %7757 = vmatmul.mubr.bf16.gmra.mxu0 %v7830_v33 }
  0x8d   : > { %7760 = vmatprep.mubr.bf16.mxu0 %v7831_v34 }
  0x94   : > { %7761 = vmatmul.mubr.bf16.gmra.mxu0 %v7832_v35 }
  0x95   : > { %7764 = vmatprep.mubr.bf16.mxu0 %v7833_v36 }
  0x9c   : > { %7765 = vmatmul.mubr.bf16.gmra.mxu0 %v7834_v37 }
  0x9d   : > { %7768 = vmatprep.mubr.bf16.mxu0 %v7835_v38 }
  0xa4   : > { %7769 = vmatmul.mubr.bf16.gmra.mxu0 %v7836_v39 }
  0xec   : > { %v7710_v55 = vpop.f32.mrf.mxu0 }
  0xee   : > { %v777_v58 = vpop.f32.mrf.mxu0 }
  0xf0   : > { %v7711_v59 = vpop.f32.mrf.mxu0 }
  0xf2   : > { %v8421_v61 = vpop.f32.mrf.mxu0 }
  0xf4   : > { %v7714_v62 = vpop.f32.mrf.mxu0 }
  0xf6   : > { %v793_v63 = vpop.f32.mrf.mxu0 }
  0xf8   : > { %v7715_v0 = vpop.f32.mrf.mxu0 }
  0xfa   : > { %v8423_v1 = vpop.f32.mrf.mxu0 }
  0xfc   : > { %v7718_v2 = vpop.f32.mrf.mxu0 }
  0xfd   : > { %v1114_v3 = vmax.f32 %v7710_v55, %v7718_v2 }
  0xfe   : > { %v809_v4 = vpop.f32.mrf.mxu0 }
  0xff   : > { %v1112_v5 = vmax.f32 %v777_v58, %v809_v4 }
 0x100   : > { %v7719_v6 = vpop.f32.mrf.mxu0 }
 0x101   : > { %v1115_v7 = vmax.f32 %v7711_v59, %v7719_v6 }
 0x102   : > { %v812_v8 = vpop.f32.mrf.mxu0 }
 0x104   : > { %v7722_v9 = vpop.f32.mrf.mxu0 }
 0x105   : > { %v1118_v10 = vmax.f32 %v7714_v62, %v7722_v9  ;;  %v1113_v62 = vmax.f32 %v8421_v61, %v812_v8 }
 0x106   : > { %v825_v11 = vpop.f32.mrf.mxu0 }
 0x107   : > { %v1116_v12 = vmax.f32 %v793_v63, %v825_v11 }
 0x108   : > { %v7723_v13 = vpop.f32.mrf.mxu0 }
 0x109   : > { %v1119_v14 = vmax.f32 %v7715_v0, %v7723_v13 }
 0x10a   : > { %v8425_v15 = vpop.f32.mrf.mxu0 }
 0x10b   : > { %v1117_v61 = vmax.f32 %v8423_v1, %v8425_v15 }
 0x10c   : > { %v7726_v16 = vpop.f32.mrf.mxu0 }
 0x10d   : > { %v1130_v17 = vmax.f32 %v1114_v3, %v7726_v16 }
 0x10e   : > { %v841_v18 = vpop.f32.mrf.mxu0 }
 0x10f   : > { %v1128_v19 = vmax.f32 %v1112_v5, %v841_v18 }
 0x110   : > { %v7727_v20 = vpop.f32.mrf.mxu0 }
 0x111   : > { %v1131_v21 = vmax.f32 %v1115_v7, %v7727_v20 }
 0x112   : > { %v844_v22 = vpop.f32.mrf.mxu0 }
 0x113   : > { %v1129_v3 = vmax.f32 %v1113_v62, %v844_v22 }
 0x114   : > { %v7730_v23 = vpop.f32.mrf.mxu0 }
 0x115   : > { %v1134_v24 = vmax.f32 %v1118_v10, %v7730_v23 }
 0x116   : > { %v857_v25 = vpop.f32.mrf.mxu0 }
 0x117   : > { %v8427_v26 = vmax.f32 %v1116_v12, %v857_v25 }
 0x118   : > { %v7731_v27 = vpop.f32.mrf.mxu0 }
 0x119   : > { %v8429_v28 = vmax.f32 %v1119_v14, %v7731_v27 }
 0x11a   : > { %v860_v29 = vpop.f32.mrf.mxu0 }
 0x11c   : > { %v7734_v30 = vpop.f32.mrf.mxu0 }
 0x11d   : > { %v1146_v59 = vmax.f32 %v1130_v17, %v7734_v30  ;;  %v1133_v30 = vmax.f32 %v1117_v61, %v860_v29 }
 0x11e   : > { %v873_v31 = vpop.f32.mrf.mxu0 }
 0x11f   : > { %v1144_v63 = vmax.f32 %v1128_v19, %v873_v31 }
 0x120   : > { %v7735_v32 = vpop.f32.mrf.mxu0 }
 0x121   : > { %v1147_v4 = vmax.f32 %v1131_v21, %v7735_v32 }
 0x122   : > { %v876_v33 = vpop.f32.mrf.mxu0 }
 0x123   : > { %v1145_v9 = vmax.f32 %v1129_v3, %v876_v33 }
 0x124   : > { %v7738_v34 = vpop.f32.mrf.mxu0 }
 0x125   : > { %v1150_v13 = vmax.f32 %v1134_v24, %v7738_v34 }
 0x126   : > { %v889_v35 = vpop.f32.mrf.mxu0 }
 0x127   : > { %v1148_v8 = vmax.f32 %v8427_v26, %v889_v35 }
 0x128   : > { %v8431_v36 = vpop.f32.mrf.mxu0 }
 0x129   : > { %v1151_v24 = vmax.f32 %v8429_v28, %v8431_v36 }
 0x12a   : > { %v8433_v37 = vpop.f32.mrf.mxu0 }
 0x12b   : > { %v1149_v26 = vmax.f32 %v1133_v30, %v8433_v37 }
 0x12c   : > { %v7742_v38 = vpop.f32.mrf.mxu0 }
 0x12d   : > { %v1162_v0 = vmax.f32 %v1146_v59, %v7742_v38  ;;  %v7901_v59 = vld [vmem:[%s9847_s3 + $0x78] sm:$0xff]  }
 0x12e   : > { %v905_v39 = vpop.f32.mrf.mxu0  ;;  %7034 = vmatprep.subr.bf16.mxu0 %v7901_v59  ;;  %v7873_v59 = vld [vmem:[%s9846_s2 + $0x168] sm:$0xff]  }
 0x12f   : > { %v1160_v5 = vmax.f32 %v1144_v63, %v905_v39 }
 0x130   : > { %v7743_v40 = vpop.f32.mrf.mxu0 }
 0x131   : > { %v1163_v10 = vmax.f32 %v1147_v4, %v7743_v40 }
 0x132   : > { %v908_v41 = vpop.f32.mrf.mxu0 }
 0x133   : > { %v1161_v16 = vmax.f32 %v1145_v9, %v908_v41 }
 0x134   : > { %v7746_v42 = vpop.f32.mrf.mxu0 }
 0x135   : > { %v1166_v19 = vmax.f32 %v1150_v13, %v7746_v42  ;;  %v7856_v13 = vld [vmem:[%s9846_s2 + $0xb0] sm:$0xff]  }
 0x136   : > { %v921_v43 = vpop.f32.mrf.mxu0 }
 0x137   : > { %v1164_v31 = vmax.f32 %v1148_v8, %v921_v43 }
 0x138   : > { %v7747_v44 = vpop.f32.mrf.mxu0 }
 0x139   : > { %v1167_v35 = vmax.f32 %v1151_v24, %v7747_v44 }
 0x13a   : > { %v924_v45 = vpop.f32.mrf.mxu0 }
 0x13b   : > { %v1165_v36 = vmax.f32 %v1149_v26, %v924_v45  ;;  %v7864_v26 = vld [vmem:[%s9846_s2 + $0x90] sm:$0xff]  }
 0x13c   : > { %v7750_v46 = vpop.f32.mrf.mxu0 }
 0x13d   : > { %v1178_v6 = vmax.f32 %v1162_v0, %v7750_v46 }
 0x13e   : > { %v937_v47 = vpop.f32.mrf.mxu0 }
 0x13f   : > { %v1176_v11 = vmax.f32 %v1160_v5, %v937_v47 }
 0x140   : > { %v7751_v48 = vpop.f32.mrf.mxu0 }
 0x141   : > { %v1179_v18 = vmax.f32 %v1163_v10, %v7751_v48 }
 0x142   : > { %v940_v49 = vpop.f32.mrf.mxu0 }
 0x143   : > { %v1177_v22 = vmax.f32 %v1161_v16, %v940_v49 }
 0x144   : > { %v7754_v50 = vpop.f32.mrf.mxu0 }
 0x145   : > { %v1182_v33 = vmax.f32 %v1166_v19, %v7754_v50  ;;  %v7859_v19 = vld [vmem:[%s9846_s2 + $0xe0] sm:$0xff]  }
 0x146   : > { %v953_v51 = vpop.f32.mrf.mxu0 }
 0x147   : > { %v1180_v39 = vmax.f32 %v1164_v31, %v953_v51  ;;  %v7862_v31 = vld [vmem:[%s9846_s2 + $0x98] sm:$0xff]  }
 0x148   : > { %v8435_v52 = vpop.f32.mrf.mxu0 }
 0x149   : > { %v1183_v41 = vmax.f32 %v1167_v35, %v8435_v52  ;;  %v7865_v35 = vld [vmem:[%s9846_s2 + $0xc8] sm:$0xff]  }
 0x14a   : > { %v8437_v53 = vpop.f32.mrf.mxu0 }
 0x14b   : > { %v1181_v44 = vmax.f32 %v1165_v36, %v8437_v53 }
 0x14c   : > { %v7758_v54 = vpop.f32.mrf.mxu0 }
 0x14d   : > { %v1194_v12 = vmax.f32 %v1178_v6, %v7758_v54 }
 0x14e   : > { %v969_v55 = vpop.f32.mrf.mxu0 }
 0x14f   : > { %v1192_v17 = vmax.f32 %v1176_v11, %v969_v55  ;;  %v7855_v11 = vld [vmem:[%s9846_s2 + $0xf0] sm:$0xff]  }
 0x150   : > { %v7759_v56 = vpop.f32.mrf.mxu0 }
 0x151   : > { %v1195_v23 = vmax.f32 %v1179_v18, %v7759_v56 }
 0x152   : > { %v972_v57 = vpop.f32.mrf.mxu0 }
 0x153   : > { %v1193_v34 = vmax.f32 %v1177_v22, %v972_v57  ;;  %v7860_v22 = vld [vmem:[%s9846_s2 + $0xa0] sm:$0xff]  }
 0x154   : > { %v7762_v58 = vpop.f32.mrf.mxu0 }
 0x155   : > { %v1198_v40 = vmax.f32 %v1182_v33, %v7762_v58 }
 0x156   : > { %v985_v60 = vpop.f32.mrf.mxu0 }
 0x157   : > { %v1196_v43 = vmax.f32 %v1180_v39, %v985_v60  ;;  %v7902_v60 = vld [vmem:[%s9847_s3 + $0x38] sm:$0xff]  }
 0x158   : > { %v7763_v2 = vpop.f32.mrf.mxu0  ;;  %7035 = vmatpush3.bf16.msra.mxu0 %v7902_v60 }
 0x159   : > { %v1199_v49 = vmax.f32 %v1183_v41, %v7763_v2 }
 0x15a   : > { %v988_v7 = vpop.f32.mrf.mxu0 }
 0x15b   : > { %v1197_v54 = vmax.f32 %v1181_v44, %v988_v7  ;;  %v7854_v7 = vld [vmem:[%s9846_s2 + $0xb8] sm:$0xff]  }
 0x15c   : > { %v7766_v14 = vpop.f32.mrf.mxu0  ;;  %v7869_v44 = vld [vmem:[%s9846_s2 + $0x178] sm:$0xff]  }
 0x15d   : > { %v1210_v20 = vmax.f32 %v1194_v12, %v7766_v14  ;;  %v7857_v14 = vld [vmem:[%s9846_s2 + $0xe8] sm:$0xff]  }
 0x15e   : > { %v1001_v21 = vpop.f32.mrf.mxu0 }
 0x15f   : > { %v8443_v25 = vmax.f32 %v1210_v20, 0.0  ;;  %v1208_v27 = vmax.f32 %v1192_v17, %v1001_v21  ;;  %v7858_v20 = vld [vmem:[%s9846_s2 + $0xa8] sm:$0xff]  }
 0x160   : > { %v7767_v32 = vpop.f32.mrf.mxu0 }
 0x161   : > { %1226 = vst [vmem:[#allocation2 + $0x14] sm:$0xff] %v8443_v25  ;;  %v8448_v1 = vmax.f32 %v1208_v27, 0.0  ;;  %v1211_v15 = vmax.f32 %v1195_v23, %v7767_v32  ;;  %v7861_v23 = vld [vmem:[%s9846_s2 + $0xd8] sm:$0xff]  }
 0x162   : > { %v1004_v38 = vpop.f32.mrf.mxu0 }
 0x163   : > { %1224 = vst [vmem:[#allocation2 + $0x4] sm:$0xff] %v8448_v1  ;;  %v8452_v29 = vmax.f32 %v1211_v15, 0.0  ;;  %v1209_v28 = vmax.f32 %v1193_v34, %v1004_v38  ;;  %v7863_v34 = vld [vmem:[%s9846_s2 + $0xd0] sm:$0xff]  }
 0x164   : > { %v7770_v42 = vpop.f32.mrf.mxu0 }
 0x165   : > { %1227 = vst [vmem:[#allocation2 + $0x1c] sm:$0xff] %v8452_v29  ;;  %v8456_v46 = vmax.f32 %v1209_v28, 0.0  ;;  %v1214_v47 = vmax.f32 %v1198_v40, %v7770_v42  ;;  %v1289_v37 = vpack.c.bf16 %v8452_v29, %v8443_v25  ;;  %v7866_v28 = vld [vmem:[%s9846_s2 + $0x88] sm:$0xff]   ;;  %v7867_v42 = vld [vmem:[%s9846_s2 + $0xc0] sm:$0xff]   ;;  %v7894_v29 = vld [vmem:[%s9846_s2 + $0x198] sm:$0xff]  }
 0x166   : > { %v1017_v48 = vpop.f32.mrf.mxu0 }
 0x167   : > { %1225 = vst [vmem:[#allocation2 + $0xc] sm:$0xff] %v8456_v46  ;;  %v8462_v50 = vmax.f32 %v1214_v47, 0.0  ;;  %v1212_v45 = vmax.f32 %v1196_v43, %v1017_v48  ;;  %v1288_v51 = vpack.c.bf16 %v8456_v46, %v8448_v1  ;;  %v7868_v47 = vld [vmem:[%s9846_s2 + $0x80] sm:$0xff]  }
 0x168   : > { %v7771_v52 = vpop.f32.mrf.mxu0  ;;  %v7891_v1 = vld [vmem:[%s9846_s2 + $0x1e0] sm:$0xff]  }
 0x169   : > { %1230 = vst [vmem:[#allocation2 + $0x34] sm:$0xff] %v8462_v50  ;;  %v8467_v55 = vmax.f32 %v1212_v45, 0.0  ;;  %v1215_v56 = vmax.f32 %v1199_v49, %v7771_v52  ;;  %v7870_v52 = vld [vmem:[%s9846_s2 + $0x138] sm:$0xff]  }
 0x16a   : > { %v1020_v57 = vpop.f32.mrf.mxu0  ;;  %v1244_v63 = vld [vmem:[#allocation2 + $0x1] sm:$0xff] }
 0x16b   : > { %1228 = vst [vmem:[#allocation2 + $0x24] sm:$0xff] %v8467_v55  ;;  %v1223_v53 = vmax.f32 %v1215_v56, 0.0  ;;  %v1213_v58 = vmax.f32 %v1197_v54, %v1020_v57  ;;  %v1232_v0 = vld [vmem:[#allocation2] sm:$0xff]  ;;  %v7871_v57 = vld [vmem:[%s9846_s2 + $0x170] sm:$0xff]  }
 0x16c   : > { %v1247_v10 = vld [vmem:[#allocation2 + $0x19] sm:$0xff]  ;;  %v1268_v41 = vld [vmem:[#allocation2 + $0x3] sm:$0xff] }
 0x16d   : > { %1231 = vst [vmem:[#allocation2 + $0x3c] sm:$0x3f] %v1223_v53  ;;  %v8476_v62 = vmax.f32 %v1213_v58, 0.0  ;;  %v1235_v17 = vld [vmem:[#allocation2 + $0x18] sm:$0xff]  ;;  %v1256_v45 = vld [vmem:[#allocation2 + $0x2] sm:$0xff]  ;;  %v7872_v58 = vld [vmem:[%s9846_s2 + $0x130] sm:$0xff]  }
 0x16e   : > { %v1245_v2 = vld [vmem:[#allocation2 + $0x9] sm:$0xff]  ;;  %v1246_v4 = vld [vmem:[#allocation2 + $0x11] sm:$0xff]  ;;  %v1271_v56 = vld [vmem:[#allocation2 + $0x1b] sm:$0xff] }
 0x16f   : > { %v1233_v3 = vld [vmem:[#allocation2 + $0x8] sm:$0xff]  ;;  %1229 = vst [vmem:[#allocation2 + $0x2c] sm:$0xff] %v8476_v62  ;;  %v1252_v5 = vpack.c.bf16 %v1245_v2, %v1244_v63  ;;  %v1290_v9 = vpack.c.bf16 %v8476_v62, %v8467_v55  ;;  %v1253_v12 = vpack.c.bf16 %v1247_v10, %v1246_v4  ;;  %v1234_v16 = vld [vmem:[#allocation2 + $0x10] sm:$0xff]  ;;  %v7877_v10 = vld [vmem:[%s9846_s2 + $0x158] sm:$0xff]  }
 0x170   : > { %v1240_v6 = vpack.c.bf16 %v1233_v3, %v1232_v0  ;;  %v1241_v61 = vpack.c.bf16 %v1235_v17, %v1234_v16  ;;  %v1269_v39 = vld [vmem:[#allocation2 + $0xb] sm:$0xff]  ;;  %v1270_v49 = vld [vmem:[#allocation2 + $0x13] sm:$0xff] }
 0x171   : > { %1872 = vmatprep.mubr.bf16.mxu1 %v1252_v5  ;;  %v1276_v43 = vpack.c.bf16 %v1269_v39, %v1268_v41  ;;  %v1257_v48 = vld [vmem:[#allocation2 + $0xa] sm:$0xff]  ;;  %v1277_v53 = vpack.c.bf16 %v1271_v56, %v1270_v49  ;;  %v1258_v60 = vld [vmem:[#allocation2 + $0x12] sm:$0xff]  ;;  %v1259_v0 = vld [vmem:[#allocation2 + $0x1a] sm:$0xff] }
 0x172   : > { %1873 = vmatmul.mubr.bf16.vlgmr.msra.gmra.mxu1 %v1240_v6  ;;  %v1248_v8 = vld [vmem:[#allocation2 + $0x21] sm:$0xff]  ;;  %v1264_v54 = vpack.c.bf16 %v1257_v48, %v1256_v45  ;;  %v1265_v3 = vpack.c.bf16 %v1259_v0, %v1258_v60  ;;  %v7879_v17 = vld [vmem:[%s9846_s2 + $0x150] sm:$0xff]  }
 0x173   : > { %6915 = vmatpush3.bf16.msra.mxu1 %v7854_v7  ;;  %1880 = vmatprep.mubr.bf16.mxu1 %v1253_v12  ;;  %v1236_v24 = vld [vmem:[#allocation2 + $0x20] sm:$0xff]  ;;  %v7874_v2 = vld [vmem:[%s9846_s2 + $0x128] sm:$0xff]   ;;  %v7888_v39 = vld [vmem:[%s9846_s2 + $0x1b0] sm:$0xff]  }
 0x174   : > { %6916 = vmatprep.subr.bf16.mxu1 %v7855_v11  ;;  %v1251_v33 = vld [vmem:[#allocation2 + $0x39] sm:$0x7f]  ;;  %v1272_v4 = vld [vmem:[#allocation2 + $0x23] sm:$0xff]  ;;  %v7896_v49 = vld [vmem:[%s9846_s2 + $0x190] sm:$0xff]  }
 0x175   : > { %v1239_v40 = vld [vmem:[#allocation2 + $0x38] sm:$0x7f]  ;;  %v7875_v5 = vld [vmem:[%s9846_s2 + $0x160] sm:$0xff]   ;;  %v7890_v41 = vld [vmem:[%s9846_s2 + $0x1a8] sm:$0xff]  }
 0x176   : > { %v1249_v18 = vld [vmem:[#allocation2 + $0x29] sm:$0xff]  ;;  %v1250_v30 = vld [vmem:[#allocation2 + $0x31] sm:$0xff]  ;;  %v7876_v7 = vld [vmem:[%s9846_s2 + $0x120] sm:$0xff]  }
 0x177   : > { %6917 = vmatpush3.bf16.msra.mxu1 %v7856_v13  ;;  %v1254_v21 = vpack.c.bf16 %v1249_v18, %v1248_v8  ;;  %v1237_v27 = vld [vmem:[#allocation2 + $0x28] sm:$0xff]  ;;  %v1255_v15 = vpack.c.bf16 %v1251_v33, %v1250_v30  ;;  %v1238_v38 = vld [vmem:[#allocation2 + $0x30] sm:$0xff]  ;;  %v1275_v18 = vld [vmem:[#allocation2 + $0x3b] sm:$0x7f] }
 0x178   : > { %6918 = vmatprep.subr.bf16.mxu1 %v7857_v14  ;;  %v1242_v32 = vpack.c.bf16 %v1237_v27, %v1236_v24  ;;  %v1243_v36 = vpack.c.bf16 %v1239_v40, %v1238_v38  ;;  %v1273_v63 = vld [vmem:[#allocation2 + $0x2b] sm:$0xff]  ;;  %v1274_v12 = vld [vmem:[#allocation2 + $0x33] sm:$0xff]  ;;  %v1260_v13 = vld [vmem:[#allocation2 + $0x22] sm:$0xff] }
 0x179   : > { %v1278_v6 = vpack.c.bf16 %v1273_v63, %v1272_v4  ;;  %v1261_v11 = vld [vmem:[#allocation2 + $0x2a] sm:$0xff]  ;;  %v7878_v14 = vld [vmem:[%s9846_s2 + $0x118] sm:$0xff]   ;;  %v7883_v24 = vld [vmem:[%s9846_s2 + $0x140] sm:$0xff]  }
 0x17a   : > { %1881 = vmatmul.mubr.bf16.gmra.mxu1 %v1241_v61  ;;  %v1266_v16 = vpack.c.bf16 %v1261_v11, %v1260_v13  ;;  %v7880_v61 = vld [vmem:[%s9846_s2 + $0x110] sm:$0xff]   ;;  %v7881_v8 = vld [vmem:[%s9846_s2 + $0x148] sm:$0xff]   ;;  %v7885_v33 = vld [vmem:[%s9846_s2 + $0x1f8] sm:$0xff]  }
 0x17b   : > { %6919 = vmatpush3.bf16.msra.mxu1 %v7858_v20  ;;  %1888 = vmatprep.mubr.bf16.mxu1 %v1254_v21  ;;  %v1279_v20 = vpack.c.bf16 %v1275_v18, %v1274_v12  ;;  %v1292_v21 = vld [vmem:[#allocation2 + $0x5] sm:$0xff]  ;;  %v1299_v25 = vld [vmem:[#allocation2 + $0x3d] sm:$0x7f]  ;;  %v1317_v56 = vld [vmem:[#allocation2 + $0xf] sm:$0xff] }
 0x17c   : > { %6920 = vmatprep.subr.bf16.mxu1 %v7859_v19  ;;  %v1262_v19 = vld [vmem:[#allocation2 + $0x32] sm:$0xff]  ;;  %v7882_v27 = vld [vmem:[%s9846_s2 + $0x108] sm:$0xff]   ;;  %v1319_v63 = vld [vmem:[#allocation2 + $0x1f] sm:$0xff] }
 0x17d   : > { %v7889_v40 = vld [vmem:[%s9846_s2 + $0x1e8] sm:$0xff]   ;;  %v1307_v4 = vld [vmem:[#allocation2 + $0x1e] sm:$0xff] }
 0x17e   : > { %v7897_v45 = vld [vmem:[%s9846_s2 + $0x1c8] sm:$0xff]   ;;  %v7907_v12 = vld [vmem:[%s9847_s3 + $0x60] sm:$0xff]   ;;  %v1322_v18 = vld [vmem:[#allocation2 + $0x37] sm:$0xff] }
 0x17f   : > { %6921 = vmatpush3.bf16.msra.mxu1 %v7860_v22  ;;  %v1293_v22 = vld [vmem:[#allocation2 + $0xd] sm:$0xff]  ;;  %v7908_v13 = vld [vmem:[%s9847_s3 + $0x20] sm:$0xff]  }
 0x180   : > { %6922 = vmatprep.subr.bf16.mxu1 %v7861_v23  ;;  %v1263_v23 = vld [vmem:[#allocation2 + $0x3a] sm:$0x7f]  ;;  %v7898_v55 = vld [vmem:[%s9846_s2 + $0x188] sm:$0xff]  }
 0x181   : > { %v1267_v30 = vpack.c.bf16 %v1263_v23, %v1262_v19  ;;  %v1305_v60 = vld [vmem:[#allocation2 + $0xe] sm:$0xff]  ;;  %v1311_v19 = vld [vmem:[#allocation2 + $0x3e] sm:$0x7f] }
 0x182   : > { %1889 = vmatmul.mubr.bf16.gmra.mxu1 %v1242_v32  ;;  %v7884_v32 = vld [vmem:[%s9846_s2 + $0x100] sm:$0xff]   ;;  %v7910_v23 = vld [vmem:[%s9847_s3 + $0x18] sm:$0xff]  }
 0x183   : > { %6923 = vmatpush3.bf16.msra.mxu1 %v7862_v31  ;;  %1896 = vmatprep.mubr.bf16.mxu1 %v1255_v15  ;;  %v1300_v31 = vpack.c.bf16 %v1293_v22, %v1292_v21  ;;  %v7886_v15 = vld [vmem:[%s9846_s2 + $0x1b8] sm:$0xff]  }
 0x184   : > { %6924 = vmatprep.subr.bf16.mxu1 %v7863_v34  ;;  %v1295_v34 = vld [vmem:[#allocation2 + $0x1d] sm:$0xff] }
 0x185   : > { %v7909_v22 = vld [vmem:[%s9847_s3 + $0x58] sm:$0xff]  }
 0x187   : > { %6925 = vmatpush3.bf16.msra.mxu1 %v7864_v26  ;;  %v1294_v26 = vld [vmem:[#allocation2 + $0x15] sm:$0xff] }
 0x188   : > { %6926 = vmatprep.subr.bf16.mxu1 %v7865_v35  ;;  %v7887_v35 = vld [vmem:[%s9846_s2 + $0x1f0] sm:$0xff]   ;;  %v1301_v38 = vpack.c.bf16 %v1295_v34, %v1294_v26  ;;  %v7919_v26 = vld [vmem:[%s9847_s3 + $0xe8] sm:$0xff]  }
 0x189   : > { %v7917_v34 = vld [vmem:[%s9847_s3 + $0xf0] sm:$0xff]  }
 0x18a   : > { %1897 = vmatmul.mubr.bf16.gmra.mxu1 %v1243_v36  ;;  %v1297_v36 = vld [vmem:[#allocation2 + $0x2d] sm:$0xff] }
 0x18b   : > { %6927 = vmatpush3.bf16.msra.mxu1 %v7866_v28  ;;  %1937 = vmatprep.mubr.bf16.mxu1 %v1276_v43  ;;  %v1296_v28 = vld [vmem:[#allocation2 + $0x25] sm:$0xff] }
 0x18c   : > { %6928 = vmatprep.subr.bf16.mxu1 %v7867_v42  ;;  %v1302_v46 = vpack.c.bf16 %v1297_v36, %v1296_v28  ;;  %v7904_v42 = vld [vmem:[%s9847_s3 + $0x30] sm:$0xff]   ;;  %v7892_v43 = vld [vmem:[%s9846_s2 + $0x1a0] sm:$0xff]   ;;  %v7925_v36 = vld [vmem:[%s9847_s3 + $0xd8] sm:$0xff]  }
 0x18d   : > { %v7924_v28 = vld [vmem:[%s9847_s3] sm:$0xff]  }
 0x18f   : > { %6929 = vmatpush3.bf16.msra.mxu1 %v7868_v47  ;;  %v7893_v47 = vld [vmem:[%s9846_s2 + $0x1d8] sm:$0xff]  }
 0x190   : > { %6954 = vmatprep.subr.bf16.mxu1 %v7869_v44  ;;  %v1298_v44 = vld [vmem:[#allocation2 + $0x35] sm:$0xff] }
 0x191   : > { %v1303_v48 = vpack.c.bf16 %v1299_v25, %v1298_v44  ;;  %v7933_v44 = vld [vmem:[%s9847_s3 + $0x178] sm:$0xff]  }
 0x192   : > { %1938 = vmatmul.mubr.bf16.vlgmr.msra.gmra.mxu1 %v1264_v54  ;;  %v1316_v54 = vld [vmem:[#allocation2 + $0x7] sm:$0xff]  ;;  %v7935_v25 = vld [vmem:[%s9847_s3 + $0x1f8] sm:$0xff]  }
 0x193   : > { %6955 = vmatpush3.bf16.msra.mxu1 %v7870_v52  ;;  %1945 = vmatprep.mubr.bf16.mxu1 %v1277_v53  ;;  %v1287_v52 = vld [vmem:[#allocation2 + $0x3c] sm:$0x7f]  ;;  %v7905_v53 = vld [vmem:[%s9847_s3 + $0x68] sm:$0xff]  }
 0x194   : > { %6956 = vmatprep.subr.bf16.mxu1 %v7871_v57  ;;  %v1291_v62 = vpack.c.bf16 %v1287_v52, %v8462_v50  ;;  %v1324_v57 = vpack.c.bf16 %v1317_v56, %v1316_v54  ;;  %v7900_v50 = vld [vmem:[%s9846_s2 + $0x180] sm:$0xff]  }
 0x197   : > { %6957 = vmatpush3.bf16.msra.mxu1 %v7872_v58  ;;  %v7906_v58 = vld [vmem:[%s9847_s3 + $0x28] sm:$0xff]  }
 0x198   : > { %6958 = vmatprep.subr.bf16.mxu1 %v7873_v59  ;;  %v1304_v59 = vld [vmem:[#allocation2 + $0x6] sm:$0xff] }
 0x199   : > { %v1312_v0 = vpack.c.bf16 %v1305_v60, %v1304_v59 }
 0x19a   : > { %1946 = vmatmul.mubr.bf16.gmra.mxu1 %v1265_v3 }
 0x19b   : > { %6959 = vmatpush3.bf16.msra.mxu1 %v7874_v2  ;;  %1953 = vmatprep.mubr.bf16.mxu1 %v1278_v6  ;;  %v1318_v2 = vld [vmem:[#allocation2 + $0x17] sm:$0xff]  ;;  %v1321_v6 = vld [vmem:[#allocation2 + $0x2f] sm:$0xff] }
 0x19c   : > { %6960 = vmatprep.subr.bf16.mxu1 %v7875_v5  ;;  %v1325_v3 = vpack.c.bf16 %v1319_v63, %v1318_v2  ;;  %v1320_v5 = vld [vmem:[#allocation2 + $0x27] sm:$0xff] }
 0x19d   : > { %v1326_v11 = vpack.c.bf16 %v1321_v6, %v1320_v5 }
 0x19f   : > { %6961 = vmatpush3.bf16.msra.mxu1 %v7876_v7  ;;  %v1306_v7 = vld [vmem:[#allocation2 + $0x16] sm:$0xff] }
 0x1a0   : > { %6962 = vmatprep.subr.bf16.mxu1 %v7877_v10  ;;  %v1313_v10 = vpack.c.bf16 %v1307_v4, %v1306_v7 }
 0x1a2   : > { %1954 = vmatmul.mubr.bf16.gmra.mxu1 %v1266_v16  ;;  %v1309_v16 = vld [vmem:[#allocation2 + $0x2e] sm:$0xff] }
 0x1a3   : > { %6963 = vmatpush3.bf16.msra.mxu1 %v7878_v14  ;;  %1961 = vmatprep.mubr.bf16.mxu1 %v1279_v20  ;;  %v1308_v14 = vld [vmem:[#allocation2 + $0x26] sm:$0xff] }
 0x1a4   : > { %6964 = vmatprep.subr.bf16.mxu1 %v7879_v17  ;;  %v1323_v17 = vld [vmem:[#allocation2 + $0x3f] sm:$0x7f]  ;;  %v1314_v20 = vpack.c.bf16 %v1309_v16, %v1308_v14 }
 0x1a7   : > { %6965 = vmatpush3.bf16.msra.mxu1 %v7880_v61  ;;  %v1327_v61 = vpack.c.bf16 %v1323_v17, %v1322_v18 }
 0x1a8   : > { %6966 = vmatprep.subr.bf16.mxu1 %v7881_v8  ;;  %v1310_v8 = vld [vmem:[#allocation2 + $0x36] sm:$0xff] }
 0x1a9   : > { %v1315_v21 = vpack.c.bf16 %v1311_v19, %v1310_v8 }
 0x1aa   : > { %1962 = vmatmul.mubr.bf16.gmra.mxu1 %v1267_v30  ;;  %v7912_v30 = vld [vmem:[%s9847_s3 + $0x10] sm:$0xff]  }
 0x1ab   : > { %6967 = vmatpush3.bf16.msra.mxu1 %v7882_v27  ;;  %2002 = vmatprep.mubr.bf16.mxu1 %v1300_v31  ;;  %v7911_v27 = vld [vmem:[%s9847_s3 + $0x50] sm:$0xff]   ;;  %v7914_v31 = vld [vmem:[%s9847_s3 + $0x8] sm:$0xff]  }
 0x1ac   : > { %6968 = vmatprep.subr.bf16.mxu1 %v7883_v24  ;;  %v7913_v24 = vld [vmem:[%s9847_s3 + $0x48] sm:$0xff]  }
 0x1af   : > { %6969 = vmatpush3.bf16.msra.mxu1 %v7884_v32  ;;  %v7915_v32 = vld [vmem:[%s9847_s3 + $0xf8] sm:$0xff]  }
 0x1b0   : > { %6994 = vmatprep.subr.bf16.mxu1 %v7885_v33  ;;  %v7916_v33 = vld [vmem:[%s9847_s3 + $0xb8] sm:$0xff]  }
 0x1b2   : > { %2003 = vmatmul.mubr.bf16.vlgmr.msra.gmra.mxu1 %v1288_v51  ;;  %v7903_v51 = vld [vmem:[%s9847_s3 + $0x70] sm:$0xff]  }
 0x1b3   : > { %6995 = vmatpush3.bf16.msra.mxu1 %v7886_v15  ;;  %2010 = vmatprep.mubr.bf16.mxu1 %v1301_v38  ;;  %v7918_v15 = vld [vmem:[%s9847_s3 + $0xb0] sm:$0xff]   ;;  %v7921_v38 = vld [vmem:[%s9847_s3 + $0xe0] sm:$0xff]  }
 0x1b4   : > { %6996 = vmatprep.subr.bf16.mxu1 %v7887_v35  ;;  %7036 = vmatprep.subr.bf16.mxu0 %v7903_v51  ;;  %v7920_v35 = vld [vmem:[%s9847_s3 + $0xa8] sm:$0xff]  }
 0x1b5   : > { %7037 = vmatpush3.bf16.msra.mxu0 %v7904_v42  ;;  %v7929_v51 = vld [vmem:[%s9847_s3 + $0xc8] sm:$0xff]  }
 0x1b6   : > { %7038 = vmatprep.subr.bf16.mxu0 %v7905_v53  ;;  %v7930_v42 = vld [vmem:[%s9847_s3 + $0x88] sm:$0xff]  }
 0x1b7   : > { %6997 = vmatpush3.bf16.msra.mxu1 %v7888_v39  ;;  %v7922_v39 = vld [vmem:[%s9847_s3 + $0xa0] sm:$0xff]  }
 0x1b8   : > { %6998 = vmatprep.subr.bf16.mxu1 %v7889_v40  ;;  %v7923_v40 = vld [vmem:[%s9847_s3 + $0x40] sm:$0xff]  }
 0x1b9   : > { %7039 = vmatpush3.bf16.msra.mxu0 %v7906_v58 }
 0x1ba   : > { %2011 = vmatmul.mubr.bf16.gmra.mxu1 %v1289_v37  ;;  %v7895_v37 = vld [vmem:[%s9846_s2 + $0x1d0] sm:$0xff]   ;;  %7040 = vmatprep.subr.bf16.mxu0 %v7907_v12 }
 0x1bb   : > { %6999 = vmatpush3.bf16.msra.mxu1 %v7890_v41  ;;  %2018 = vmatprep.mubr.bf16.mxu1 %v1302_v46  ;;  %v7926_v41 = vld [vmem:[%s9847_s3 + $0x98] sm:$0xff]   ;;  %v7928_v46 = vld [vmem:[%s9847_s3 + $0x90] sm:$0xff]  }
 0x1bc   : > { %7000 = vmatprep.subr.bf16.mxu1 %v7891_v1  ;;  %v7927_v1 = vld [vmem:[%s9847_s3 + $0xd0] sm:$0xff]  }
 0x1bd   : > { %7041 = vmatpush3.bf16.msra.mxu0 %v7908_v13 }
 0x1be   : > { %7042 = vmatprep.subr.bf16.mxu0 %v7909_v22 }
 0x1bf   : > { %7001 = vmatpush3.bf16.msra.mxu1 %v7892_v43  ;;  %v7931_v43 = vld [vmem:[%s9847_s3 + $0xc0] sm:$0xff]  }
 0x1c0   : > { %7002 = vmatprep.subr.bf16.mxu1 %v7893_v47  ;;  %v7932_v47 = vld [vmem:[%s9847_s3 + $0x80] sm:$0xff]  }
 0x1c1   : > { %7043 = vmatpush3.bf16.msra.mxu0 %v7910_v23 }
 0x1c2   : > { %2019 = vmatmul.mubr.bf16.gmra.mxu1 %v1290_v9  ;;  %v7899_v9 = vld [vmem:[%s9846_s2 + $0x1c0] sm:$0xff]   ;;  %7044 = vmatprep.subr.bf16.mxu0 %v7911_v27 }
 0x1c3   : > { %7003 = vmatpush3.bf16.msra.mxu1 %v7894_v29  ;;  %2026 = vmatprep.mubr.bf16.mxu1 %v1303_v48 }
 0x1c4   : > { %7004 = vmatprep.subr.bf16.mxu1 %v7895_v37 }
 0x1c5   : > { %7045 = vmatpush3.bf16.msra.mxu0 %v7912_v30 }
 0x1c6   : > { %7046 = vmatprep.subr.bf16.mxu0 %v7913_v24 }
 0x1c7   : > { %7005 = vmatpush3.bf16.msra.mxu1 %v7896_v49 }
 0x1c8   : > { %7006 = vmatprep.subr.bf16.mxu1 %v7897_v45 }
 0x1c9   : > { %7047 = vmatpush3.bf16.msra.mxu0 %v7914_v31 }
 0x1ca   : > { %2027 = vmatmul.mubr.bf16.gmra.mxu1 %v1291_v62  ;;  %7048 = vmatprep.subr.bf16.mxu0 %v7923_v40 }
 0x1cb   : > { %7007 = vmatpush3.bf16.msra.mxu1 %v7898_v55  ;;  %2067 = vmatprep.mubr.bf16.mxu1 %v1324_v57 }
 0x1cc   : > { %7008 = vmatprep.subr.bf16.mxu1 %v7899_v9 }
 0x1cd   : > { %7049 = vmatpush3.bf16.msra.mxu0 %v7924_v28 }
 0x1ce   : > { %7114 = vmatprep.subr.bf16.mxu0 %v7933_v44 }
 0x1cf   : > { %7009 = vmatpush3.bf16.msra.mxu1 %v7900_v50 }
 0x1d0   : > { %7074 = vmatprep.subr.bf16.mxu1 %v7915_v32 }
 0x1d2   : > { %2068 = vmatmul.mubr.bf16.vlgmr.msra.gmra.mxu1 %v1312_v0 }
 0x1d3   : > { %2075 = vmatprep.mubr.bf16.mxu1 %v1325_v3  ;;  %7075 = vmatpush3.bf16.msra.mxu1 %v7916_v33 }
 0x1d4   : > { %7076 = vmatprep.subr.bf16.mxu1 %v7917_v34 }
 0x1d7   : > { %7077 = vmatpush3.bf16.msra.mxu1 %v7918_v15 }
 0x1d8   : > { %7078 = vmatprep.subr.bf16.mxu1 %v7919_v26 }
 0x1da   : > { %2076 = vmatmul.mubr.bf16.gmra.mxu1 %v1313_v10 }
 0x1db   : > { %2083 = vmatprep.mubr.bf16.mxu1 %v1326_v11  ;;  %7079 = vmatpush3.bf16.msra.mxu1 %v7920_v35 }
 0x1dc   : > { %7080 = vmatprep.subr.bf16.mxu1 %v7921_v38 }
 0x1df   : > { %7081 = vmatpush3.bf16.msra.mxu1 %v7922_v39 }
 0x1e0   : > { %7082 = vmatprep.subr.bf16.mxu1 %v7925_v36 }
 0x1e2   : > { %2084 = vmatmul.mubr.bf16.gmra.mxu1 %v1314_v20 }
 0x1e3   : > { %2091 = vmatprep.mubr.bf16.mxu1 %v1327_v61  ;;  %7083 = vmatpush3.bf16.msra.mxu1 %v7926_v41 }
 0x1e4   : > { %7084 = vmatprep.subr.bf16.mxu1 %v7927_v1 }
 0x1e7   : > { %7085 = vmatpush3.bf16.msra.mxu1 %v7928_v46 }
 0x1e8   : > { %7086 = vmatprep.subr.bf16.mxu1 %v7929_v51 }
 0x1ea   : > { %2092 = vmatmul.mubr.bf16.gmra.mxu1 %v1315_v21 }
 0x1eb   : > { %7087 = vmatpush3.bf16.msra.mxu1 %v7930_v42 }
 0x1ec   : > { %7088 = vmatprep.subr.bf16.mxu1 %v7931_v43 }
 0x1ef   : > { %7089 = vmatpush3.bf16.msra.mxu1 %v7932_v47 }
 0x1f0   : > { %7154 = vmatprep.subr.bf16.mxu1 %v7935_v25 }
 0x232   : > { %v6890_v29 = vpop.f32.mrf.mxu1 }
 0x234   : > { %v6891_v37 = vpop.f32.mrf.mxu1 }
 0x235   : > { %v6892_v48 = vadd.f32 %v6891_v37, %v6890_v29 }
 0x236   : > { %v6893_v49 = vpop.f32.mrf.mxu1 }
 0x238   : > { %v6894_v45 = vpop.f32.mrf.mxu1 }
 0x239   : > { %v6895_v51 = vadd.f32 %v6894_v45, %v6893_v49 }
 0x23a   : > { %v6896_v52 = vpop.f32.mrf.mxu1 }
 0x23c   : > { %v6897_v54 = vpop.f32.mrf.mxu1 }
 0x23d   : > { %v8728_v56 = vadd.f32 %v6897_v54, %v6896_v52 }
 0x23e   : > { %v8730_v55 = vpop.f32.mrf.mxu1 }
 0x240   : > { %v8732_v62 = vpop.f32.mrf.mxu1 }
 0x241   : > { %v6901_v49 = vadd.f32 %v8732_v62, %v8730_v55 }
 0x242   : > { %v6902_v9 = vpop.f32.mrf.mxu1 }
 0x244   : > { %v6903_v57 = vpop.f32.mrf.mxu1 }
 0x245   : > { %v8734_v53 = vadd.f32 %v6903_v57, %v6902_v9 }
 0x246   : > { %v8736_v58 = vpop.f32.mrf.mxu1 }
 0x248   : > { %v8738_v50 = vpop.f32.mrf.mxu1 }
 0x24a   : > { %v6908_v59 = vpop.f32.mrf.mxu1 }
 0x24c   : > { %v6909_v60 = vpop.f32.mrf.mxu1 }
 0x24d   : > { %v8740_v63 = vadd.f32 %v6909_v60, %v6908_v59 }
 0x24e   : > { %v8742_v0 = vpop.f32.mrf.mxu1 }
 0x250   : > { %v8744_v2 = vpop.f32.mrf.mxu1 }
 0x252   : > { %v6930_v3 = vpop.f32.mrf.mxu1 }
 0x254   : > { %v6931_v4 = vpop.f32.mrf.mxu1 }
 0x255   : > { %v6932_v39 = vadd.f32 %v6931_v4, %v6930_v3 }
 0x256   : > { %v6933_v5 = vpop.f32.mrf.mxu1 }
 0x257   : > { %v1940_v41 = vadd.f32 %v6932_v39, %v6892_v48 }
 0x258   : > { %v6934_v6 = vpop.f32.mrf.mxu1 }
 0x259   : > { %v6935_v1 = vadd.f32 %v6934_v6, %v6933_v5 }
 0x25a   : > { %v6936_v7 = vpop.f32.mrf.mxu1 }
 0x25b   : > { %v1943_v25 = vadd.f32 %v6935_v1, %v6895_v51 }
 0x25c   : > { %v6937_v10 = vpop.f32.mrf.mxu1 }
 0x25d   : > { %v6938_v29 = vadd.f32 %v6937_v10, %v6936_v7 }
 0x25e   : > { %v6939_v11 = vpop.f32.mrf.mxu1 }
 0x25f   : > { %v1948_v3 = vadd.f32 %v6938_v29, %v8728_v56  ;;  %v7936_v29 = vld [vmem:[%s9847_s3 + $0x1b8] sm:$0xff]  }
 0x260   : > { %v6940_v12 = vpop.f32.mrf.mxu1 }
 0x261   : > { %v6941_v4 = vadd.f32 %v6940_v12, %v6939_v11 }
 0x262   : > { %v6942_v13 = vpop.f32.mrf.mxu1 }
 0x264   : > { %v6943_v14 = vpop.f32.mrf.mxu1 }
 0x266   : > { %v8746_v16 = vpop.f32.mrf.mxu1 }
 0x268   : > { %v6946_v18 = vpop.f32.mrf.mxu1 }
 0x26a   : > { %v8748_v17 = vpop.f32.mrf.mxu1 }
 0x26c   : > { %v8750_v20 = vpop.f32.mrf.mxu1 }
 0x26e   : > { %v8752_v61 = vpop.f32.mrf.mxu1 }
 0x270   : > { %v8754_v8 = vpop.f32.mrf.mxu1 }
 0x272   : > { %v6970_v19 = vpop.f32.mrf.mxu1 }
 0x274   : > { %v6971_v21 = vpop.f32.mrf.mxu1 }
 0x275   : > { %v6972_v28 = vadd.f32 %v6971_v21, %v6970_v19  ;;  %v1951_v21 = vadd.f32 %v6941_v4, %v6901_v49 }
 0x276   : > { %v6973_v22 = vpop.f32.mrf.mxu1 }
 0x277   : > { %v2005_v42 = vadd.f32 %v6972_v28, %v1940_v41  ;;  %v6947_v28 = vadd.f32 %v6946_v18, %v8746_v16  ;;  %v7934_v16 = vld [vmem:[%s9847_s3 + $0x138] sm:$0xff]  }
 0x278   : > { %v6974_v23 = vpop.f32.mrf.mxu1 }
 0x279   : > { %v6975_v43 = vadd.f32 %v6974_v23, %v6973_v22  ;;  %v6944_v22 = vadd.f32 %v6943_v14, %v6942_v13 }
 0x27a   : > { %v6976_v27 = vpop.f32.mrf.mxu1 }
 0x27b   : > { %v2008_v54 = vadd.f32 %v6975_v43, %v1943_v25  ;;  %v1956_v62 = vadd.f32 %v6944_v22, %v8734_v53  ;;  %v6950_v53 = vadd.f32 %v8750_v20, %v8748_v17  ;;  %v7937_v17 = vld [vmem:[%s9847_s3 + $0x170] sm:$0xff]  }
 0x27c   : > { %v6977_v30 = vpop.f32.mrf.mxu1  ;;  %v7939_v20 = vld [vmem:[%s9847_s3 + $0x1f0] sm:$0xff]  }
 0x27d   : > { %v6978_v9 = vadd.f32 %v6977_v30, %v6976_v27 }
 0x27e   : > { %v6979_v24 = vpop.f32.mrf.mxu1 }
 0x27f   : > { %v2013_v5 = vadd.f32 %v6978_v9, %v1948_v3  ;;  %v6953_v3 = vadd.f32 %v8754_v8, %v8752_v61  ;;  %v6913_v61 = vadd.f32 %v8744_v2, %v8742_v0  ;;  %v7942_v0 = vld [vmem:[%s9847_s3 + $0x128] sm:$0xff]  }
 0x280   : > { %v6980_v31 = vpop.f32.mrf.mxu1  ;;  %v7944_v2 = vld [vmem:[%s9847_s3 + $0x1a8] sm:$0xff]  }
 0x281   : > { %v6981_v6 = vadd.f32 %v6980_v31, %v6979_v24  ;;  %v6907_v31 = vadd.f32 %v8738_v50, %v8736_v58  ;;  %v1967_v22 = vadd.f32 %v6953_v3, %v6913_v61  ;;  %v7957_v3 = vld [vmem:[%s9847_s3 + $0x148] sm:$0xff]  }
 0x282   : > { %v6982_v32 = vpop.f32.mrf.mxu1  ;;  %v7958_v61 = vld [vmem:[%s9847_s3 + $0x108] sm:$0xff]  }
 0x283   : > { %v2016_v56 = vadd.f32 %v6981_v6, %v1951_v21  ;;  %v1959_v18 = vadd.f32 %v6947_v28, %v6907_v31 }
 0x284   : > { %v6983_v33 = vpop.f32.mrf.mxu1 }
 0x285   : > { %v6984_v11 = vadd.f32 %v6983_v33, %v6982_v32 }
 0x286   : > { %v6985_v34 = vpop.f32.mrf.mxu1 }
 0x287   : > { %v2021_v14 = vadd.f32 %v6984_v11, %v1956_v62 }
 0x288   : > { %v6986_v15 = vpop.f32.mrf.mxu1 }
 0x28a   : > { %v8756_v26 = vpop.f32.mrf.mxu1 }
 0x28c   : > { %v8758_v35 = vpop.f32.mrf.mxu1 }
 0x28e   : > { %v8760_v38 = vpop.f32.mrf.mxu1 }
 0x290   : > { %v8762_v40 = vpop.f32.mrf.mxu1 }
 0x291   : > { %v6993_v6 = vadd.f32 %v8762_v40, %v8760_v38 }
 0x292   : > { %v7010_v36 = vpop.f32.mrf.mxu1 }
 0x294   : > { %v7011_v46 = vpop.f32.mrf.mxu1 }
 0x295   : > { %v7012_v47 = vadd.f32 %v7011_v46, %v7010_v36  ;;  %v6987_v36 = vadd.f32 %v6986_v15, %v6985_v34 }
 0x296   : > { %v7013_v44 = vpop.f32.mrf.mxu1 }
 0x297   : > { %v2070_v37 = vadd.f32 %v7012_v47, %v2005_v42  ;;  %v2024_v9 = vadd.f32 %v6987_v36, %v1959_v18  ;;  %v7949_v18 = vld [vmem:[%s9847_s3 + $0x158] sm:$0xff]  }
 0x298   : > { %v7014_v52 = vpop.f32.mrf.mxu1 }
 0x299   : > { %v2100_v57 = vmax.f32 %v2070_v37, 0.0  ;;  %v7015_v59 = vadd.f32 %v7014_v52, %v7013_v44 }
 0x29a   : > { %v7016_v60 = vpop.f32.mrf.mxu1 }
 0x29b   : > { %2108 = vst [vmem:[#allocation2 + $0x4] sm:$0xff] %v2100_v57  ;;  %v2073_v48 = vadd.f32 %v7015_v59, %v2008_v54 }
 0x29c   : > { %v7017_v45 = vpop.f32.mrf.mxu1 }
 0x29d   : > { %v2101_v19 = vmax.f32 %v2073_v48, 0.0  ;;  %v7018_v7 = vadd.f32 %v7017_v45, %v7016_v60  ;;  %v1964_v48 = vadd.f32 %v6950_v53, %v8740_v63  ;;  %v7941_v63 = vld [vmem:[%s9847_s3 + $0x168] sm:$0xff]   ;;  %v7951_v53 = vld [vmem:[%s9847_s3 + $0x1d8] sm:$0xff]  }
 0x29e   : > { %v7019_v10 = vpop.f32.mrf.mxu1  ;;  %v7943_v45 = vld [vmem:[%s9847_s3 + $0x1e8] sm:$0xff]  }
 0x29f   : > { %2109 = vst [vmem:[#allocation2 + $0xc] sm:$0xff] %v2101_v19  ;;  %v2078_v23 = vadd.f32 %v7018_v7, %v2013_v5  ;;  %v8767_v27 = vpack.c.bf16 %v2101_v19, %v2100_v57  ;;  %v6990_v57 = vadd.f32 %v8758_v35, %v8756_v26  ;;  %v7938_v26 = vld [vmem:[%s9847_s3 + $0x130] sm:$0xff]  }
 0x2a0   : > { %v7020_v30 = vpop.f32.mrf.mxu1  ;;  %v7940_v35 = vld [vmem:[%s9847_s3 + $0x1b0] sm:$0xff]  }
 0x2a1   : > { %v2102_v12 = vmax.f32 %v2078_v23, 0.0  ;;  %v7021_v39 = vadd.f32 %v7020_v30, %v7019_v10  ;;  %v2029_v5 = vadd.f32 %v6990_v57, %v1964_v48  ;;  %v7955_v57 = vld [vmem:[%s9847_s3 + $0x1d0] sm:$0xff]  }
 0x2a2   : > { %v7022_v55 = vpop.f32.mrf.mxu1  ;;  %v2128_v46 = vld [vmem:[#allocation2 + $0x1] sm:$0xff] }
 0x2a3   : > { %2110 = vst [vmem:[#allocation2 + $0x14] sm:$0xff] %v2102_v12  ;;  %v2081_v24 = vadd.f32 %v7021_v39, %v2016_v56  ;;  %v2152_v51 = vld [vmem:[#allocation2 + $0x3] sm:$0xff] }
 0x2a4   : > { %v7023_v13 = vpop.f32.mrf.mxu1  ;;  %v2116_v32 = vld [vmem:[#allocation2] sm:$0xff] }
 0x2a5   : > { %v2103_v41 = vmax.f32 %v2081_v24, 0.0  ;;  %v7024_v1 = vadd.f32 %v7023_v13, %v7022_v55  ;;  %v2140_v44 = vld [vmem:[#allocation2 + $0x2] sm:$0xff] }
 0x2a6   : > { %v7025_v33 = vpop.f32.mrf.mxu1  ;;  %v2129_v42 = vld [vmem:[#allocation2 + $0x9] sm:$0xff]  ;;  %v7945_v13 = vld [vmem:[%s9847_s3 + $0x160] sm:$0xff]  }
 0x2a7   : > { %v2153_v43 = vld [vmem:[#allocation2 + $0xb] sm:$0xff]  ;;  %2111 = vst [vmem:[#allocation2 + $0x1c] sm:$0xff] %v2103_v41  ;;  %v8778_v50 = vadd.f32 %v7024_v1, %v2021_v14  ;;  %v2136_v34 = vpack.c.bf16 %v2129_v42, %v2128_v46  ;;  %v8789_v54 = vpack.c.bf16 %v2103_v41, %v2102_v12  ;;  %v7947_v14 = vld [vmem:[%s9847_s3 + $0x1e0] sm:$0xff]   ;;  %v2032_v41 = vadd.f32 %v6993_v6, %v1967_v22 }
 0x2a8   : > { %v2117_v58 = vld [vmem:[#allocation2 + $0x8] sm:$0xff]  ;;  %v2160_v15 = vpack.c.bf16 %v2153_v43, %v2152_v51  ;;  %v7026_v37 = vpop.f32.mrf.mxu1 }
 0x2a9   : > { %v2124_v47 = vpack.c.bf16 %v2117_v58, %v2116_v32  ;;  %v2141_v25 = vld [vmem:[#allocation2 + $0xa] sm:$0xff]  ;;  %v2104_v59 = vmax.f32 %v8778_v50, 0.0  ;;  %v7027_v60 = vadd.f32 %v7026_v37, %v7025_v33  ;;  %2756 = vmatprep.mubr.bf16.mxu0 %v2136_v34  ;;  %v7946_v32 = vld [vmem:[%s9847_s3 + $0x120] sm:$0xff]   ;;  %v7950_v50 = vld [vmem:[%s9847_s3 + $0x118] sm:$0xff]  }
 0x2aa   : > { %v2148_v52 = vpack.c.bf16 %v2141_v25, %v2140_v44  ;;  %2821 = vmatprep.mubr.bf16.mxu1 %v2160_v15  ;;  %v7028_v4 = vpop.f32.mrf.mxu1  ;;  %v2130_v10 = vld [vmem:[#allocation2 + $0x11] sm:$0xff]  ;;  %v7960_v22 = vld [vmem:[%s9847_s3 + $0x188] sm:$0xff]  }
 0x2ab   : > { %2757 = vmatmul.mubr.bf16.vlgmr.msra.gmra.mxu0 %v2124_v47  ;;  %2112 = vst [vmem:[#allocation2 + $0x24] sm:$0xff] %v2104_v59  ;;  %v2089_v49 = vadd.f32 %v7027_v60, %v2024_v9  ;;  %v2154_v21 = vld [vmem:[#allocation2 + $0x13] sm:$0xff] }
 0x2ac   : > { %2822 = vmatmul.mubr.bf16.vlgmr.msra.gmra.mxu1 %v2148_v52  ;;  %7115 = vmatpush3.bf16.msra.mxu0 %v7934_v16  ;;  %v7029_v8 = vpop.f32.mrf.mxu1  ;;  %v2118_v39 = vld [vmem:[#allocation2 + $0x10] sm:$0xff]  ;;  %v7948_v16 = vld [vmem:[%s9847_s3 + $0x1a0] sm:$0xff]  }
 0x2ad   : > { %7155 = vmatpush3.bf16.msra.mxu1 %v7936_v29  ;;  %7116 = vmatprep.subr.bf16.mxu0 %v7937_v17  ;;  %v2105_v19 = vmax.f32 %v2089_v49, 0.0  ;;  %v7030_v7 = vadd.f32 %v7029_v8, %v7028_v4  ;;  %v2142_v28 = vld [vmem:[#allocation2 + $0x12] sm:$0xff]  ;;  %v7959_v4 = vld [vmem:[%s9847_s3 + $0x1c8] sm:$0xff]  }
 0x2ae   : > { %7156 = vmatprep.subr.bf16.mxu1 %v7939_v20  ;;  %v7031_v23 = vpop.f32.mrf.mxu1  ;;  %v2131_v30 = vld [vmem:[#allocation2 + $0x19] sm:$0xff]  ;;  %v7953_v9 = vld [vmem:[%s9847_s3 + $0x150] sm:$0xff]  }
 0x2af   : > { %v2155_v56 = vld [vmem:[#allocation2 + $0x1b] sm:$0xff]  ;;  %2113 = vst [vmem:[#allocation2 + $0x2c] sm:$0xff] %v2105_v19  ;;  %v8819_v12 = vadd.f32 %v7030_v7, %v2029_v5  ;;  %v2137_v38 = vpack.c.bf16 %v2131_v30, %v2130_v10  ;;  %v8827_v36 = vpack.c.bf16 %v2105_v19, %v2104_v59  ;;  %v7954_v59 = vld [vmem:[%s9847_s3 + $0x110] sm:$0xff]   ;;  %v2200_v30 = vld [vmem:[#allocation2 + $0x7] sm:$0xff] }
 0x2b0   : > { %v2119_v11 = vld [vmem:[#allocation2 + $0x18] sm:$0xff]  ;;  %7117 = vmatpush3.bf16.msra.mxu0 %v7938_v26  ;;  %v2161_v40 = vpack.c.bf16 %v2155_v56, %v2154_v21  ;;  %v7032_v62 = vpop.f32.mrf.mxu1  ;;  %v7956_v60 = vld [vmem:[%s9847_s3 + $0x190] sm:$0xff]   ;;  %v7961_v56 = vld [vmem:[%s9847_s3 + $0x140] sm:$0xff]  }
 0x2b1   : > { %7157 = vmatpush3.bf16.msra.mxu1 %v7940_v35  ;;  %v2143_v55 = vld [vmem:[#allocation2 + $0x1a] sm:$0xff]  ;;  %7118 = vmatprep.subr.bf16.mxu0 %v7941_v63  ;;  %v2125_v24 = vpack.c.bf16 %v2119_v11, %v2118_v39  ;;  %v2106_v1 = vmax.f32 %v8819_v12, 0.0  ;;  %v7033_v46 = vadd.f32 %v7032_v62, %v7031_v23  ;;  %v2177_v48 = vld [vmem:[#allocation2 + $0xd] sm:$0xff] }
 0x2b2   : > { %v2149_v31 = vpack.c.bf16 %v2143_v55, %v2142_v28  ;;  %7158 = vmatprep.subr.bf16.mxu1 %v7943_v45  ;;  %2764 = vmatprep.mubr.bf16.mxu0 %v2137_v38  ;;  %v2132_v42 = vld [vmem:[#allocation2 + $0x21] sm:$0xff]  ;;  %v7952_v17 = vld [vmem:[%s9847_s3 + $0x198] sm:$0xff]   ;;  %v2201_v21 = vld [vmem:[#allocation2 + $0xf] sm:$0xff] }
 0x2b3   : > { %2829 = vmatprep.mubr.bf16.mxu1 %v2161_v40  ;;  %2765 = vmatmul.mubr.bf16.gmra.mxu0 %v2125_v24  ;;  %2114 = vst [vmem:[#allocation2 + $0x34] sm:$0xff] %v2106_v1  ;;  %v2097_v51 = vadd.f32 %v7033_v46, %v2032_v41  ;;  %v2156_v43 = vld [vmem:[#allocation2 + $0x23] sm:$0xff]  ;;  %v2208_v38 = vpack.c.bf16 %v2201_v21, %v2200_v30  ;;  %v2189_v28 = vld [vmem:[#allocation2 + $0xe] sm:$0xff]  ;;  %v2202_v41 = vld [vmem:[#allocation2 + $0x17] sm:$0xff] }
 0x2b4   : > { %2830 = vmatmul.mubr.bf16.gmra.mxu1 %v2149_v31  ;;  %7119 = vmatpush3.bf16.msra.mxu0 %v7942_v0  ;;  %v2120_v58 = vld [vmem:[#allocation2 + $0x20] sm:$0xff]  ;;  %v2178_v31 = vld [vmem:[#allocation2 + $0x15] sm:$0xff]  ;;  %v7991_v30 = vld [vmem:[%s9848_s4 + $0x8] sm:$0xff]  }
 0x2b5   : > { %7159 = vmatpush3.bf16.msra.mxu1 %v7944_v2  ;;  %7120 = vmatprep.subr.bf16.mxu0 %v7945_v13  ;;  %v2107_v33 = vmax.f32 %v2097_v51, 0.0  ;;  %v2144_v37 = vld [vmem:[#allocation2 + $0x22] sm:$0xff]  ;;  %v7968_v12 = vld [vmem:[%s9848_s4 + $0xb8] sm:$0xff]   ;;  %v7986_v21 = vld [vmem:[%s9848_s4 + $0xd0] sm:$0xff]  }
 0x2b6   : > { %7160 = vmatprep.subr.bf16.mxu1 %v7947_v14  ;;  %v2133_v34 = vld [vmem:[#allocation2 + $0x29] sm:$0xff]  ;;  %v7963_v11 = vld [vmem:[%s9847_s3 + $0x1c0] sm:$0xff]  }
 0x2b7   : > { %v2157_v15 = vld [vmem:[#allocation2 + $0x2b] sm:$0xff]  ;;  %2115 = vst [vmem:[#allocation2 + $0x3c] sm:$0x7f] %v2107_v33  ;;  %v2138_v44 = vpack.c.bf16 %v2133_v34, %v2132_v42  ;;  %v7962_v40 = vld [vmem:[%s9847_s3 + $0x100] sm:$0xff]  }
 0x2b8   : > { %v2121_v47 = vld [vmem:[#allocation2 + $0x28] sm:$0xff]  ;;  %7121 = vmatpush3.bf16.msra.mxu0 %v7946_v32  ;;  %v2162_v25 = vpack.c.bf16 %v2157_v15, %v2156_v43  ;;  %v7964_v39 = vld [vmem:[%s9847_s3 + $0x180] sm:$0xff]  }
 0x2b9   : > { %7161 = vmatpush3.bf16.msra.mxu1 %v7948_v16  ;;  %v2126_v29 = vpack.c.bf16 %v2121_v47, %v2120_v58  ;;  %v2145_v52 = vld [vmem:[#allocation2 + $0x2a] sm:$0xff]  ;;  %7122 = vmatprep.subr.bf16.mxu0 %v7949_v18  ;;  %v2179_v55 = vld [vmem:[#allocation2 + $0x1d] sm:$0xff] }
 0x2ba   : > { %v2150_v20 = vpack.c.bf16 %v2145_v52, %v2144_v37  ;;  %7162 = vmatprep.subr.bf16.mxu1 %v7951_v53  ;;  %2772 = vmatprep.mubr.bf16.mxu0 %v2138_v44  ;;  %v2134_v49 = vld [vmem:[#allocation2 + $0x31] sm:$0xff]  ;;  %v2176_v2 = vld [vmem:[#allocation2 + $0x5] sm:$0xff]  ;;  %v2185_v14 = vpack.c.bf16 %v2179_v55, %v2178_v31 }
 0x2bb   : > { %2837 = vmatprep.mubr.bf16.mxu1 %v2162_v25  ;;  %2773 = vmatmul.mubr.bf16.gmra.mxu0 %v2126_v29  ;;  %v2158_v26 = vld [vmem:[#allocation2 + $0x33] sm:$0xff]  ;;  %v2184_v23 = vpack.c.bf16 %v2177_v48, %v2176_v2  ;;  %v2203_v62 = vld [vmem:[#allocation2 + $0x1f] sm:$0xff]  ;;  %v2204_v43 = vld [vmem:[#allocation2 + $0x27] sm:$0xff] }
 0x2bc   : > { %2838 = vmatmul.mubr.bf16.gmra.mxu1 %v2150_v20  ;;  %7123 = vmatpush3.bf16.msra.mxu0 %v7950_v50  ;;  %v2122_v35 = vld [vmem:[#allocation2 + $0x30] sm:$0xff]  ;;  %v2188_v24 = vld [vmem:[#allocation2 + $0x6] sm:$0xff]  ;;  %v2209_v46 = vpack.c.bf16 %v2203_v62, %v2202_v41  ;;  %v2191_v51 = vld [vmem:[#allocation2 + $0x1e] sm:$0xff] }
 0x2bd   : > { %7163 = vmatpush3.bf16.msra.mxu1 %v7952_v17  ;;  %7124 = vmatprep.subr.bf16.mxu0 %v7953_v9  ;;  %v2146_v7 = vld [vmem:[#allocation2 + $0x32] sm:$0xff]  ;;  %v2196_v13 = vpack.c.bf16 %v2189_v28, %v2188_v24  ;;  %v2180_v53 = vld [vmem:[#allocation2 + $0x25] sm:$0xff] }
 0x2be   : > { %7164 = vmatprep.subr.bf16.mxu1 %v7955_v57  ;;  %v2135_v8 = vld [vmem:[#allocation2 + $0x39] sm:$0xff]  ;;  %v2181_v32 = vld [vmem:[#allocation2 + $0x2d] sm:$0xff] }
 0x2bf   : > { %v2159_v63 = vld [vmem:[#allocation2 + $0x3b] sm:$0xff]  ;;  %v2139_v5 = vpack.c.bf16 %v2135_v8, %v2134_v49  ;;  %v2205_v16 = vld [vmem:[#allocation2 + $0x2f] sm:$0xff]  ;;  %v2186_v42 = vpack.c.bf16 %v2181_v32, %v2180_v53  ;;  %v2192_v44 = vld [vmem:[#allocation2 + $0x26] sm:$0xff] }
 0x2c0   : > { %v2123_v45 = vld [vmem:[#allocation2 + $0x38] sm:$0xff]  ;;  %7125 = vmatpush3.bf16.msra.mxu0 %v7954_v59  ;;  %v2163_v6 = vpack.c.bf16 %v2159_v63, %v2158_v26  ;;  %v2210_v58 = vpack.c.bf16 %v2205_v16, %v2204_v43  ;;  %v2193_v50 = vld [vmem:[#allocation2 + $0x2e] sm:$0xff]  ;;  %v7978_v8 = vld [vmem:[%s9848_s4 + $0xe0] sm:$0xff]  }
 0x2c1   : > { %7165 = vmatpush3.bf16.msra.mxu1 %v7956_v60  ;;  %v2127_v19 = vpack.c.bf16 %v2123_v45, %v2122_v35  ;;  %v2147_v10 = vld [vmem:[#allocation2 + $0x3a] sm:$0xff]  ;;  %7126 = vmatprep.subr.bf16.mxu0 %v7957_v3  ;;  %v2198_v25 = vpack.c.bf16 %v2193_v50, %v2192_v44  ;;  %v7970_v60 = vld [vmem:[%s9848_s4 + $0xf0] sm:$0xff]   ;;  %v7973_v48 = vld [vmem:[%s9848_s4 + $0x68] sm:$0xff]  }
 0x2c2   : > { %v2151_v0 = vpack.c.bf16 %v2147_v10, %v2146_v7  ;;  %7166 = vmatprep.subr.bf16.mxu1 %v7959_v4  ;;  %2780 = vmatprep.mubr.bf16.mxu0 %v2139_v5  ;;  %v2190_v18 = vld [vmem:[#allocation2 + $0x16] sm:$0xff]  ;;  %v2207_v47 = vld [vmem:[#allocation2 + $0x3f] sm:$0xff]  ;;  %v7974_v49 = vld [vmem:[%s9848_s4 + $0xe8] sm:$0xff]  }
 0x2c3   : > { %2845 = vmatprep.mubr.bf16.mxu1 %v2163_v6  ;;  %2781 = vmatmul.mubr.bf16.gmra.mxu0 %v2127_v19  ;;  %v2197_v33 = vpack.c.bf16 %v2191_v51, %v2190_v18  ;;  %v2183_v34 = vld [vmem:[#allocation2 + $0x3d] sm:$0xff]  ;;  %v7971_v3 = vld [vmem:[%s9848_s4 + $0x30] sm:$0xff]   ;;  %v7975_v26 = vld [vmem:[%s9848_s4 + $0x28] sm:$0xff]  }
 0x2c4   : > { %2846 = vmatmul.mubr.bf16.gmra.mxu1 %v2151_v0  ;;  %7127 = vmatpush3.bf16.msra.mxu0 %v7958_v61  ;;  %v2206_v15 = vld [vmem:[#allocation2 + $0x37] sm:$0xff]  ;;  %v7976_v35 = vld [vmem:[%s9848_s4 + $0xa8] sm:$0xff]   ;;  %v7977_v61 = vld [vmem:[%s9848_s4 + $0x60] sm:$0xff]  }
 0x2c5   : > { %2886 = vmatprep.mubr.bf16.mxu0 %v2184_v23  ;;  %7167 = vmatpush3.bf16.msra.mxu1 %v7960_v22  ;;  %v2211_v37 = vpack.c.bf16 %v2207_v47, %v2206_v15  ;;  %v2171_v52 = vld [vmem:[#allocation2 + $0x3c] sm:$0xff]  ;;  %v7972_v4 = vld [vmem:[%s9848_s4 + $0xb0] sm:$0xff]   ;;  %v7989_v22 = vld [vmem:[%s9848_s4 + $0x48] sm:$0xff]  }
 0x2c6   : > { %2951 = vmatprep.mubr.bf16.mxu1 %v2208_v38  ;;  %7128 = vmatprep.subr.bf16.mxu0 %v7961_v56  ;;  %v2195_v17 = vld [vmem:[#allocation2 + $0x3e] sm:$0xff]  ;;  %v2175_v20 = vpack.c.bf16 %v2171_v52, %v2106_v1  ;;  %v7969_v1 = vld [vmem:[%s9848_s4 + $0x70] sm:$0xff]   ;;  %v7990_v23 = vld [vmem:[%s9848_s4 + $0xc8] sm:$0xff]  }
 0x2c7   : > { %7168 = vmatprep.subr.bf16.mxu1 %v7963_v11  ;;  %v7965_v57 = vld [vmem:[%s9848_s4 + $0x78] sm:$0xff]   ;;  %v7979_v63 = vld [vmem:[%s9848_s4 + $0x20] sm:$0xff]   ;;  %v7985_v10 = vld [vmem:[%s9848_s4 + $0x50] sm:$0xff]  }
 0x2c8   : > { %7129 = vmatpush3.bf16.msra.mxu0 %v7962_v40  ;;  %v7967_v59 = vld [vmem:[%s9848_s4 + $0x38] sm:$0xff]   ;;  %v7980_v45 = vld [vmem:[%s9848_s4 + $0xa0] sm:$0xff]   ;;  %v7987_v0 = vld [vmem:[%s9848_s4 + $0x10] sm:$0xff]  }
 0x2c9   : > { %7169 = vmatpush3.bf16.msra.mxu1 %v7964_v39  ;;  %7194 = vmatprep.subr.bf16.mxu0 %v7965_v57  ;;  %v7981_v5 = vld [vmem:[%s9848_s4 + $0x58] sm:$0xff]   ;;  %v7988_v2 = vld [vmem:[%s9848_s4 + $0x90] sm:$0xff]   ;;  %v7992_v56 = vld [vmem:[%s9848_s4 + $0x88] sm:$0xff]  }
 0x2ca   : > { %v7982_v6 = vld [vmem:[%s9848_s4 + $0xd8] sm:$0xff]   ;;  %v7993_v11 = vld [vmem:[%s9848_s4 + $0x40] sm:$0xff]  }
 0x2cb   : > { %2887 = vmatmul.mubr.bf16.vlgmr.msra.gmra.mxu0 %v8767_v27  ;;  %v2182_v27 = vld [vmem:[#allocation2 + $0x35] sm:$0xff]  ;;  %v7994_v38 = vld [vmem:[%s9848_s4 + $0xc0] sm:$0xff]  }
 0x2cc   : > { %2952 = vmatmul.mubr.bf16.vlgmr.msra.gmra.mxu1 %v2196_v13  ;;  %2894 = vmatprep.mubr.bf16.mxu0 %v2185_v14  ;;  %v2187_v29 = vpack.c.bf16 %v2183_v34, %v2182_v27  ;;  %v7983_v19 = vld [vmem:[%s9848_s4 + $0x18] sm:$0xff]   ;;  %v7995_v40 = vld [vmem:[%s9848_s4] sm:$0xff]  }
 0x2cd   : > { %2959 = vmatprep.mubr.bf16.mxu1 %v2209_v46  ;;  %7195 = vmatpush3.bf16.msra.mxu0 %v7967_v59  ;;  %v7984_v7 = vld [vmem:[%s9848_s4 + $0x98] sm:$0xff]   ;;  %v7996_v39 = vld [vmem:[%s9848_s4 + $0x80] sm:$0xff]  }
 0x2ce   : > { %7196 = vmatprep.subr.bf16.mxu0 %v7969_v1  ;;  %v7997_v28 = vld [vmem:[%s9848_s4 + $0x178] sm:$0xff]  }
 0x2cf   : > { %v7998_v55 = vld [vmem:[%s9848_s4 + $0x1f8] sm:$0xff]  }
 0x2d1   : > { %7197 = vmatpush3.bf16.msra.mxu0 %v7971_v3 }
 0x2d2   : > { %7198 = vmatprep.subr.bf16.mxu0 %v7973_v48 }
 0x2d3   : > { %2895 = vmatmul.mubr.bf16.gmra.mxu0 %v8789_v54  ;;  %v2194_v54 = vld [vmem:[#allocation2 + $0x36] sm:$0xff] }
 0x2d4   : > { %2960 = vmatmul.mubr.bf16.gmra.mxu1 %v2197_v33  ;;  %2902 = vmatprep.mubr.bf16.mxu0 %v2186_v42  ;;  %v2199_v9 = vpack.c.bf16 %v2195_v17, %v2194_v54 }
 0x2d5   : > { %2967 = vmatprep.mubr.bf16.mxu1 %v2210_v58  ;;  %7199 = vmatpush3.bf16.msra.mxu0 %v7975_v26 }
 0x2d6   : > { %7200 = vmatprep.subr.bf16.mxu0 %v7977_v61 }
 0x2d9   : > { %7201 = vmatpush3.bf16.msra.mxu0 %v7979_v63 }
 0x2da   : > { %7202 = vmatprep.subr.bf16.mxu0 %v7981_v5 }
 0x2db   : > { %2903 = vmatmul.mubr.bf16.gmra.mxu0 %v8827_v36  ;;  %v7966_v36 = vld [vmem:[%s9848_s4 + $0xf8] sm:$0xff]  }
 0x2dc   : > { %2968 = vmatmul.mubr.bf16.gmra.mxu1 %v2198_v25  ;;  %2910 = vmatprep.mubr.bf16.mxu0 %v2187_v29 }
 0x2dd   : > { %2975 = vmatprep.mubr.bf16.mxu1 %v2211_v37  ;;  %7240 = vmatprep.subr.bf16.mxu1 %v7966_v36 }
 0x2de   : > { %7241 = vmatpush3.bf16.msra.mxu1 %v7968_v12  ;;  %7203 = vmatpush3.bf16.msra.mxu0 %v7983_v19 }
 0x2df   : > { %7242 = vmatprep.subr.bf16.mxu1 %v7970_v60  ;;  %7204 = vmatprep.subr.bf16.mxu0 %v7985_v10 }
 0x2e2   : > { %7243 = vmatpush3.bf16.msra.mxu1 %v7972_v4  ;;  %7205 = vmatpush3.bf16.msra.mxu0 %v7987_v0 }
 0x2e3   : > { %2911 = vmatmul.mubr.bf16.gmra.mxu0 %v2175_v20  ;;  %7244 = vmatprep.subr.bf16.mxu1 %v7974_v49 }
 0x2e4   : > { %2976 = vmatmul.mubr.bf16.gmra.mxu1 %v2199_v9  ;;  %7206 = vmatprep.subr.bf16.mxu0 %v7989_v22 }
 0x2e6   : > { %7245 = vmatpush3.bf16.msra.mxu1 %v7976_v35  ;;  %7207 = vmatpush3.bf16.msra.mxu0 %v7991_v30 }
 0x2e7   : > { %7246 = vmatprep.subr.bf16.mxu1 %v7978_v8  ;;  %7208 = vmatprep.subr.bf16.mxu0 %v7993_v11 }
 0x2ea   : > { %7247 = vmatpush3.bf16.msra.mxu1 %v7980_v45  ;;  %7209 = vmatpush3.bf16.msra.mxu0 %v7995_v40 }
 0x2eb   : > { %7248 = vmatprep.subr.bf16.mxu1 %v7982_v6  ;;  %7286 = vmatprep.subr.bf16.mxu0 %v7997_v28 }
 0x2ee   : > { %7249 = vmatpush3.bf16.msra.mxu1 %v7984_v7 }
 0x2ef   : > { %7250 = vmatprep.subr.bf16.mxu1 %v7986_v21 }
 0x2f2   : > { %7251 = vmatpush3.bf16.msra.mxu1 %v7988_v2 }
 0x2f3   : > { %7252 = vmatprep.subr.bf16.mxu1 %v7990_v23 }
 0x2f6   : > { %7253 = vmatpush3.bf16.msra.mxu1 %v7992_v56 }
 0x2f7   : > { %7254 = vmatprep.subr.bf16.mxu1 %v7994_v38 }
 0x2fa   : > { %7255 = vmatpush3.bf16.msra.mxu1 %v7996_v39 }
 0x2fb   : > { %7332 = vmatprep.subr.bf16.mxu1 %v7998_v55 }
 0x36b   : > { %v7050_v62 = vpop.f32.mrf.mxu0 }
 0x36c   : > { %v7090_v24 = vpop.f32.mrf.mxu1 }
 0x36d   : > { %v7051_v31 = vpop.f32.mrf.mxu0 }
 0x36e   : > { %v7091_v13 = vpop.f32.mrf.mxu1  ;;  %v7052_v59 = vadd.f32 %v7051_v31, %v7050_v62 }
 0x36f   : > { %v7053_v14 = vpop.f32.mrf.mxu0  ;;  %v7092_v12 = vadd.f32 %v7091_v13, %v7090_v24 }
 0x370   : > { %v7093_v41 = vpop.f32.mrf.mxu1 }
 0x371   : > { %v7054_v46 = vpop.f32.mrf.mxu0  ;;  %v2824_v49 = vadd.f32 %v7092_v12, %v7052_v59 }
 0x372   : > { %v7094_v51 = vpop.f32.mrf.mxu1  ;;  %v7055_v3 = vadd.f32 %v7054_v46, %v7053_v14 }
 0x373   : > { %v7056_v32 = vpop.f32.mrf.mxu0  ;;  %v7095_v4 = vadd.f32 %v7094_v51, %v7093_v41 }
 0x374   : > { %v7096_v16 = vpop.f32.mrf.mxu1 }
 0x375   : > { %v7057_v18 = vpop.f32.mrf.mxu0  ;;  %v2827_v5 = vadd.f32 %v7095_v4, %v7055_v3 }
 0x376   : > { %v7097_v53 = vpop.f32.mrf.mxu1  ;;  %v7058_v19 = vadd.f32 %v7057_v18, %v7056_v32 }
 0x377   : > { %v7059_v33 = vpop.f32.mrf.mxu0  ;;  %v7098_v7 = vadd.f32 %v7097_v53, %v7096_v16 }
 0x378   : > { %v7099_v42 = vpop.f32.mrf.mxu1 }
 0x379   : > { %v7060_v43 = vpop.f32.mrf.mxu0  ;;  %v2832_v39 = vadd.f32 %v7098_v7, %v7058_v19 }
 0x37a   : > { %v7100_v58 = vpop.f32.mrf.mxu1  ;;  %v7061_v11 = vadd.f32 %v7060_v43, %v7059_v33 }
 0x37b   : > { %v7062_v50 = vpop.f32.mrf.mxu0  ;;  %v7101_v38 = vadd.f32 %v7100_v58, %v7099_v42 }
 0x37c   : > { %v7102_v27 = vpop.f32.mrf.mxu1 }
 0x37d   : > { %v7063_v34 = vpop.f32.mrf.mxu0  ;;  %v2835_v46 = vadd.f32 %v7101_v38, %v7061_v11 }
 0x37e   : > { %v7103_v15 = vpop.f32.mrf.mxu1  ;;  %v7064_v32 = vadd.f32 %v7063_v34, %v7062_v50 }
 0x37f   : > { %v8999_v47 = vpop.f32.mrf.mxu0  ;;  %v7104_v16 = vadd.f32 %v7103_v15, %v7102_v27 }
 0x380   : > { %v9001_v44 = vpop.f32.mrf.mxu1 }
 0x381   : > { %v7066_v25 = vpop.f32.mrf.mxu0  ;;  %v2840_v50 = vadd.f32 %v7104_v16, %v7064_v32  ;;  %v8006_v16 = vld [vmem:[%s9848_s4 + $0x1e8] sm:$0xff]  }
 0x382   : > { %v7106_v29 = vpop.f32.mrf.mxu1 }
 0x383   : > { %v9003_v37 = vpop.f32.mrf.mxu0 }
 0x384   : > { %v9005_v52 = vpop.f32.mrf.mxu1 }
 0x385   : > { %v9007_v54 = vpop.f32.mrf.mxu0 }
 0x386   : > { %v9009_v17 = vpop.f32.mrf.mxu1 }
 0x387   : > { %v9011_v20 = vpop.f32.mrf.mxu0 }
 0x388   : > { %v9013_v9 = vpop.f32.mrf.mxu1 }
 0x389   : > { %v9015_v57 = vpop.f32.mrf.mxu0 }
 0x38a   : > { %v9017_v36 = vpop.f32.mrf.mxu1 }
 0x38b   : > { %v7130_v1 = vpop.f32.mrf.mxu0 }
 0x38c   : > { %v7170_v60 = vpop.f32.mrf.mxu1 }
 0x38d   : > { %v7131_v48 = vpop.f32.mrf.mxu0 }
 0x38e   : > { %v7132_v26 = vadd.f32 %v7131_v48, %v7130_v1  ;;  %v7171_v35 = vpop.f32.mrf.mxu1  ;;  %v7067_v1 = vadd.f32 %v7066_v25, %v8999_v47  ;;  %v7999_v47 = vld [vmem:[%s9848_s4 + $0x138] sm:$0xff]  }
 0x38f   : > { %v7133_v61 = vpop.f32.mrf.mxu0  ;;  %v7172_v63 = vadd.f32 %v7171_v35, %v7170_v60  ;;  %v7107_v60 = vadd.f32 %v7106_v29, %v9001_v44  ;;  %v8000_v44 = vld [vmem:[%s9848_s4 + $0x1b8] sm:$0xff]   ;;  %v7070_v29 = vadd.f32 %v9007_v54, %v9003_v37 }
 0x390   : > { %v2889_v8 = vadd.f32 %v7132_v26, %v2824_v49  ;;  %v7173_v45 = vpop.f32.mrf.mxu1 }
 0x391   : > { %v7134_v6 = vpop.f32.mrf.mxu0  ;;  %v2843_v25 = vadd.f32 %v7107_v60, %v7067_v1  ;;  %v8007_v1 = vld [vmem:[%s9848_s4 + $0x128] sm:$0xff]  }
 0x392   : > { %v9019_v10 = vadd.f32 %v7172_v63, %v2889_v8  ;;  %v7135_v21 = vadd.f32 %v7134_v6, %v7133_v61  ;;  %v7174_v0 = vpop.f32.mrf.mxu1  ;;  %v7110_v63 = vadd.f32 %v9009_v17, %v9005_v52  ;;  %v8001_v52 = vld [vmem:[%s9848_s4 + $0x170] sm:$0xff]  }
 0x393   : > { %v7136_v2 = vpop.f32.mrf.mxu0  ;;  %v7175_v30 = vadd.f32 %v7174_v0, %v7173_v45  ;;  %v8002_v17 = vld [vmem:[%s9848_s4 + $0x1f0] sm:$0xff]  }
 0x394   : > { %v2984_v22 = vmax.f32 %v9019_v10, 0.0  ;;  %v2892_v23 = vadd.f32 %v7135_v21, %v2827_v5  ;;  %v7176_v56 = vpop.f32.mrf.mxu1  ;;  %v8034_v10 = vld [vmem:[%s9850_s6 + $0xf0] sm:$0xff]  }
 0x395   : > { %v7137_v40 = vpop.f32.mrf.mxu0 }
 0x396   : > { %2992 = vst [vmem:[#allocation2 + $0x4] sm:$0xff] %v2984_v22  ;;  %v9024_v28 = vadd.f32 %v7175_v30, %v2892_v23  ;;  %v7138_v55 = vadd.f32 %v7137_v40, %v7136_v2  ;;  %v7177_v62 = vpop.f32.mrf.mxu1 }
 0x397   : > { %v7139_v24 = vpop.f32.mrf.mxu0  ;;  %v7178_v14 = vadd.f32 %v7177_v62, %v7176_v56 }
 0x398   : > { %v2985_v31 = vmax.f32 %v9024_v28, 0.0  ;;  %v2897_v13 = vadd.f32 %v7138_v55, %v2832_v39  ;;  %v7179_v41 = vpop.f32.mrf.mxu1  ;;  %v8035_v28 = vld [vmem:[%s9850_s6 + $0x30] sm:$0xff]  }
 0x399   : > { %v7140_v51 = vpop.f32.mrf.mxu0 }
 0x39a   : > { %2993 = vst [vmem:[#allocation2 + $0xc] sm:$0xff] %v2985_v31  ;;  %v9029_v18 = vadd.f32 %v7178_v14, %v2897_v13  ;;  %v7141_v53 = vadd.f32 %v7140_v51, %v7139_v24  ;;  %v7180_v33 = vpop.f32.mrf.mxu1  ;;  %v7073_v24 = vadd.f32 %v9015_v57, %v9011_v20  ;;  %v7113_v13 = vadd.f32 %v9017_v36, %v9013_v9  ;;  %v8003_v20 = vld [vmem:[%s9848_s4 + $0x130] sm:$0xff]   ;;  %v8005_v36 = vld [vmem:[%s9848_s4 + $0x168] sm:$0xff]  }
 0x39b   : > { %v7142_v42 = vpop.f32.mrf.mxu0  ;;  %v7181_v59 = vadd.f32 %v7180_v33, %v7179_v41  ;;  %v2848_v41 = vadd.f32 %v7110_v63, %v7070_v29  ;;  %v8004_v9 = vld [vmem:[%s9848_s4 + $0x1b0] sm:$0xff]   ;;  %v8008_v63 = vld [vmem:[%s9848_s4 + $0x1a8] sm:$0xff]  }
 0x39c   : > { %v2986_v43 = vmax.f32 %v9029_v18, 0.0  ;;  %v2900_v58 = vadd.f32 %v7141_v53, %v2835_v46  ;;  %v7182_v12 = vpop.f32.mrf.mxu1  ;;  %v2851_v60 = vadd.f32 %v7113_v13, %v7073_v24  ;;  %v8041_v18 = vld [vmem:[%s9850_s6 + $0x60] sm:$0xff]  }
 0x39d   : > { %v7143_v3 = vpop.f32.mrf.mxu0  ;;  %v3014_v61 = vld [vmem:[#allocation2 + $0x1] sm:$0xff] }
 0x39e   : > { %2994 = vst [vmem:[#allocation2 + $0x14] sm:$0xff] %v2986_v43  ;;  %v9036_v27 = vadd.f32 %v7181_v59, %v2900_v58  ;;  %v7144_v34 = vadd.f32 %v7143_v3, %v7142_v42  ;;  %v7183_v15 = vpop.f32.mrf.mxu1  ;;  %v3042_v8 = vld [vmem:[#allocation2 + $0x3] sm:$0xff] }
 0x39f   : > { %v7145_v4 = vpop.f32.mrf.mxu0  ;;  %v7184_v26 = vadd.f32 %v7183_v15, %v7182_v12  ;;  %v3000_v30 = vld [vmem:[#allocation2] sm:$0xff] }
 0x3a0   : > { %v2987_v48 = vmax.f32 %v9036_v27, 0.0  ;;  %v2905_v49 = vadd.f32 %v7144_v34, %v2840_v50  ;;  %v7185_v35 = vpop.f32.mrf.mxu1  ;;  %v3028_v56 = vld [vmem:[#allocation2 + $0x2] sm:$0xff] }
 0x3a1   : > { %v7146_v45 = vpop.f32.mrf.mxu0  ;;  %v3015_v5 = vld [vmem:[#allocation2 + $0x9] sm:$0xff]  ;;  %v8042_v27 = vld [vmem:[%s9850_s6 + $0xe0] sm:$0xff]  }
 0x3a2   : > { %v3043_v6 = vld [vmem:[#allocation2 + $0xb] sm:$0xff]  ;;  %2995 = vst [vmem:[#allocation2 + $0x1c] sm:$0xff] %v2987_v48  ;;  %v9051_v7 = vadd.f32 %v7184_v26, %v2905_v49  ;;  %v7147_v21 = vadd.f32 %v7146_v45, %v7145_v4  ;;  %v7186_v0 = vpop.f32.mrf.mxu1  ;;  %v3023_v2 = vpack.c.bf16 %v3015_v5, %v3014_v61  ;;  %v8009_v45 = vld [vmem:[%s9848_s4 + $0x160] sm:$0xff]  }
 0x3a3   : > { %v3001_v19 = vld [vmem:[#allocation2 + $0x8] sm:$0xff]  ;;  %v3051_v23 = vpack.c.bf16 %v3043_v6, %v3042_v8  ;;  %v7148_v37 = vpop.f32.mrf.mxu0  ;;  %v7187_v55 = vadd.f32 %v7186_v0, %v7185_v35 }
 0x3a4   : > { %v3029_v11 = vld [vmem:[#allocation2 + $0xa] sm:$0xff]  ;;  %v3009_v54 = vpack.c.bf16 %v3001_v19, %v3000_v30  ;;  %v2988_v40 = vmax.f32 %v9051_v7, 0.0  ;;  %v2908_v39 = vadd.f32 %v7147_v21, %v2843_v25  ;;  %v7188_v62 = vpop.f32.mrf.mxu1  ;;  %3656 = vmatprep.mubr.bf16.mxu0 %v3023_v2  ;;  %v8010_v21 = vld [vmem:[%s9848_s4 + $0x1e0] sm:$0xff]   ;;  %v8013_v30 = vld [vmem:[%s9848_s4 + $0x158] sm:$0xff]  }
 0x3a5   : > { %v3037_v38 = vpack.c.bf16 %v3029_v11, %v3028_v56  ;;  %3727 = vmatprep.mubr.bf16.mxu1 %v3051_v23  ;;  %v7149_v14 = vpop.f32.mrf.mxu0  ;;  %v3016_v59 = vld [vmem:[#allocation2 + $0x11] sm:$0xff]  ;;  %v8011_v2 = vld [vmem:[%s9848_s4 + $0x120] sm:$0xff]  }
 0x3a6   : > { %3657 = vmatmul.mubr.bf16.vlgmr.msra.gmra.mxu0 %v3009_v54  ;;  %2996 = vst [vmem:[#allocation2 + $0x24] sm:$0xff] %v2988_v40  ;;  %v9066_v46 = vadd.f32 %v7187_v55, %v2908_v39  ;;  %v7150_v51 = vadd.f32 %v7149_v14, %v7148_v37  ;;  %v7189_v32 = vpop.f32.mrf.mxu1  ;;  %v3044_v12 = vld [vmem:[#allocation2 + $0x13] sm:$0xff]  ;;  %v8012_v23 = vld [vmem:[%s9848_s4 + $0x1a0] sm:$0xff]  }
 0x3a7   : > { %3728 = vmatmul.mubr.bf16.vlgmr.msra.gmra.mxu1 %v3037_v38  ;;  %7287 = vmatpush3.bf16.msra.mxu0 %v7999_v47  ;;  %v7151_v57 = vpop.f32.mrf.mxu0  ;;  %v7190_v42 = vadd.f32 %v7189_v32, %v7188_v62  ;;  %v3002_v61 = vld [vmem:[#allocation2 + $0x10] sm:$0xff]  ;;  %v8014_v56 = vld [vmem:[%s9848_s4 + $0x1d8] sm:$0xff]  }
 0x3a8   : > { %7333 = vmatpush3.bf16.msra.mxu1 %v8000_v44  ;;  %7288 = vmatprep.subr.bf16.mxu0 %v8001_v52  ;;  %v2989_v53 = vmax.f32 %v9066_v46, 0.0  ;;  %v2913_v33 = vadd.f32 %v7150_v51, %v2848_v41  ;;  %v7191_v58 = vpop.f32.mrf.mxu1  ;;  %v3030_v8 = vld [vmem:[#allocation2 + $0x12] sm:$0xff] }
 0x3a9   : > { %7334 = vmatprep.subr.bf16.mxu1 %v8002_v17  ;;  %v7152_v3 = vpop.f32.mrf.mxu0  ;;  %v3017_v50 = vld [vmem:[#allocation2 + $0x19] sm:$0xff]  ;;  %v8049_v7 = vld [vmem:[%s9850_s6 + $0x50] sm:$0xff]  }
 0x3aa   : > { %v3045_v34 = vld [vmem:[#allocation2 + $0x1b] sm:$0xff]  ;;  %2997 = vst [vmem:[#allocation2 + $0x2c] sm:$0xff] %v2989_v53  ;;  %v9086_v4 = vadd.f32 %v7190_v42, %v2913_v33  ;;  %v7153_v49 = vadd.f32 %v7152_v3, %v7151_v57  ;;  %v7192_v26 = vpop.f32.mrf.mxu1  ;;  %v3024_v35 = vpack.c.bf16 %v3017_v50, %v3016_v59  ;;  %v8019_v57 = vld [vmem:[%s9848_s4 + $0x110] sm:$0xff]   ;;  %v8021_v33 = vld [vmem:[%s9848_s4 + $0x148] sm:$0xff]  }
 0x3ab   : > { %v3003_v15 = vld [vmem:[#allocation2 + $0x18] sm:$0xff]  ;;  %7289 = vmatpush3.bf16.msra.mxu0 %v8003_v20  ;;  %v3052_v44 = vpack.c.bf16 %v3045_v34, %v3044_v12  ;;  %v7193_v19 = vadd.f32 %v7192_v26, %v7191_v58  ;;  %v8017_v20 = vld [vmem:[%s9848_s4 + $0x150] sm:$0xff]   ;;  %v8022_v42 = vld [vmem:[%s9848_s4 + $0x1c8] sm:$0xff]  }
 0x3ac   : > { %7335 = vmatpush3.bf16.msra.mxu1 %v8004_v9  ;;  %v3031_v47 = vld [vmem:[#allocation2 + $0x1a] sm:$0xff]  ;;  %v3010_v25 = vpack.c.bf16 %v3003_v15, %v3002_v61  ;;  %7290 = vmatprep.subr.bf16.mxu0 %v8005_v36  ;;  %v2990_v5 = vmax.f32 %v9086_v4, 0.0  ;;  %v2916_v6 = vadd.f32 %v7153_v49, %v2851_v60  ;;  %v8018_v9 = vld [vmem:[%s9848_s4 + $0x1d0] sm:$0xff]  }
 0x3ad   : > { %v3038_v29 = vpack.c.bf16 %v3031_v47, %v3030_v8  ;;  %3664 = vmatprep.mubr.bf16.mxu0 %v3024_v35  ;;  %7336 = vmatprep.subr.bf16.mxu1 %v8006_v16  ;;  %v3018_v37 = vld [vmem:[#allocation2 + $0x21] sm:$0xff]  ;;  %v8015_v41 = vld [vmem:[%s9848_s4 + $0x118] sm:$0xff]   ;;  %v8020_v36 = vld [vmem:[%s9848_s4 + $0x190] sm:$0xff]  }
 0x3ae   : > { %3735 = vmatprep.mubr.bf16.mxu1 %v3052_v44  ;;  %3665 = vmatmul.mubr.bf16.gmra.mxu0 %v3010_v25  ;;  %2998 = vst [vmem:[#allocation2 + $0x34] sm:$0xff] %v2990_v5  ;;  %v9100_v0 = vadd.f32 %v7193_v19, %v2916_v6  ;;  %v3046_v54 = vld [vmem:[#allocation2 + $0x23] sm:$0xff]  ;;  %v8016_v32 = vld [vmem:[%s9848_s4 + $0x198] sm:$0xff]  }
 0x3af   : > { %3736 = vmatmul.mubr.bf16.gmra.mxu1 %v3038_v29  ;;  %7291 = vmatpush3.bf16.msra.mxu0 %v8007_v1  ;;  %v3004_v38 = vld [vmem:[#allocation2 + $0x20] sm:$0xff]  ;;  %v8023_v8 = vld [vmem:[%s9848_s4 + $0x108] sm:$0xff]  }
 0x3b0   : > { %7337 = vmatpush3.bf16.msra.mxu1 %v8008_v63  ;;  %7292 = vmatprep.subr.bf16.mxu0 %v8009_v45  ;;  %v2991_v11 = vmax.f32 %v9100_v0, 0.0  ;;  %v3032_v13 = vld [vmem:[#allocation2 + $0x22] sm:$0xff] }
 0x3b1   : > { %7338 = vmatprep.subr.bf16.mxu1 %v8010_v21  ;;  %v3019_v52 = vld [vmem:[#allocation2 + $0x29] sm:$0xff]  ;;  %v8025_v25 = vld [vmem:[%s9848_s4 + $0x140] sm:$0xff]   ;;  %v8029_v21 = vld [vmem:[%s9850_s6 + $0x78] sm:$0xff]  }
 0x3b2   : > { %v3047_v17 = vld [vmem:[#allocation2 + $0x2b] sm:$0xff]  ;;  %2999 = vst [vmem:[#allocation2 + $0x3c] sm:$0xff] %v2991_v11  ;;  %v3025_v55 = vpack.c.bf16 %v3019_v52, %v3018_v37  ;;  %v8026_v63 = vld [vmem:[%s9848_s4 + $0x1c0] sm:$0xff]  }
 0x3b3   : > { %v3005_v39 = vld [vmem:[#allocation2 + $0x28] sm:$0xff]  ;;  %v3053_v62 = vpack.c.bf16 %v3047_v17, %v3046_v54  ;;  %7293 = vmatpush3.bf16.msra.mxu0 %v8011_v2  ;;  %v8027_v45 = vld [vmem:[%s9848_s4 + $0x100] sm:$0xff]  }
 0x3b4   : > { %v3011_v24 = vpack.c.bf16 %v3005_v39, %v3004_v38  ;;  %v3033_v14 = vld [vmem:[#allocation2 + $0x2a] sm:$0xff]  ;;  %7339 = vmatpush3.bf16.msra.mxu1 %v8012_v23  ;;  %7294 = vmatprep.subr.bf16.mxu0 %v8013_v30  ;;  %v8028_v19 = vld [vmem:[%s9848_s4 + $0x180] sm:$0xff]   ;;  %v8030_v30 = vld [vmem:[%s9850_s6 + $0xf8] sm:$0xff]  }
 0x3b5   : > { %v3039_v51 = vpack.c.bf16 %v3033_v14, %v3032_v13  ;;  %3672 = vmatprep.mubr.bf16.mxu0 %v3025_v55  ;;  %3743 = vmatprep.mubr.bf16.mxu1 %v3053_v62  ;;  %v3020_v16 = vld [vmem:[#allocation2 + $0x31] sm:$0xff]  ;;  %v8024_v44 = vld [vmem:[%s9848_s4 + $0x188] sm:$0xff]   ;;  %v3065_v13 = vpack.c.bf16 %v2985_v31, %v2984_v22  ;;  %v8057_v4 = vld [vmem:[%s9850_s6 + $0x40] sm:$0xff]  }
 0x3b6   : > { %3673 = vmatmul.mubr.bf16.gmra.mxu0 %v3011_v24  ;;  %7340 = vmatprep.subr.bf16.mxu1 %v8014_v56  ;;  %v3048_v58 = vld [vmem:[#allocation2 + $0x33] sm:$0xff]  ;;  %v3070_v54 = vld [vmem:[#allocation2 + $0x5] sm:$0xff]  ;;  %v3073_v24 = vld [vmem:[#allocation2 + $0x1d] sm:$0xff] }
 0x3b7   : > { %3744 = vmatmul.mubr.bf16.gmra.mxu1 %v3039_v51  ;;  %7295 = vmatpush3.bf16.msra.mxu0 %v8015_v41  ;;  %v3006_v59 = vld [vmem:[#allocation2 + $0x30] sm:$0xff]  ;;  %v3098_v17 = vld [vmem:[#allocation2 + $0x7] sm:$0xff]  ;;  %v8031_v62 = vld [vmem:[%s9850_s6 + $0x38] sm:$0xff]  }
 0x3b8   : > { %7341 = vmatpush3.bf16.msra.mxu1 %v8016_v32  ;;  %7296 = vmatprep.subr.bf16.mxu0 %v8017_v20  ;;  %v3034_v12 = vld [vmem:[#allocation2 + $0x32] sm:$0xff]  ;;  %v3084_v14 = vld [vmem:[#allocation2 + $0x6] sm:$0xff]  ;;  %v3064_v0 = vld [vmem:[#allocation2 + $0x44] sm:$0x1] }
 0x3b9   : > { %7342 = vmatprep.subr.bf16.mxu1 %v8018_v9  ;;  %v3021_v1 = vld [vmem:[#allocation2 + $0x39] sm:$0xff]  ;;  %v3022_v26 = vld [vmem:[#allocation2 + $0x41] sm:$0x1]  ;;  %v3050_v35 = vld [vmem:[#allocation2 + $0x43] sm:$0x1] }
 0x3ba   : > { %v3049_v60 = vld [vmem:[#allocation2 + $0x3b] sm:$0xff]  ;;  %v3026_v50 = vpack.c.bf16 %v3021_v1, %v3020_v16  ;;  %v3027_v47 = vpack.c.bf16 %v3022_v26, %v3022_v26  ;;  %v3055_v29 = vpack.c.bf16 %v3050_v35, %v3050_v35  ;;  %v3071_v23 = vld [vmem:[#allocation2 + $0xd] sm:$0xff] }
 0x3bb   : > { %v3007_v3 = vld [vmem:[#allocation2 + $0x38] sm:$0xff]  ;;  %v3054_v34 = vpack.c.bf16 %v3049_v60, %v3048_v58  ;;  %7297 = vmatpush3.bf16.msra.mxu0 %v8019_v57  ;;  %v3008_v6 = vld [vmem:[#allocation2 + $0x40] sm:$0x1]  ;;  %v3036_v2 = vld [vmem:[#allocation2 + $0x42] sm:$0x1]  ;;  %v3079_v52 = vpack.c.bf16 %v3071_v23, %v3070_v54 }
 0x3bc   : > { %v3012_v15 = vpack.c.bf16 %v3007_v3, %v3006_v59  ;;  %v3035_v49 = vld [vmem:[#allocation2 + $0x3a] sm:$0xff]  ;;  %7343 = vmatpush3.bf16.msra.mxu1 %v8020_v36  ;;  %7298 = vmatprep.subr.bf16.mxu0 %v8021_v33  ;;  %v3099_v56 = vld [vmem:[#allocation2 + $0xf] sm:$0xff]  ;;  %v3013_v37 = vpack.c.bf16 %v3008_v6, %v3008_v6  ;;  %v3041_v38 = vpack.c.bf16 %v3036_v2, %v3036_v2  ;;  %v3074_v60 = vld [vmem:[#allocation2 + $0x25] sm:$0xff] }
 0x3bd   : > { %v3040_v61 = vpack.c.bf16 %v3035_v49, %v3034_v12  ;;  %3680 = vmatprep.mubr.bf16.mxu0 %v3026_v50  ;;  %3751 = vmatprep.mubr.bf16.mxu1 %v3054_v34  ;;  %v3107_v39 = vpack.c.bf16 %v3099_v56, %v3098_v17  ;;  %v3085_v55 = vld [vmem:[#allocation2 + $0xe] sm:$0xff]  ;;  %v8032_v41 = vld [vmem:[%s9850_s6 + $0xb8] sm:$0xff]   ;;  %v3066_v12 = vpack.c.bf16 %v2987_v48, %v2986_v43  ;;  %v8043_v48 = vld [vmem:[%s9850_s6 + $0x20] sm:$0xff]  }
 0x3be   : > { %3681 = vmatmul.mubr.bf16.gmra.mxu0 %v3012_v15  ;;  %7344 = vmatprep.subr.bf16.mxu1 %v8022_v42  ;;  %v3101_v51 = vld [vmem:[#allocation2 + $0x1f] sm:$0xff]  ;;  %v3093_v32 = vpack.c.bf16 %v3085_v55, %v3084_v14  ;;  %v3072_v20 = vld [vmem:[#allocation2 + $0x15] sm:$0xff]  ;;  %v8037_v16 = vld [vmem:[%s9850_s6 + $0x68] sm:$0xff]  }
 0x3bf   : > { %3752 = vmatmul.mubr.bf16.gmra.mxu1 %v3040_v61  ;;  %3688 = vmatprep.mubr.bf16.mxu0 %v3027_v47  ;;  %v8033_v9 = vld [vmem:[%s9850_s6 + $0x70] sm:$0xff]   ;;  %v3080_v57 = vpack.c.bf16 %v3073_v24, %v3072_v20  ;;  %v8038_v33 = vld [vmem:[%s9850_s6 + $0xe8] sm:$0xff]   ;;  %v3087_v42 = vld [vmem:[#allocation2 + $0x1e] sm:$0xff] }
 0x3c0   : > { %3759 = vmatprep.mubr.bf16.mxu1 %v3055_v29  ;;  %7299 = vmatpush3.bf16.msra.mxu0 %v8023_v8  ;;  %v3100_v36 = vld [vmem:[#allocation2 + $0x17] sm:$0xff]  ;;  %v3075_v58 = vld [vmem:[#allocation2 + $0x2d] sm:$0xff]  ;;  %v8044_v26 = vld [vmem:[%s9850_s6 + $0xa0] sm:$0xff]  }
 0x3c1   : > { %7345 = vmatpush3.bf16.msra.mxu1 %v8024_v44  ;;  %7300 = vmatprep.subr.bf16.mxu0 %v8025_v25  ;;  %v3108_v22 = vpack.c.bf16 %v3101_v51, %v3100_v36  ;;  %v8036_v31 = vld [vmem:[%s9850_s6 + $0xb0] sm:$0xff]   ;;  %v8039_v3 = vld [vmem:[%s9850_s6 + $0x28] sm:$0xff]   ;;  %v3081_v34 = vpack.c.bf16 %v3075_v58, %v3074_v60  ;;  %v8045_v35 = vld [vmem:[%s9850_s6 + $0x58] sm:$0xff]   ;;  %v3069_v51 = vpack.c.bf16 %v3064_v0, %v3064_v0 }
 0x3c2   : > { %7346 = vmatprep.subr.bf16.mxu1 %v8026_v63  ;;  %v3103_v59 = vld [vmem:[#allocation2 + $0x2f] sm:$0xff]  ;;  %v3102_v15 = vld [vmem:[#allocation2 + $0x27] sm:$0xff]  ;;  %v8046_v61 = vld [vmem:[%s9850_s6 + $0xd8] sm:$0xff]   ;;  %v3067_v63 = vpack.c.bf16 %v2989_v53, %v2988_v40 }
 0x3c3   : > { %v3086_v1 = vld [vmem:[#allocation2 + $0x16] sm:$0xff]  ;;  %v8040_v49 = vld [vmem:[%s9850_s6 + $0xa8] sm:$0xff]   ;;  %v3109_v43 = vpack.c.bf16 %v3103_v59, %v3102_v15  ;;  %v3105_v29 = vld [vmem:[#allocation2 + $0x3f] sm:$0xff] }
 0x3c4   : > { %7301 = vmatpush3.bf16.msra.mxu0 %v8027_v45  ;;  %v3094_v50 = vpack.c.bf16 %v3087_v42, %v3086_v1  ;;  %v3089_v8 = vld [vmem:[#allocation2 + $0x2e] sm:$0xff]  ;;  %v3077_v44 = vld [vmem:[#allocation2 + $0x3d] sm:$0xff]  ;;  %v3088_v45 = vld [vmem:[#allocation2 + $0x26] sm:$0xff] }
 0x3c5   : > { %7347 = vmatpush3.bf16.msra.mxu1 %v8028_v19  ;;  %7378 = vmatprep.subr.bf16.mxu0 %v8029_v21  ;;  %v3076_v47 = vld [vmem:[#allocation2 + $0x35] sm:$0xff]  ;;  %v3095_v19 = vpack.c.bf16 %v3089_v8, %v3088_v45  ;;  %v3078_v23 = vld [vmem:[#allocation2 + $0x45] sm:$0x1]  ;;  %v8053_v56 = vld [vmem:[%s9850_s6 + $0x48] sm:$0xff]  }
 0x3c6   : > { %3689 = vmatmul.mubr.bf16.gmra.mxu0 %v3013_v37  ;;  %7418 = vmatprep.subr.bf16.mxu1 %v8030_v30  ;;  %v3104_v25 = vld [vmem:[#allocation2 + $0x37] sm:$0xff]  ;;  %v3082_v21 = vpack.c.bf16 %v3077_v44, %v3076_v47  ;;  %v3106_v37 = vld [vmem:[#allocation2 + $0x47] sm:$0x1]  ;;  %v3083_v17 = vpack.c.bf16 %v3078_v23, %v3078_v23  ;;  %v8055_v55 = vld [vmem:[%s9850_s6 + $0x8] sm:$0xff]  }
 0x3c7   : > { %3760 = vmatmul.mubr.bf16.gmra.mxu1 %v3041_v38  ;;  %3798 = vmatprep.mubr.bf16.mxu0 %v3079_v52  ;;  %v8047_v6 = vld [vmem:[%s9850_s6 + $0x18] sm:$0xff]   ;;  %v3110_v46 = vpack.c.bf16 %v3105_v29, %v3104_v25  ;;  %v8050_v40 = vld [vmem:[%s9850_s6 + $0xd0] sm:$0xff]   ;;  %v8054_v52 = vld [vmem:[%s9850_s6 + $0xc8] sm:$0xff]  }
 0x3c8   : > { %3869 = vmatprep.mubr.bf16.mxu1 %v3107_v39  ;;  %v8048_v2 = vld [vmem:[%s9850_s6 + $0x98] sm:$0xff]   ;;  %v8051_v53 = vld [vmem:[%s9850_s6 + $0x10] sm:$0xff]   ;;  %v3068_v39 = vpack.c.bf16 %v2991_v11, %v2990_v5  ;;  %v8058_v5 = vld [vmem:[%s9850_s6 + $0xc0] sm:$0xff]  }
 0x3c9   : > { %v8052_v30 = vld [vmem:[%s9850_s6 + $0x90] sm:$0xff]   ;;  %v3091_v38 = vld [vmem:[#allocation2 + $0x3e] sm:$0xff]  ;;  %v3092_v11 = vld [vmem:[#allocation2 + $0x46] sm:$0x1] }
 0x3ca   : > { %v3090_v54 = vld [vmem:[#allocation2 + $0x36] sm:$0xff]  ;;  %v8059_v14 = vld [vmem:[%s9850_s6] sm:$0xff]   ;;  %v8111_v23 = vld [vmem:[%s9851_s7 + $0xc8] sm:$0xff]  }
 0x3cb   : > { %v3096_v24 = vpack.c.bf16 %v3091_v38, %v3090_v54  ;;  %v8063_v20 = vld [vmem:[%s8997_s26 + $0x4] ss:$16 sps:$4 sm:$0xff]   ;;  %v8064_v36 = vld [vmem:[%s8997_s26 + $0x8] ss:$16 sps:$4 sm:$0xff]   ;;  %v8073_v42 = vld [vmem:[%s8997_s26 + $0x40] ss:$16 sps:$4 sm:$0xff]  }
 0x3cc   : > { %v8076_v58 = vld [vmem:[%s8997_s26 + $0x48] ss:$16 sps:$4 sm:$0xff]   ;;  %v8081_v59 = vld [vmem:[%s8997_s26 + $0x64] ss:$16 sps:$4 sm:$0xff]   ;;  %v8079_v1 = vld [vmem:[%s8997_s26 + $0x60] ss:$16 sps:$4 sm:$0xff]  }
 0x3cd   : > { %v8082_v60 = vld [vmem:[%s8997_s26 + $0x68] ss:$16 sps:$4 sm:$0xff]   ;;  %v8097_v8 = vld [vmem:[%s9851_s7 + $0x60] sm:$0xff]  }
 0x3ce   : > { %3799 = vmatmul.mubr.bf16.vlgmr.msra.gmra.mxu0 %v3065_v13  ;;  %v8056_v13 = vld [vmem:[%s9850_s6 + $0x88] sm:$0xff]   ;;  %v8088_v15 = vld [vmem:[%s9851_s7 + $0xb8] sm:$0xff]   ;;  %v8098_v47 = vld [vmem:[%s9851_s7 + $0x20] sm:$0xff]  }
 0x3cf   : > { %3870 = vmatmul.mubr.bf16.vlgmr.msra.gmra.mxu1 %v3093_v32  ;;  %7379 = vmatpush3.bf16.msra.mxu0 %v8031_v62  ;;  %v3111_v62 = vpack.c.bf16 %v3106_v37, %v3106_v37  ;;  %v3097_v32 = vpack.c.bf16 %v3092_v11, %v3092_v11  ;;  %v8099_v44 = vld [vmem:[%s9851_s7 + $0xe0] sm:$0xff]   ;;  %v8101_v29 = vld [vmem:[%s9851_s7 + $0x58] sm:$0xff]   ;;  %v8110_v37 = vld [vmem:[%s9851_s7 + $0x8] sm:$0xff]  }
 0x3d0   : > { %7419 = vmatpush3.bf16.msra.mxu1 %v8032_v41  ;;  %3806 = vmatprep.mubr.bf16.mxu0 %v3080_v57  ;;  %v8060_v41 = vld [vmem:[%s9850_s6 + $0x80] sm:$0xff]   ;;  %v8102_v45 = vld [vmem:[%s9851_s7 + $0x18] sm:$0xff]   ;;  %v8112_v54 = vld [vmem:[%s9851_s7 + $0x88] sm:$0xff]  }
 0x3d1   : > { %3877 = vmatprep.mubr.bf16.mxu1 %v3108_v22  ;;  %7380 = vmatprep.subr.bf16.mxu0 %v8033_v9  ;;  %v8066_v9 = vld [vmem:[%s8997_s26 + $0xc] ss:$16 sps:$4 sm:$0xff]   ;;  %v8061_v57 = vld [vmem:[%s8997_s26] ss:$16 sps:$4 sm:$0xff]  }
 0x3d2   : > { %7420 = vmatprep.subr.bf16.mxu1 %v8034_v10  ;;  %v8069_v10 = vld [vmem:[%s8997_s26 + $0x24] ss:$16 sps:$4 sm:$0xff]   ;;  %v8072_v22 = vld [vmem:[%s8997_s26 + $0x2c] ss:$16 sps:$4 sm:$0xff]  }
 0x3d3   : > { %7381 = vmatpush3.bf16.msra.mxu0 %v8035_v28  ;;  %v8067_v28 = vld [vmem:[%s8997_s26 + $0x20] ss:$16 sps:$4 sm:$0xff]  }
 0x3d4   : > { %7421 = vmatpush3.bf16.msra.mxu1 %v8036_v31  ;;  %7382 = vmatprep.subr.bf16.mxu0 %v8037_v16  ;;  %v8070_v31 = vld [vmem:[%s8997_s26 + $0x28] ss:$16 sps:$4 sm:$0xff]   ;;  %v8075_v16 = vld [vmem:[%s8997_s26 + $0x44] ss:$16 sps:$4 sm:$0xff]  }
 0x3d5   : > { %7422 = vmatprep.subr.bf16.mxu1 %v8038_v33  ;;  %v8078_v33 = vld [vmem:[%s8997_s26 + $0x4c] ss:$16 sps:$4 sm:$0xff]   ;;  %v8100_v25 = vld [vmem:[%s9851_s7 + $0xa0] sm:$0xff]  }
 0x3d6   : > { %3807 = vmatmul.mubr.bf16.gmra.mxu0 %v3066_v12  ;;  %v8084_v12 = vld [vmem:[%s8997_s26 + $0x6c] ss:$16 sps:$4 sm:$0xff]   ;;  %v8113_v38 = vld [vmem:[%s9851_s7 + $0x40] sm:$0xff]  }
 0x3d7   : > { %3878 = vmatmul.mubr.bf16.gmra.mxu1 %v3094_v50  ;;  %3814 = vmatprep.mubr.bf16.mxu0 %v3081_v34  ;;  %v8086_v50 = vld [vmem:[%s9851_s7 + $0x38] sm:$0xff]  }
 0x3d8   : > { %3885 = vmatprep.mubr.bf16.mxu1 %v3109_v43  ;;  %7383 = vmatpush3.bf16.msra.mxu0 %v8039_v3  ;;  %v8085_v3 = vld [vmem:[%s9851_s7 + $0x78] sm:$0xff]   ;;  %v8091_v43 = vld [vmem:[%s9851_s7 + $0xf0] sm:$0xff]  }
 0x3d9   : > { %7423 = vmatpush3.bf16.msra.mxu1 %v8040_v49  ;;  %7384 = vmatprep.subr.bf16.mxu0 %v8041_v18  ;;  %v8087_v34 = vld [vmem:[%s9851_s7 + $0xf8] sm:$0xff]   ;;  %v8089_v49 = vld [vmem:[%s9851_s7 + $0x70] sm:$0xff]  }
 0x3da   : > { %7424 = vmatprep.subr.bf16.mxu1 %v8042_v27  ;;  %v8090_v18 = vld [vmem:[%s9851_s7 + $0x30] sm:$0xff]  }
 0x3db   : > { %v8092_v27 = vld [vmem:[%s9851_s7 + $0xb0] sm:$0xff]  }
 0x3dc   : > { %7385 = vmatpush3.bf16.msra.mxu0 %v8043_v48  ;;  %v8093_v48 = vld [vmem:[%s9851_s7 + $0x68] sm:$0xff]  }
 0x3dd   : > { %7425 = vmatpush3.bf16.msra.mxu1 %v8044_v26  ;;  %7386 = vmatprep.subr.bf16.mxu0 %v8045_v35  ;;  %v8094_v26 = vld [vmem:[%s9851_s7 + $0x28] sm:$0xff]  }
 0x3de   : > { %3815 = vmatmul.mubr.bf16.gmra.mxu0 %v3067_v63  ;;  %7426 = vmatprep.subr.bf16.mxu1 %v8046_v61  ;;  %v8095_v35 = vld [vmem:[%s9851_s7 + $0xe8] sm:$0xff]   ;;  %v8103_v63 = vld [vmem:[%s9851_s7 + $0xd8] sm:$0xff]  }
 0x3df   : > { %3886 = vmatmul.mubr.bf16.gmra.mxu1 %v3095_v19  ;;  %3822 = vmatprep.mubr.bf16.mxu0 %v3082_v21  ;;  %v8096_v61 = vld [vmem:[%s9851_s7 + $0xa8] sm:$0xff]   ;;  %v8105_v19 = vld [vmem:[%s9851_s7 + $0x50] sm:$0xff]  }
 0x3e0   : > { %3893 = vmatprep.mubr.bf16.mxu1 %v3110_v46  ;;  %7387 = vmatpush3.bf16.msra.mxu0 %v8047_v6  ;;  %v8104_v6 = vld [vmem:[%s9851_s7 + $0x98] sm:$0xff]   ;;  %v8107_v21 = vld [vmem:[%s9851_s7 + $0xd0] sm:$0xff]   ;;  %v8109_v46 = vld [vmem:[%s9851_s7 + $0x48] sm:$0xff]  }
 0x3e1   : > { %7427 = vmatpush3.bf16.msra.mxu1 %v8048_v2  ;;  %7388 = vmatprep.subr.bf16.mxu0 %v8049_v7  ;;  %v8106_v2 = vld [vmem:[%s9851_s7 + $0x10] sm:$0xff]  }
 0x3e2   : > { %7428 = vmatprep.subr.bf16.mxu1 %v8050_v40  ;;  %v8108_v7 = vld [vmem:[%s9851_s7 + $0x90] sm:$0xff]  }
 0x3e4   : > { %7389 = vmatpush3.bf16.msra.mxu0 %v8051_v53 }
 0x3e5   : > { %7429 = vmatpush3.bf16.msra.mxu1 %v8052_v30  ;;  %7390 = vmatprep.subr.bf16.mxu0 %v8053_v56 }
 0x3e6   : > { %3823 = vmatmul.mubr.bf16.gmra.mxu0 %v3068_v39  ;;  %7430 = vmatprep.subr.bf16.mxu1 %v8054_v52  ;;  %v8115_v39 = vld [vmem:[%s9851_s7 + $0xc0] sm:$0xff]  }
 0x3e7   : > { %3894 = vmatmul.mubr.bf16.gmra.mxu1 %v3096_v24  ;;  %3830 = vmatprep.mubr.bf16.mxu0 %v3083_v17  ;;  %v8114_v24 = vld [vmem:[%s9851_s7] sm:$0xff]  }
 0x3e8   : > { %7391 = vmatpush3.bf16.msra.mxu0 %v8055_v55  ;;  %3901 = vmatprep.mubr.bf16.mxu1 %v3111_v62 }
 0x3e9   : > { %7431 = vmatpush3.bf16.msra.mxu1 %v8056_v13  ;;  %7392 = vmatprep.subr.bf16.mxu0 %v8057_v4  ;;  %v8116_v13 = vld [vmem:[%s9851_s7 + $0x80] sm:$0xff]   ;;  %v8117_v4 = vld [vmem:[%s9851_s7 + $0x178] sm:$0xff]  }
 0x3ea   : > { %7432 = vmatprep.subr.bf16.mxu1 %v8058_v5 }
 0x3ec   : > { %7393 = vmatpush3.bf16.msra.mxu0 %v8059_v14 }
 0x3ed   : > { %7433 = vmatpush3.bf16.msra.mxu1 %v8060_v41  ;;  %7458 = vmatprep.subr.bf16.mxu0 %v8085_v3 }
 0x3ee   : > { %3831 = vmatmul.mubr.bf16.gmra.mxu0 %v3069_v51  ;;  %7480 = vmatprep.subr.bf16.mxu1 %v8087_v34 }
 0x3ef   : > { %3902 = vmatmul.mubr.bf16.gmra.mxu1 %v3097_v32  ;;  %4438 = vmatprep.mubr.bf16.mxu0 %v8063_v20 }
 0x3f0   : > { %4503 = vmatprep.mubr.bf16.mxu1 %v8066_v9 }
 0x3f6   : > { %4439 = vmatmul.mubr.bf16.vlgmr.msra.gmra.mxu0 %v8061_v57 }
 0x3f7   : > { %4504 = vmatmul.mubr.bf16.vlgmr.msra.gmra.mxu1 %v8064_v36  ;;  %4446 = vmatprep.mubr.bf16.mxu0 %v8069_v10 }
 0x3f8   : > { %4511 = vmatprep.mubr.bf16.mxu1 %v8072_v22  ;;  %7459 = vmatpush3.bf16.msra.mxu0 %v8086_v50 }
 0x3f9   : > { %7481 = vmatpush3.bf16.msra.mxu1 %v8088_v15  ;;  %7460 = vmatprep.subr.bf16.mxu0 %v8089_v49 }
 0x3fa   : > { %7482 = vmatprep.subr.bf16.mxu1 %v8091_v43 }
 0x3fc   : > { %7461 = vmatpush3.bf16.msra.mxu0 %v8090_v18 }
 0x3fd   : > { %7483 = vmatpush3.bf16.msra.mxu1 %v8092_v27  ;;  %7462 = vmatprep.subr.bf16.mxu0 %v8093_v48 }
 0x3fe   : > { %4447 = vmatmul.mubr.bf16.gmra.mxu0 %v8067_v28  ;;  %7484 = vmatprep.subr.bf16.mxu1 %v8095_v35 }
 0x3ff   : > { %4512 = vmatmul.mubr.bf16.gmra.mxu1 %v8070_v31  ;;  %4454 = vmatprep.mubr.bf16.mxu0 %v8075_v16 }
 0x400   : > { %4519 = vmatprep.mubr.bf16.mxu1 %v8078_v33  ;;  %7463 = vmatpush3.bf16.msra.mxu0 %v8094_v26 }
 0x401   : > { %7485 = vmatpush3.bf16.msra.mxu1 %v8096_v61  ;;  %7464 = vmatprep.subr.bf16.mxu0 %v8097_v8 }
 0x402   : > { %7486 = vmatprep.subr.bf16.mxu1 %v8099_v44 }
 0x404   : > { %7465 = vmatpush3.bf16.msra.mxu0 %v8098_v47 }
 0x405   : > { %7487 = vmatpush3.bf16.msra.mxu1 %v8100_v25  ;;  %7466 = vmatprep.subr.bf16.mxu0 %v8101_v29 }
 0x406   : > { %4455 = vmatmul.mubr.bf16.gmra.mxu0 %v8073_v42  ;;  %7488 = vmatprep.subr.bf16.mxu1 %v8103_v63 }
 0x407   : > { %4520 = vmatmul.mubr.bf16.gmra.mxu1 %v8076_v58  ;;  %4462 = vmatprep.mubr.bf16.mxu0 %v8081_v59 }
 0x408   : > { %4527 = vmatprep.mubr.bf16.mxu1 %v8084_v12  ;;  %7467 = vmatpush3.bf16.msra.mxu0 %v8102_v45 }
 0x409   : > { %7489 = vmatpush3.bf16.msra.mxu1 %v8104_v6  ;;  %7468 = vmatprep.subr.bf16.mxu0 %v8105_v19 }
 0x40a   : > { %7490 = vmatprep.subr.bf16.mxu1 %v8107_v21 }
 0x40c   : > { %7469 = vmatpush3.bf16.msra.mxu0 %v8106_v2 }
 0x40d   : > { %7491 = vmatpush3.bf16.msra.mxu1 %v8108_v7  ;;  %7470 = vmatprep.subr.bf16.mxu0 %v8109_v46 }
 0x40e   : > { %4463 = vmatmul.mubr.bf16.gmra.mxu0 %v8079_v1  ;;  %7492 = vmatprep.subr.bf16.mxu1 %v8111_v23 }
 0x40f   : > { %4528 = vmatmul.mubr.bf16.gmra.mxu1 %v8082_v60 }
 0x410   : > { %7471 = vmatpush3.bf16.msra.mxu0 %v8110_v37 }
 0x411   : > { %7493 = vmatpush3.bf16.msra.mxu1 %v8112_v54  ;;  %7472 = vmatprep.subr.bf16.mxu0 %v8113_v38 }
 0x412   : > { %7494 = vmatprep.subr.bf16.mxu1 %v8115_v39 }
 0x414   : > { %7473 = vmatpush3.bf16.msra.mxu0 %v8114_v24 }
 0x415   : > { %7495 = vmatpush3.bf16.msra.mxu1 %v8116_v13  ;;  %7502 = vmatprep.subr.bf16.mxu0 %v8117_v4 }
 0x466   : > { %v7210_v40 = vpop.f32.mrf.mxu0 }
 0x467   : > { %v7256_v53 = vpop.f32.mrf.mxu1 }
 0x468   : > { %v7211_v30 = vpop.f32.mrf.mxu0 }
 0x469   : > { %v7257_v56 = vpop.f32.mrf.mxu1  ;;  %v7212_v48 = vadd.f32 %v7211_v30, %v7210_v40 }
 0x46a   : > { %v7213_v52 = vpop.f32.mrf.mxu0  ;;  %v7258_v26 = vadd.f32 %v7257_v56, %v7256_v53 }
 0x46b   : > { %v7259_v17 = vpop.f32.mrf.mxu1 }
 0x46c   : > { %v7214_v55 = vpop.f32.mrf.mxu0  ;;  %v3730_v44 = vadd.f32 %v7258_v26, %v7212_v48 }
 0x46d   : > { %v7260_v62 = vpop.f32.mrf.mxu1  ;;  %v7215_v25 = vadd.f32 %v7214_v55, %v7213_v52 }
 0x46e   : > { %v7216_v5 = vpop.f32.mrf.mxu0  ;;  %v7261_v29 = vadd.f32 %v7260_v62, %v7259_v17 }
 0x46f   : > { %v7262_v0 = vpop.f32.mrf.mxu1 }
 0x470   : > { %v7217_v11 = vpop.f32.mrf.mxu0  ;;  %v3733_v37 = vadd.f32 %v7261_v29, %v7215_v25 }
 0x471   : > { %v7263_v14 = vpop.f32.mrf.mxu1  ;;  %v7218_v7 = vadd.f32 %v7217_v11, %v7216_v5 }
 0x472   : > { %v7219_v41 = vpop.f32.mrf.mxu0  ;;  %v7264_v46 = vadd.f32 %v7263_v14, %v7262_v0 }
 0x473   : > { %v7265_v51 = vpop.f32.mrf.mxu1 }
 0x474   : > { %v7220_v32 = vpop.f32.mrf.mxu0  ;;  %v3738_v13 = vadd.f32 %v7264_v46, %v7218_v7 }
 0x475   : > { %v7266_v20 = vpop.f32.mrf.mxu1  ;;  %v7221_v30 = vadd.f32 %v7220_v32, %v7219_v41 }
 0x476   : > { %v7222_v9 = vpop.f32.mrf.mxu0  ;;  %v7267_v56 = vadd.f32 %v7266_v20, %v7265_v51 }
 0x477   : > { %v7268_v57 = vpop.f32.mrf.mxu1 }
 0x478   : > { %v7223_v36 = vpop.f32.mrf.mxu0  ;;  %v3741_v51 = vadd.f32 %v7267_v56, %v7221_v30 }
 0x479   : > { %v7269_v10 = vpop.f32.mrf.mxu1  ;;  %v7224_v38 = vadd.f32 %v7223_v36, %v7222_v9 }
 0x47a   : > { %v7225_v22 = vpop.f32.mrf.mxu0  ;;  %v7270_v17 = vadd.f32 %v7269_v10, %v7268_v57 }
 0x47b   : > { %v7271_v28 = vpop.f32.mrf.mxu1 }
 0x47c   : > { %v7226_v31 = vpop.f32.mrf.mxu0  ;;  %v3746_v57 = vadd.f32 %v7270_v17, %v7224_v38 }
 0x47d   : > { %v7272_v16 = vpop.f32.mrf.mxu1  ;;  %v7227_v4 = vadd.f32 %v7226_v31, %v7225_v22 }
 0x47e   : > { %v9386_v33 = vpop.f32.mrf.mxu0  ;;  %v7273_v5 = vadd.f32 %v7272_v16, %v7271_v28 }
 0x47f   : > { %v9388_v42 = vpop.f32.mrf.mxu1 }
 0x480   : > { %v9390_v58 = vpop.f32.mrf.mxu0 }
 0x481   : > { %v9392_v59 = vpop.f32.mrf.mxu1  ;;  %v7230_v22 = vadd.f32 %v9390_v58, %v9386_v33 }
 0x482   : > { %v9394_v12 = vpop.f32.mrf.mxu0  ;;  %v7276_v29 = vadd.f32 %v9392_v59, %v9388_v42 }
 0x483   : > { %v9396_v1 = vpop.f32.mrf.mxu1 }
 0x484   : > { %v9398_v60 = vpop.f32.mrf.mxu0  ;;  %v3754_v38 = vadd.f32 %v7276_v29, %v7230_v22 }
 0x485   : > { %v9400_v3 = vpop.f32.mrf.mxu1 }
 0x486   : > { %v7234_v50 = vpop.f32.mrf.mxu0 }
 0x487   : > { %v7280_v34 = vpop.f32.mrf.mxu1 }
 0x488   : > { %v7235_v15 = vpop.f32.mrf.mxu0 }
 0x489   : > { %v7281_v49 = vpop.f32.mrf.mxu1 }
 0x48a   : > { %v7237_v18 = vpop.f32.mrf.mxu0 }
 0x48b   : > { %v7283_v43 = vpop.f32.mrf.mxu1  ;;  %v9404_v18 = vadd.f32 %v7273_v5, %v7227_v4 }
 0x48c   : > { %v7238_v27 = vpop.f32.mrf.mxu0 }
 0x48d   : > { %v7284_v35 = vpop.f32.mrf.mxu1 }
 0x48e   : > { %v7302_v61 = vpop.f32.mrf.mxu0 }
 0x48f   : > { %v7348_v8 = vpop.f32.mrf.mxu1 }
 0x490   : > { %v7303_v47 = vpop.f32.mrf.mxu0 }
 0x491   : > { %v7304_v63 = vadd.f32 %v7303_v47, %v7302_v61  ;;  %v7349_v45 = vpop.f32.mrf.mxu1 }
 0x492   : > { %v7305_v6 = vpop.f32.mrf.mxu0  ;;  %v7350_v21 = vadd.f32 %v7349_v45, %v7348_v8 }
 0x493   : > { %v3801_v19 = vadd.f32 %v7304_v63, %v3730_v44  ;;  %v7351_v2 = vpop.f32.mrf.mxu1 }
 0x494   : > { %v7306_v23 = vpop.f32.mrf.mxu0 }
 0x495   : > { %v3872_v54 = vadd.f32 %v7350_v21, %v3801_v19  ;;  %v7307_v40 = vadd.f32 %v7306_v23, %v7305_v6  ;;  %v7352_v53 = vpop.f32.mrf.mxu1 }
 0x496   : > { %v7308_v52 = vpop.f32.mrf.mxu0  ;;  %v7353_v62 = vadd.f32 %v7352_v53, %v7351_v2 }
 0x497   : > { %v3908_v39 = vmax.f32 %v3872_v54, 0.0  ;;  %v3804_v55 = vadd.f32 %v7307_v40, %v3733_v37  ;;  %v7354_v24 = vpop.f32.mrf.mxu1 }
 0x498   : > { %v7309_v0 = vpop.f32.mrf.mxu0 }
 0x499   : > { %v3917_v11 = vsel %vm3916_vm0, %v3908_v39, -inf  ;;  %v3925_v14 = vsel %vm3924_vm1, %v3908_v39, -inf  ;;  %v3875_v50 = vadd.f32 %v7353_v62, %v3804_v55  ;;  %v7310_v34 = vadd.f32 %v7309_v0, %v7308_v52  ;;  %v7355_v41 = vpop.f32.mrf.mxu1 }
 0x49a   : > { %v3918_v32 = vrot.slane %v3917_v11, 4  ;;  %v3926_v20 = vrot.slane %v3925_v14, 4  ;;  %v7311_v9 = vpop.f32.mrf.mxu0  ;;  %v7356_v15 = vadd.f32 %v7355_v41, %v7354_v24  ;;  %v7233_v62 = vadd.f32 %v9398_v60, %v9394_v12 }
 0x49b   : > { %v3909_v36 = vmax.f32 %v3875_v50, 0.0  ;;  %v3809_v10 = vadd.f32 %v7310_v34, %v3738_v13  ;;  %v7357_v49 = vpop.f32.mrf.mxu1  ;;  %v7279_v41 = vadd.f32 %v9400_v3, %v9396_v1 }
 0x49c   : > { %v3919_v28 = vmax.f32 %v3917_v11, %v3918_v32  ;;  %v3927_v31 = vmax.f32 %v3925_v14, %v3926_v20  ;;  %v7312_v16 = vpop.f32.mrf.mxu0 }
 0x49d   : > { %v3932_v43 = vsel %vm3916_vm0, %v3909_v36, -inf  ;;  %v3939_v27 = vsel %vm3924_vm1, %v3909_v36, -inf  ;;  %v3880_v48 = vadd.f32 %v7356_v15, %v3809_v10  ;;  %v7313_v26 = vadd.f32 %v7312_v16, %v7311_v9  ;;  %v7358_v35 = vpop.f32.mrf.mxu1 }
 0x49e   : > { %v3920_v61 = vrot.slane %v3919_v28, 2  ;;  %v3928_v8 = vrot.slane %v3927_v31, 2  ;;  %v3933_v47 = vrot.slane %v3932_v43, 4  ;;  %v3940_v44 = vrot.slane %v3939_v27, 4  ;;  %v7314_v25 = vpop.f32.mrf.mxu0 }
 0x49f   : > { %v3910_v63 = vmax.f32 %v3880_v48, 0.0  ;;  %v3812_v33 = vadd.f32 %v7313_v26, %v3741_v51  ;;  %v7359_v58 = vadd.f32 %v7358_v35, %v7357_v49  ;;  %v7360_v45 = vpop.f32.mrf.mxu1 }
 0x4a0   : > { %v3921_v6 = vmax.f32 %v3919_v28, %v3920_v61  ;;  %v3929_v19 = vmax.f32 %v3927_v31, %v3928_v8  ;;  %v3934_v21 = vmax.f32 %v3932_v43, %v3933_v47  ;;  %v3941_v2 = vmax.f32 %v3939_v27, %v3940_v44  ;;  %v7315_v7 = vpop.f32.mrf.mxu0 }
 0x4a1   : > { %v3946_v46 = vsel %vm3916_vm0, %v3910_v63, -inf  ;;  %v3953_v23 = vsel %vm3924_vm1, %v3910_v63, -inf  ;;  %v3883_v37 = vadd.f32 %v7359_v58, %v3812_v33  ;;  %v7316_v54 = vadd.f32 %v7315_v7, %v7314_v25  ;;  %v7361_v40 = vpop.f32.mrf.mxu1 }
 0x4a2   : > { %v3922_v53 = vrot.slane %v3921_v6, 1  ;;  %v3930_v30 = vrot.slane %v3929_v19, 1  ;;  %v3935_v42 = vrot.slane %v3934_v21, 2  ;;  %v3942_v59 = vrot.slane %v3941_v2, 2  ;;  %v7317_v56 = vpop.f32.mrf.mxu0 }
 0x4a3   : > { %v3947_v52 = vrot.slane %v3946_v46, 4  ;;  %v3954_v17 = vrot.slane %v3953_v23, 4  ;;  %v3911_v39 = vmax.f32 %v3883_v37, 0.0  ;;  %v7363_v55 = vpop.f32.mrf.mxu1  ;;  %v3817_v4 = vadd.f32 %v7316_v54, %v3746_v57 }
 0x4a4   : > { %v3936_v24 = vmax.f32 %v3934_v21, %v3935_v42  ;;  %v3943_v13 = vmax.f32 %v3941_v2, %v3942_v59  ;;  %v7318_v5 = vpop.f32.mrf.mxu0  ;;  %v3923_v51 = vmax.f32 %v3921_v6, %v3922_v53  ;;  %v3931_v32 = vmax.f32 %v3929_v19, %v3930_v30 }
 0x4a5   : > { %v3948_v0 = vmax.f32 %v3946_v46, %v3947_v52  ;;  %v3955_v11 = vmax.f32 %v3953_v23, %v3954_v17  ;;  %v3960_v14 = vsel %vm3916_vm0, %v3911_v39, -inf  ;;  %v3967_v50 = vsel %vm3924_vm1, %v3911_v39, -inf  ;;  %v7364_v34 = vpop.f32.mrf.mxu1 }
 0x4a6   : > { %v3961_v20 = vrot.slane %v3960_v14, 4  ;;  %v7320_v9 = vpop.f32.mrf.mxu0  ;;  %v3968_v60 = vrot.slane %v3967_v50, 4  ;;  %v7362_v10 = vadd.f32 %v7361_v40, %v7360_v45  ;;  %v3937_v15 = vrot.slane %v3936_v24, 1 }
 0x4a7   : > { %v3949_v36 = vrot.slane %v3948_v0, 2  ;;  %v3956_v12 = vrot.slane %v3955_v11, 2  ;;  %v7366_v57 = vpop.f32.mrf.mxu1  ;;  %v3944_v49 = vrot.slane %v3943_v13, 1  ;;  %v7319_v28 = vadd.f32 %v7318_v5, %v7317_v56 }
 0x4a8   : > { %v3962_v22 = vmax.f32 %v3960_v14, %v3961_v20  ;;  %v7321_v31 = vpop.f32.mrf.mxu0  ;;  %v3969_v27 = vmax.f32 %v3967_v50, %v3968_v60  ;;  %v3888_v48 = vadd.f32 %v7362_v10, %v3817_v4  ;;  %v7365_v35 = vadd.f32 %v7364_v34, %v7363_v55 }
 0x4a9   : > { %v3950_v16 = vmax.f32 %v3948_v0, %v3949_v36  ;;  %v9420_v43 = vmax.f32 %v3955_v11, %v3956_v12  ;;  %v7367_v1 = vpop.f32.mrf.mxu1  ;;  %v3820_v26 = vadd.f32 %v7319_v28, %v9404_v18  ;;  %v7322_v61 = vadd.f32 %v7321_v31, %v7320_v9 }
 0x4aa   : > { %v3963_v3 = vrot.slane %v3962_v22, 2  ;;  %v7323_v8 = vpop.f32.mrf.mxu0  ;;  %v3757_v47 = vadd.f32 %v7279_v41, %v7233_v62  ;;  %v9424_v44 = vsel %vm4030_vm2, %v3923_v51, %v3931_v32  ;;  %v3970_v25 = vrot.slane %v3969_v27, 2 }
 0x4ab   : > { %v3912_v29 = vmax.f32 %v3888_v48, 0.0  ;;  %v7369_v63 = vpop.f32.mrf.mxu1  ;;  %v3938_v33 = vmax.f32 %v3936_v24, %v3937_v15  ;;  %v3951_v58 = vrot.slane %v3950_v16, 1  ;;  %v3891_v45 = vadd.f32 %v7365_v35, %v3820_v26 }
 0x4ac   : > { %v3825_v6 = vadd.f32 %v7322_v61, %v3754_v38  ;;  %v7324_v19 = vpop.f32.mrf.mxu0  ;;  %v9426_v21 = vmax.f32 %v3943_v13, %v3944_v49  ;;  %v9428_v2 = vmax.f32 %v3962_v22, %v3963_v3  ;;  %v7368_v7 = vadd.f32 %v7367_v1, %v7366_v57 }
 0x4ad   : > { %v3974_v18 = vsel %vm3916_vm0, %v3912_v29, -inf  ;;  %v7370_v46 = vpop.f32.mrf.mxu1  ;;  %v3958_v23 = vrot.slane %v9420_v43, 1  ;;  %v3981_v54 = vsel %vm3924_vm1, %v3912_v29, -inf  ;;  %v3913_v40 = vmax.f32 %v3891_v45, 0.0 }
 0x4ae   : > { %v3975_v37 = vrot.slane %v3974_v18, 4  ;;  %v7326_v53 = vpop.f32.mrf.mxu0  ;;  %v9433_v30 = vmax.f32 %v3969_v27, %v3970_v25  ;;  %v3982_v42 = vrot.slane %v3981_v54, 4  ;;  %v3896_v59 = vadd.f32 %v7368_v7, %v3825_v6 }
 0x4af   : > { %v7325_v56 = vadd.f32 %v7324_v19, %v7323_v8  ;;  %v7372_v38 = vpop.f32.mrf.mxu1  ;;  %v9435_v52 = vmax.f32 %v3950_v16, %v3951_v58  ;;  %v3988_v39 = vsel %vm3916_vm0, %v3913_v40, -inf  ;;  %v3995_v55 = vsel %vm3924_vm1, %v3913_v40, -inf }
 0x4b0   : > { %v3976_v17 = vmax.f32 %v3974_v18, %v3975_v37  ;;  %v7327_v62 = vpop.f32.mrf.mxu0  ;;  %v3965_v24 = vrot.slane %v9428_v2, 1  ;;  %v3983_v13 = vmax.f32 %v3981_v54, %v3982_v42  ;;  %v3989_v4 = vrot.slane %v3988_v39, 4 }
 0x4b1   : > { %v3996_v5 = vrot.slane %v3995_v55, 4  ;;  %v7373_v0 = vpop.f32.mrf.mxu1  ;;  %v3914_v14 = vmax.f32 %v3896_v59, 0.0  ;;  %v3828_v50 = vadd.f32 %v7325_v56, %v3757_v47  ;;  %v7371_v34 = vadd.f32 %v7370_v46, %v7369_v63 }
 0x4b2   : > { %v3977_v11 = vrot.slane %v3976_v17, 2  ;;  %v7329_v41 = vpop.f32.mrf.mxu0  ;;  %v3972_v51 = vrot.slane %v9433_v30, 1  ;;  %v3984_v32 = vrot.slane %v3983_v13, 2  ;;  %v3990_v20 = vmax.f32 %v3988_v39, %v3989_v4 }
 0x4b3   : > { %v3997_v9 = vmax.f32 %v3995_v55, %v3996_v5  ;;  %v7375_v36 = vpop.f32.mrf.mxu1  ;;  %v4002_v60 = vsel %vm3916_vm0, %v3914_v14, -inf  ;;  %v4009_v10 = vsel %vm3924_vm1, %v3914_v14, -inf  ;;  %v3899_v57 = vadd.f32 %v7371_v34, %v3828_v50 }
 0x4b4   : > { %v3978_v12 = vmax.f32 %v3976_v17, %v3977_v11  ;;  %v7330_v15 = vpop.f32.mrf.mxu0  ;;  %v3985_v49 = vmax.f32 %v3983_v13, %v3984_v32  ;;  %v3991_v22 = vrot.slane %v3990_v20, 2  ;;  %v4003_v31 = vrot.slane %v4002_v60, 4 }
 0x4b5   : > { %v3998_v28 = vrot.slane %v3997_v9, 2  ;;  %v7376_v16 = vpop.f32.mrf.mxu1  ;;  %v4010_v48 = vrot.slane %v4009_v10, 4  ;;  %v3915_v1 = vmax.f32 %v3899_v57, 0.0  ;;  %v4033_v26 = vsel %vm4032_vm3, %v9424_v44, %v3938_v33 }
 0x4b6   : > { %v3979_v27 = vrot.slane %v3978_v12, 1  ;;  %v9443_v3 = vpop.f32.mrf.mxu0  ;;  %v3986_v35 = vrot.slane %v3985_v49, 1  ;;  %v3992_v61 = vmax.f32 %v3990_v20, %v3991_v22  ;;  %v4004_v47 = vmax.f32 %v4002_v60, %v4003_v31 }
 0x4b7   : > { %v3999_v8 = vmax.f32 %v3997_v9, %v3998_v28  ;;  %v9447_v25 = vpop.f32.mrf.mxu1  ;;  %v4011_v63 = vmax.f32 %v4009_v10, %v4010_v48  ;;  %v4016_v58 = vsel %vm3916_vm0, %v3915_v1, -inf  ;;  %v4023_v45 = vsel %vm3924_vm1, %v3915_v1, -inf }
 0x4b8   : > { %v3980_v29 = vmax.f32 %v3978_v12, %v3979_v27  ;;  %v9451_v6 = vpop.f32.mrf.mxu0  ;;  %v3987_v19 = vmax.f32 %v3985_v49, %v3986_v35  ;;  %v3993_v18 = vrot.slane %v3992_v61, 1  ;;  %v4005_v46 = vrot.slane %v4004_v47, 2 }
 0x4b9   : > { %v4000_v7 = vrot.slane %v3999_v8, 1  ;;  %v7435_v44 = vpop.f32.mrf.mxu1  ;;  %v3959_v33 = vmax.f32 %v9420_v43, %v3958_v23  ;;  %v4012_v37 = vrot.slane %v4011_v63, 2  ;;  %v4017_v54 = vrot.slane %v4016_v58, 4 }
 0x4ba   : > { %v4024_v40 = vrot.slane %v4023_v45, 4  ;;  %v9456_v53 = vpop.f32.mrf.mxu0  ;;  %v3966_v42 = vmax.f32 %v9428_v2, %v3965_v24  ;;  %v3973_v59 = vmax.f32 %v9433_v30, %v3972_v51  ;;  %v3994_v56 = vmax.f32 %v3992_v61, %v3993_v18 }
 0x4bb   : > { %v4006_v38 = vmax.f32 %v4004_v47, %v4005_v46  ;;  %v9460_v17 = vpop.f32.mrf.mxu1  ;;  %v4013_v39 = vmax.f32 %v4011_v63, %v4012_v37  ;;  %v4018_v55 = vmax.f32 %v4016_v58, %v4017_v54  ;;  %v4035_v43 = vsel %vm4034_vm4, %v4033_v26, %v9426_v21 }
 0x4bc   : > { %v4025_v62 = vmax.f32 %v4023_v45, %v4024_v40  ;;  %v7398_v13 = vpop.f32.mrf.mxu0  ;;  %v4043_v23 = vsel %vm4030_vm2, %v3980_v29, %v3987_v19  ;;  %v4001_v4 = vmax.f32 %v3999_v8, %v4000_v7  ;;  %v4036_v30 = vsel %vm3916_vm0, %v4035_v43, %v9435_v52 }
 0x4bd   : > { %v4007_v5 = vrot.slane %v4006_v38, 1  ;;  %v7438_v2 = vpop.f32.mrf.mxu1  ;;  %v4014_v24 = vrot.slane %v4013_v39, 1  ;;  %v4019_v0 = vrot.slane %v4018_v55, 2  ;;  %v4044_v50 = vsel %vm4032_vm3, %v4043_v23, %v3994_v56 }
 0x4be   : > { %v4026_v11 = vrot.slane %v4025_v62, 2  ;;  %v7400_v14 = vpop.f32.mrf.mxu0  ;;  %v4038_v51 = vsel %vm4037_vm5, %v4036_v30, %v3959_v33  ;;  %v4045_v60 = vsel %vm4034_vm4, %v4044_v50, %v4001_v4  ;;  %v7396_v45 = vadd.f32 %v9451_v6, %v9443_v3 }
 0x4bf   : > { %v4008_v34 = vmax.f32 %v4006_v38, %v4007_v5  ;;  %v7440_v41 = vpop.f32.mrf.mxu1  ;;  %v4020_v21 = vmax.f32 %v4018_v55, %v4019_v0  ;;  %v4040_v52 = vsel %vm4039_vm6, %v4038_v51, %v3966_v42  ;;  %v4015_v9 = vmax.f32 %v4013_v39, %v4014_v24 }
 0x4c0   : > { %v4027_v32 = vmax.f32 %v4025_v62, %v4026_v11  ;;  %v7401_v20 = vpop.f32.mrf.mxu0  ;;  %v4042_v12 = vsel %vm4041_vm7, %v4040_v52, %v3973_v59  ;;  %v7436_v19 = vadd.f32 %v7435_v44, %v9447_v25  ;;  %v7399_v38 = vadd.f32 %v7398_v13, %v9456_v53 }
 0x4c1   : > { %v7441_v36 = vpop.f32.mrf.mxu1  ;;  %v4021_v10 = vrot.slane %v4020_v21, 1  ;;  %v4046_v49 = vsel %vm3916_vm0, %v4045_v60, %v4008_v34  ;;  %4050 = vst [vmem:[%s414_s23] sm:$0xff] %v4042_v12  ;;  %v7402_v29 = vadd.f32 %v7401_v20, %v7400_v14  ;;  %v7439_v55 = vadd.f32 %v7438_v2, %v9460_v17  ;;  %v8118_v60 = vld [vmem:[%s9851_s7 + $0x138] sm:$0xff]  }
 0x4c2   : > { %v4028_v57 = vrot.slane %v4027_v32, 1  ;;  %v7403_v15 = vpop.f32.mrf.mxu0  ;;  %v4047_v48 = vsel %vm4037_vm5, %v4046_v49, %v4015_v9  ;;  %v7442_v63 = vadd.f32 %v7441_v36, %v7440_v41  ;;  %v4506_v56 = vadd.f32 %v7436_v19, %v7396_v45  ;;  %v8127_v45 = vld [vmem:[%s9851_s7 + $0x150] sm:$0xff]  }
 0x4c3   : > { %v7443_v22 = vpop.f32.mrf.mxu1  ;;  %v4022_v28 = vmax.f32 %v4020_v21, %v4021_v10  ;;  %v4509_v0 = vadd.f32 %v7439_v55, %v7399_v38  ;;  %v8128_v19 = vld [vmem:[%s9851_s7 + $0x110] sm:$0xff]   ;;  %v8136_v38 = vld [vmem:[%s9852_s8 + $0xb8] sm:$0xff]  }
 0x4c4   : > { %v4029_v31 = vmax.f32 %v4027_v32, %v4028_v57  ;;  %v7404_v16 = vpop.f32.mrf.mxu0  ;;  %v4514_v54 = vadd.f32 %v7442_v63, %v7402_v29  ;;  %v8124_v29 = vld [vmem:[%s9851_s7 + $0x120] sm:$0xff]   ;;  %v8125_v63 = vld [vmem:[%s9851_s7 + $0x158] sm:$0xff]   ;;  %v8139_v55 = vld [vmem:[%s9852_s8 + $0xf0] sm:$0xff]  }
 0x4c5   : > { %v7444_v27 = vpop.f32.mrf.mxu1  ;;  %v4048_v26 = vsel %vm4039_vm6, %v4047_v48, %v4022_v28  ;;  %v7405_v40 = vadd.f32 %v7404_v16, %v7403_v15 }
 0x4c6   : > { %v7406_v1 = vpop.f32.mrf.mxu0  ;;  %v4049_v61 = vsel %vm4041_vm7, %v4048_v26, %v4029_v31  ;;  %v7445_v42 = vadd.f32 %v7444_v27, %v7443_v22  ;;  %v4548_v23 = vmax.f32 %v4506_v56, %v4514_v54  ;;  %v8135_v56 = vld [vmem:[%s9852_s8 + $0xf8] sm:$0xff]  }
 0x4c7   : > { %v7446_v35 = vpop.f32.mrf.mxu1  ;;  %4051 = vst [vmem:[%s414_s23 + $0x8] sm:$0xff] %v4049_v61  ;;  %v8121_v61 = vld [vmem:[%s9851_s7 + $0x168] sm:$0xff]  }
 0x4c8   : > { %v7407_v8 = vpop.f32.mrf.mxu0  ;;  %v4517_v4 = vadd.f32 %v7445_v42, %v7405_v40  ;;  %v8133_v42 = vld [vmem:[%s9852_s8 + $0x78] sm:$0xff]  }
 0x4c9   : > { %v7447_v47 = vpop.f32.mrf.mxu1  ;;  %v7408_v7 = vadd.f32 %v7407_v8, %v7406_v1  ;;  %v8119_v1 = vld [vmem:[%s9851_s7 + $0x170] sm:$0xff]   ;;  %v8122_v8 = vld [vmem:[%s9851_s7 + $0x128] sm:$0xff]   ;;  %7524 = vmatprep.subr.bf16.mxu1 %v8133_v42 }
 0x4ca   : > { %v7409_v58 = vpop.f32.mrf.mxu0  ;;  %v7448_v46 = vadd.f32 %v7447_v47, %v7446_v35  ;;  %v4549_v41 = vmax.f32 %v4509_v0, %v4517_v4  ;;  %v8120_v35 = vld [vmem:[%s9851_s7 + $0x130] sm:$0xff]   ;;  %v8123_v47 = vld [vmem:[%s9851_s7 + $0x160] sm:$0xff]   ;;  %v8150_v0 = vld [vmem:[%s9852_s8 + $0x18] sm:$0xff]  }
 0x4cb   : > { %v7449_v18 = vpop.f32.mrf.mxu1  ;;  %v8146_v4 = vld [vmem:[%s9852_s8 + $0x20] sm:$0xff]  }
 0x4cc   : > { %v7410_v33 = vpop.f32.mrf.mxu0  ;;  %v4522_v62 = vadd.f32 %v7448_v46, %v7408_v7  ;;  %v8130_v7 = vld [vmem:[%s9851_s7 + $0x108] sm:$0xff]   ;;  %v8131_v46 = vld [vmem:[%s9851_s7 + $0x140] sm:$0xff]  }
 0x4cd   : > { %v7450_v37 = vpop.f32.mrf.mxu1  ;;  %v7411_v43 = vadd.f32 %v7410_v33, %v7409_v58  ;;  %v8126_v58 = vld [vmem:[%s9851_s7 + $0x118] sm:$0xff]   ;;  %v8132_v33 = vld [vmem:[%s9851_s7 + $0x100] sm:$0xff]  }
 0x4ce   : > { %v7412_v59 = vpop.f32.mrf.mxu0  ;;  %v7451_v3 = vadd.f32 %v7450_v37, %v7449_v18  ;;  %v4552_v11 = vmax.f32 %v4548_v23, %v4522_v62  ;;  %v8129_v18 = vld [vmem:[%s9851_s7 + $0x148] sm:$0xff]   ;;  %v8138_v62 = vld [vmem:[%s9852_s8 + $0x30] sm:$0xff]   ;;  %v8145_v23 = vld [vmem:[%s9852_s8 + $0x60] sm:$0xff]  }
 0x4cf   : > { %v7452_v39 = vpop.f32.mrf.mxu1 }
 0x4d0   : > { %v7413_v6 = vpop.f32.mrf.mxu0  ;;  %v4525_v14 = vadd.f32 %v7451_v3, %v7411_v43  ;;  %v8140_v43 = vld [vmem:[%s9852_s8 + $0xb0] sm:$0xff]   ;;  %v8141_v3 = vld [vmem:[%s9852_s8 + $0x68] sm:$0xff]  }
 0x4d1   : > { %v7414_v25 = vadd.f32 %v7413_v6, %v7412_v59  ;;  %v7453_v44 = vpop.f32.mrf.mxu1  ;;  %v8134_v59 = vld [vmem:[%s9852_s8 + $0x38] sm:$0xff]   ;;  %v8142_v6 = vld [vmem:[%s9852_s8 + $0x28] sm:$0xff]  }
 0x4d2   : > { %v7454_v5 = vadd.f32 %v7453_v44, %v7452_v39  ;;  %v7415_v30 = vpop.f32.mrf.mxu0  ;;  %v4553_v51 = vmax.f32 %v4549_v41, %v4525_v14  ;;  %v8137_v39 = vld [vmem:[%s9852_s8 + $0x70] sm:$0xff]   ;;  %v8144_v44 = vld [vmem:[%s9852_s8 + $0xa8] sm:$0xff]   ;;  %v8152_v14 = vld [vmem:[%s9852_s8 + $0x98] sm:$0xff]  }
 0x4d3   : > { %v7455_v24 = vpop.f32.mrf.mxu1  ;;  %v8157_v41 = vld [vmem:[%s9852_s8 + $0x48] sm:$0xff]  }
 0x4d4   : > { %v4530_v50 = vadd.f32 %v7454_v5, %v7414_v25  ;;  %v7416_v34 = vpop.f32.mrf.mxu0  ;;  %v8143_v25 = vld [vmem:[%s9852_s8 + $0xe8] sm:$0xff]   ;;  %v8147_v5 = vld [vmem:[%s9852_s8 + $0xe0] sm:$0xff]  }
 0x4d5   : > { %v7417_v53 = vadd.f32 %v7416_v34, %v7415_v30  ;;  %v7456_v13 = vpop.f32.mrf.mxu1  ;;  %v8148_v30 = vld [vmem:[%s9852_s8 + $0xa0] sm:$0xff]   ;;  %v8155_v34 = vld [vmem:[%s9852_s8 + $0xd0] sm:$0xff]  }
 0x4d6   : > { %v4556_v17 = vmax.f32 %v4552_v11, %v4530_v50  ;;  %v7457_v2 = vadd.f32 %v7456_v13, %v7455_v24  ;;  %v8149_v24 = vld [vmem:[%s9852_s8 + $0x58] sm:$0xff]   ;;  %v8153_v50 = vld [vmem:[%s9852_s8 + $0x50] sm:$0xff]  }
 0x4d7   : > { %v8151_v11 = vld [vmem:[%s9852_s8 + $0xd8] sm:$0xff]   ;;  %v8156_v13 = vld [vmem:[%s9852_s8 + $0x90] sm:$0xff]  }
 0x4d8   : > { %v4558_v21 = vmax.f32 %v4556_v17, 0.0  ;;  %v4533_v32 = vadd.f32 %v7457_v2, %v7417_v53  ;;  %v8154_v53 = vld [vmem:[%s9852_s8 + $0x10] sm:$0xff]   ;;  %v8159_v17 = vld [vmem:[%s9852_s8 + $0xc8] sm:$0xff]  }
 0x4d9   : > { %v8158_v2 = vld [vmem:[%s9852_s8 + $0x8] sm:$0xff]  }
 0x4da   : > { %4560 = vst [vmem:[#allocation4 + $0x3] sm:$0xff] %v4558_v21  ;;  %v4557_v20 = vmax.f32 %v4553_v51, %v4533_v32  ;;  %v8160_v51 = vld [vmem:[%s9852_s8 + $0x88] sm:$0xff]   ;;  %v8163_v32 = vld [vmem:[%s9852_s8 + $0xc0] sm:$0xff]  }
 0x4dc   : > { %v4559_v52 = vmax.f32 %v4557_v20, 0.0  ;;  %v8162_v20 = vld [vmem:[%s9852_s8] sm:$0xff]  }
 0x4de   : > { %4561 = vst [vmem:[#allocation4 + $0xb] sm:$0x7f] %v4559_v52  ;;  %v8164_v52 = vld [vmem:[%s9852_s8 + $0x80] sm:$0xff]  }
 0x4e1   : > { %v4565_v9 = vld [vmem:[#allocation4 + $0x1] sm:$0xff] }
 0x4e2   : > { %v4562_v36 = vld [vmem:[#allocation4] sm:$0xff] }
 0x4e3   : > { %v4568_v12 = vld [vmem:[#allocation4 + $0x2] sm:$0xff] }
 0x4e5   : > { %v4566_v10 = vld [vmem:[#allocation4 + $0x9] sm:$0xff] }
 0x4e6   : > { %v4572_v57 = vld [vmem:[#allocation4 + $0xb] sm:$0xff]  ;;  %v4567_v49 = vpack.c.bf16 %v4566_v10, %v4565_v9 }
 0x4e7   : > { %v4563_v15 = vld [vmem:[#allocation4 + $0x8] sm:$0xff]  ;;  %v4573_v22 = vpack.c.bf16 %v4572_v57, %v4558_v21  ;;  %v8161_v21 = vld [vmem:[%s9852_s8 + $0x40] sm:$0xff]   ;;  %v8165_v9 = vld [vmem:[%s9852_s8 + $0x178] sm:$0xff]  }
 0x4e8   : > { %v4564_v28 = vpack.c.bf16 %v4563_v15, %v4562_v36  ;;  %v4569_v31 = vld [vmem:[#allocation4 + $0xa] sm:$0xff]  ;;  %4996 = vmatprep.mubr.bf16.mxu0 %v4567_v49 }
 0x4e9   : > { %v4577_v16 = vld [vmem:[#allocation4 + $0x5] sm:$0xff]  ;;  %v4578_v27 = vld [vmem:[#allocation4 + $0xd] sm:$0xff]  ;;  %v4570_v48 = vpack.c.bf16 %v4569_v31, %v4568_v12  ;;  %5037 = vmatprep.mubr.bf16.mxu1 %v4573_v22 }
 0x4ea   : > { %v4579_v26 = vpack.c.bf16 %v4578_v27, %v4577_v16  ;;  %4997 = vmatmul.mubr.bf16.vlgmr.msra.gmra.mxu0 %v4564_v28  ;;  %v4574_v37 = vld [vmem:[#allocation4 + $0x4] sm:$0xff]  ;;  %v4575_v54 = vld [vmem:[#allocation4 + $0xc] sm:$0xff] }
 0x4eb   : > { %5038 = vmatmul.mubr.bf16.vlgmr.msra.gmra.mxu1 %v4570_v48  ;;  %7503 = vmatpush3.bf16.msra.mxu0 %v8118_v60  ;;  %v4576_v40 = vpack.c.bf16 %v4575_v54, %v4574_v37 }
 0x4ec   : > { %5078 = vmatprep.mubr.bf16.mxu0 %v4579_v26  ;;  %7504 = vmatprep.subr.bf16.mxu0 %v8119_v1 }
 0x4ed   : > { %7525 = vmatpush3.bf16.msra.mxu1 %v8134_v59 }
 0x4ee   : > { %7526 = vmatprep.subr.bf16.mxu1 %v8137_v39 }
 0x4ef   : > { %7505 = vmatpush3.bf16.msra.mxu0 %v8120_v35 }
 0x4f0   : > { %7506 = vmatprep.subr.bf16.mxu0 %v8121_v61 }
 0x4f1   : > { %7527 = vmatpush3.bf16.msra.mxu1 %v8138_v62 }
 0x4f2   : > { %7528 = vmatprep.subr.bf16.mxu1 %v8141_v3 }
 0x4f3   : > { %7507 = vmatpush3.bf16.msra.mxu0 %v8122_v8 }
 0x4f4   : > { %7508 = vmatprep.subr.bf16.mxu0 %v8123_v47 }
 0x4f5   : > { %7529 = vmatpush3.bf16.msra.mxu1 %v8142_v6  ;;  %v8168_v6 = vld [vmem:[%s9852_s8 + $0x130] sm:$0xff]  }
 0x4f6   : > { %7530 = vmatprep.subr.bf16.mxu1 %v8145_v23 }
 0x4f7   : > { %7509 = vmatpush3.bf16.msra.mxu0 %v8124_v29 }
 0x4f8   : > { %7510 = vmatprep.subr.bf16.mxu0 %v8125_v63 }
 0x4f9   : > { %7531 = vmatpush3.bf16.msra.mxu1 %v8146_v4 }
 0x4fa   : > { %7532 = vmatprep.subr.bf16.mxu1 %v8149_v24  ;;  %v8170_v24 = vld [vmem:[%s9852_s8 + $0x128] sm:$0xff]  }
 0x4fb   : > { %7511 = vmatpush3.bf16.msra.mxu0 %v8126_v58 }
 0x4fc   : > { %7512 = vmatprep.subr.bf16.mxu0 %v8127_v45 }
 0x4fd   : > { %7533 = vmatpush3.bf16.msra.mxu1 %v8150_v0 }
 0x4fe   : > { %7534 = vmatprep.subr.bf16.mxu1 %v8153_v50  ;;  %v8172_v50 = vld [vmem:[%s9852_s8 + $0x120] sm:$0xff]  }
 0x4ff   : > { %7513 = vmatpush3.bf16.msra.mxu0 %v8128_v19 }
 0x500   : > { %7514 = vmatprep.subr.bf16.mxu0 %v8129_v18 }
 0x501   : > { %7535 = vmatpush3.bf16.msra.mxu1 %v8154_v53  ;;  %v8174_v53 = vld [vmem:[%s9852_s8 + $0x118] sm:$0xff]  }
 0x502   : > { %7536 = vmatprep.subr.bf16.mxu1 %v8157_v41  ;;  %v8176_v41 = vld [vmem:[%s9852_s8 + $0x110] sm:$0xff]  }
 0x503   : > { %7515 = vmatpush3.bf16.msra.mxu0 %v8130_v7  ;;  %v5108_v7 = vld [vmem:[#allocation4 + $0x13] sm:$0x1] }
 0x504   : > { %7516 = vmatprep.subr.bf16.mxu0 %v8131_v46  ;;  %v5110_v59 = vpack.c.bf16 %v5108_v7, %v5108_v7  ;;  %v8203_v7 = vld [vmem:[%s9853_s9 + $0x10] sm:$0xff]  }
 0x505   : > { %7537 = vmatpush3.bf16.msra.mxu1 %v8158_v2  ;;  %v8178_v2 = vld [vmem:[%s9852_s8 + $0x108] sm:$0xff]  }
 0x506   : > { %7538 = vmatprep.subr.bf16.mxu1 %v8161_v21  ;;  %v8180_v21 = vld [vmem:[%s9852_s8 + $0x100] sm:$0xff]  }
 0x507   : > { %7517 = vmatpush3.bf16.msra.mxu0 %v8132_v33 }
 0x508   : > { %7552 = vmatprep.subr.bf16.mxu0 %v8135_v56 }
 0x509   : > { %7539 = vmatpush3.bf16.msra.mxu1 %v8162_v20 }
 0x50a   : > { %5079 = vmatmul.mubr.bf16.vlgmr.msra.gmra.mxu0 %v4576_v40  ;;  %7580 = vmatprep.subr.bf16.mxu1 %v8165_v9 }
 0x50b   : > { %7553 = vmatpush3.bf16.msra.mxu0 %v8136_v38 }
 0x50c   : > { %7554 = vmatprep.subr.bf16.mxu0 %v8139_v55  ;;  %v8166_v55 = vld [vmem:[%s9852_s8 + $0x138] sm:$0xff]  }
 0x50f   : > { %7555 = vmatpush3.bf16.msra.mxu0 %v8140_v43  ;;  %v8167_v43 = vld [vmem:[%s9852_s8 + $0x170] sm:$0xff]  }
 0x510   : > { %7556 = vmatprep.subr.bf16.mxu0 %v8143_v25  ;;  %v8169_v25 = vld [vmem:[%s9852_s8 + $0x168] sm:$0xff]  }
 0x513   : > { %7557 = vmatpush3.bf16.msra.mxu0 %v8144_v44 }
 0x514   : > { %7558 = vmatprep.subr.bf16.mxu0 %v8147_v5 }
 0x517   : > { %7559 = vmatpush3.bf16.msra.mxu0 %v8148_v30 }
 0x518   : > { %7560 = vmatprep.subr.bf16.mxu0 %v8151_v11  ;;  %v8171_v11 = vld [vmem:[%s9852_s8 + $0x160] sm:$0xff]  }
 0x51b   : > { %7561 = vmatpush3.bf16.msra.mxu0 %v8152_v14 }
 0x51c   : > { %7562 = vmatprep.subr.bf16.mxu0 %v8155_v34  ;;  %v8173_v34 = vld [vmem:[%s9852_s8 + $0x158] sm:$0xff]  }
 0x51f   : > { %7563 = vmatpush3.bf16.msra.mxu0 %v8156_v13  ;;  %v8175_v13 = vld [vmem:[%s9852_s8 + $0x150] sm:$0xff]  }
 0x520   : > { %7564 = vmatprep.subr.bf16.mxu0 %v8159_v17  ;;  %v8177_v17 = vld [vmem:[%s9852_s8 + $0x148] sm:$0xff]  }
 0x523   : > { %7565 = vmatpush3.bf16.msra.mxu0 %v8160_v51  ;;  %v8179_v51 = vld [vmem:[%s9852_s8 + $0x140] sm:$0xff]  }
 0x524   : > { %7566 = vmatprep.subr.bf16.mxu0 %v8163_v32  ;;  %v5118_v32 = vld [vmem:[#allocation4 + $0x15] sm:$0x1] }
 0x525   : > { %v5120_v9 = vpack.c.bf16 %v5118_v32, %v5118_v32 }
 0x527   : > { %7567 = vmatpush3.bf16.msra.mxu0 %v8164_v52 }
 0x5aa   : > { %v7474_v36 = vpop.f32.mrf.mxu0 }
 0x5ab   : > { %v7496_v12 = vpop.f32.mrf.mxu1 }
 0x5ac   : > { %v7475_v60 = vpop.f32.mrf.mxu0 }
 0x5ad   : > { %v7497_v10 = vpop.f32.mrf.mxu1  ;;  %v7476_v22 = vadd.f32 %v7475_v60, %v7474_v36 }
 0x5ae   : > { %v7477_v57 = vpop.f32.mrf.mxu0  ;;  %v7498_v28 = vadd.f32 %v7497_v10, %v7496_v12  ;;  %v5113_v12 = vld [vmem:[#allocation4 + $0x14] sm:$0x1] }
 0x5af   : > { %v7499_v15 = vpop.f32.mrf.mxu1  ;;  %v5115_v60 = vpack.c.bf16 %v5113_v12, %v5113_v12  ;;  %v8181_v10 = vld [vmem:[%s9853_s9 + $0x78] sm:$0xff]  }
 0x5b0   : > { %v7478_v49 = vpop.f32.mrf.mxu0  ;;  %v5040_v48 = vadd.f32 %v7498_v28, %v7476_v22  ;;  %v8185_v22 = vld [vmem:[%s9853_s9 + $0x70] sm:$0xff]   ;;  %7608 = vmatprep.subr.bf16.mxu0 %v8181_v10 }
 0x5b1   : > { %v7500_v31 = vpop.f32.mrf.mxu1  ;;  %v7479_v1 = vadd.f32 %v7478_v49, %v7477_v57  ;;  %v8182_v57 = vld [vmem:[%s9853_s9 + $0xf8] sm:$0xff]   ;;  %v8186_v28 = vld [vmem:[%s9853_s9 + $0xf0] sm:$0xff]  }
 0x5b2   : > { %v7501_v26 = vadd.f32 %v7500_v31, %v7499_v15  ;;  %v8183_v15 = vld [vmem:[%s9853_s9 + $0x38] sm:$0xff]   ;;  %v8187_v31 = vld [vmem:[%s9853_s9 + $0x30] sm:$0xff]  }
 0x5b3   : > { %v8184_v49 = vld [vmem:[%s9853_s9 + $0xb8] sm:$0xff]  }
 0x5b4   : > { %v5043_v29 = vadd.f32 %v7501_v26, %v7479_v1  ;;  %v8191_v1 = vld [vmem:[%s9853_s9 + $0x28] sm:$0xff]  }
 0x5b5   : > { %v8192_v26 = vld [vmem:[%s9853_s9 + $0xa8] sm:$0xff]  }
 0x5ca   : > { %v7518_v16 = vpop.f32.mrf.mxu0 }
 0x5cc   : > { %v7519_v27 = vpop.f32.mrf.mxu0 }
 0x5cd   : > { %v7520_v35 = vadd.f32 %v7519_v27, %v7518_v16  ;;  %v8188_v16 = vld [vmem:[%s9853_s9 + $0xb0] sm:$0xff]   ;;  %v8189_v27 = vld [vmem:[%s9853_s9 + $0x68] sm:$0xff]  }
 0x5ce   : > { %v7521_v61 = vpop.f32.mrf.mxu0 }
 0x5cf   : > { %v5081_v8 = vadd.f32 %v7520_v35, %v5040_v48  ;;  %v8190_v48 = vld [vmem:[%s9853_s9 + $0xe8] sm:$0xff]   ;;  %v8193_v35 = vld [vmem:[%s9853_s9 + $0x60] sm:$0xff]  }
 0x5d0   : > { %v7522_v47 = vpop.f32.mrf.mxu0 }
 0x5d1   : > { %v5087_v63 = vmax.f32 %v5081_v8, 0.0  ;;  %v7523_v58 = vadd.f32 %v7522_v47, %v7521_v61  ;;  %v8194_v61 = vld [vmem:[%s9853_s9 + $0xe0] sm:$0xff]  }
 0x5d2   : > { %v8195_v8 = vld [vmem:[%s9853_s9 + $0x20] sm:$0xff]  }
 0x5d3   : > { %5089 = vst [vmem:[#allocation4 + $0x3] sm:$0xff] %v5087_v63  ;;  %v5084_v45 = vadd.f32 %v7523_v58, %v5043_v29  ;;  %v8196_v47 = vld [vmem:[%s9853_s9 + $0xa0] sm:$0xff]   ;;  %v8197_v29 = vld [vmem:[%s9853_s9 + $0x58] sm:$0xff]  }
 0x5d4   : > { %v8199_v58 = vld [vmem:[%s9853_s9 + $0x18] sm:$0xff]  }
 0x5d5   : > { %v5088_v19 = vmax.f32 %v5084_v45, 0.0  ;;  %v8200_v45 = vld [vmem:[%s9853_s9 + $0x98] sm:$0xff]  }
 0x5d7   : > { %5090 = vst [vmem:[#allocation4 + $0xb] sm:$0xff] %v5088_v19  ;;  %v5109_v18 = vpack.c.bf16 %v5088_v19, %v5087_v63  ;;  %v8198_v63 = vld [vmem:[%s9853_s9 + $0xd8] sm:$0xff]   ;;  %v8201_v19 = vld [vmem:[%s9853_s9 + $0x50] sm:$0xff]  }
 0x5d9   : > { %5585 = vmatprep.mubr.bf16.mxu0 %v5109_v18  ;;  %v8202_v18 = vld [vmem:[%s9853_s9 + $0xd0] sm:$0xff]  }
 0x5da   : > { %v5096_v46 = vld [vmem:[#allocation4 + $0x1] sm:$0xff] }
 0x5db   : > { %v5091_v33 = vld [vmem:[#allocation4] sm:$0xff] }
 0x5dc   : > { %v5101_v37 = vld [vmem:[#allocation4 + $0x2] sm:$0xff] }
 0x5de   : > { %v5097_v54 = vld [vmem:[#allocation4 + $0x9] sm:$0xff]  ;;  %v5098_v62 = vld [vmem:[#allocation4 + $0x11] sm:$0x1]  ;;  %v5103_v44 = vld [vmem:[#allocation4 + $0x12] sm:$0x1] }
 0x5df   : > { %v5092_v40 = vld [vmem:[#allocation4 + $0x8] sm:$0xff]  ;;  %v5099_v56 = vpack.c.bf16 %v5097_v54, %v5096_v46  ;;  %v5100_v3 = vpack.c.bf16 %v5098_v62, %v5098_v62  ;;  %v5093_v23 = vld [vmem:[#allocation4 + $0x10] sm:$0x1]  ;;  %v5105_v30 = vpack.c.bf16 %v5103_v44, %v5103_v44  ;;  %v8207_v54 = vld [vmem:[%s9853_s9 + $0x8] sm:$0xff]  }
 0x5e0   : > { %v5102_v42 = vld [vmem:[#allocation4 + $0xa] sm:$0xff]  ;;  %v5094_v38 = vpack.c.bf16 %v5092_v40, %v5091_v33  ;;  %v5095_v0 = vpack.c.bf16 %v5093_v23, %v5093_v23  ;;  %v8205_v33 = vld [vmem:[%s9853_s9 + $0x48] sm:$0xff]  }
 0x5e1   : > { %v5104_v39 = vpack.c.bf16 %v5102_v42, %v5101_v37  ;;  %5537 = vmatprep.mubr.bf16.mxu1 %v5099_v56  ;;  %v5116_v4 = vld [vmem:[#allocation4 + $0x5] sm:$0xff]  ;;  %v5117_v5 = vld [vmem:[#allocation4 + $0xd] sm:$0xff]  ;;  %v8209_v42 = vld [vmem:[%s9853_s9 + $0x40] sm:$0xff]  }
 0x5e2   : > { %5538 = vmatmul.mubr.bf16.vlgmr.msra.gmra.mxu1 %v5094_v38  ;;  %v5119_v14 = vpack.c.bf16 %v5117_v5, %v5116_v4  ;;  %v5111_v20 = vld [vmem:[#allocation4 + $0x4] sm:$0xff]  ;;  %v5112_v52 = vld [vmem:[#allocation4 + $0xc] sm:$0xff]  ;;  %v8211_v56 = vld [vmem:[%s9853_s9] sm:$0xff]  }
 0x5e3   : > { %5586 = vmatmul.mubr.bf16.vlgmr.msra.gmra.mxu0 %v5104_v39  ;;  %7581 = vmatpush3.bf16.msra.mxu1 %v8166_v55  ;;  %v5114_v36 = vpack.c.bf16 %v5112_v52, %v5111_v20  ;;  %v8204_v46 = vld [vmem:[%s9853_s9 + $0x90] sm:$0xff]   ;;  %v8206_v37 = vld [vmem:[%s9853_s9 + $0xc8] sm:$0xff]   ;;  %v8212_v38 = vld [vmem:[%s9853_s9 + $0x80] sm:$0xff]  }
 0x5e4   : > { %5593 = vmatprep.mubr.bf16.mxu0 %v5110_v59  ;;  %5545 = vmatprep.mubr.bf16.mxu1 %v5100_v3  ;;  %v8208_v40 = vld [vmem:[%s9853_s9 + $0x88] sm:$0xff]   ;;  %v8210_v59 = vld [vmem:[%s9853_s9 + $0xc0] sm:$0xff]   ;;  %v8213_v39 = vld [vmem:[%s9853_s9 + $0x178] sm:$0xff]  }
 0x5e5   : > { %7582 = vmatprep.subr.bf16.mxu1 %v8167_v43  ;;  %7609 = vmatpush3.bf16.msra.mxu0 %v8183_v15 }
 0x5e6   : > { %7610 = vmatprep.subr.bf16.mxu0 %v8185_v22 }
 0x5e7   : > { %7583 = vmatpush3.bf16.msra.mxu1 %v8168_v6 }
 0x5e8   : > { %7584 = vmatprep.subr.bf16.mxu1 %v8169_v25 }
 0x5e9   : > { %7611 = vmatpush3.bf16.msra.mxu0 %v8187_v31 }
 0x5ea   : > { %5546 = vmatmul.mubr.bf16.gmra.mxu1 %v5095_v0  ;;  %7612 = vmatprep.subr.bf16.mxu0 %v8189_v27 }
 0x5eb   : > { %5594 = vmatmul.mubr.bf16.gmra.mxu0 %v5105_v30  ;;  %7585 = vmatpush3.bf16.msra.mxu1 %v8170_v24 }
 0x5ec   : > { %5633 = vmatprep.mubr.bf16.mxu1 %v5119_v14  ;;  %7586 = vmatprep.subr.bf16.mxu1 %v8171_v11 }
 0x5ed   : > { %7613 = vmatpush3.bf16.msra.mxu0 %v8191_v1 }
 0x5ee   : > { %7614 = vmatprep.subr.bf16.mxu0 %v8193_v35  ;;  %v8214_v35 = vld [vmem:[%s9853_s9 + $0x138] sm:$0xff]  }
 0x5ef   : > { %7587 = vmatpush3.bf16.msra.mxu1 %v8172_v50 }
 0x5f0   : > { %7588 = vmatprep.subr.bf16.mxu1 %v8173_v34 }
 0x5f1   : > { %7615 = vmatpush3.bf16.msra.mxu0 %v8195_v8 }
 0x5f2   : > { %7616 = vmatprep.subr.bf16.mxu0 %v8197_v29 }
 0x5f3   : > { %7589 = vmatpush3.bf16.msra.mxu1 %v8174_v53 }
 0x5f4   : > { %7590 = vmatprep.subr.bf16.mxu1 %v8175_v13 }
 0x5f5   : > { %7617 = vmatpush3.bf16.msra.mxu0 %v8199_v58 }
 0x5f6   : > { %7618 = vmatprep.subr.bf16.mxu0 %v8201_v19 }
 0x5f7   : > { %7591 = vmatpush3.bf16.msra.mxu1 %v8176_v41 }
 0x5f8   : > { %7592 = vmatprep.subr.bf16.mxu1 %v8177_v17 }
 0x5f9   : > { %7619 = vmatpush3.bf16.msra.mxu0 %v8203_v7 }
 0x5fa   : > { %7620 = vmatprep.subr.bf16.mxu0 %v8205_v33 }
 0x5fb   : > { %7593 = vmatpush3.bf16.msra.mxu1 %v8178_v2 }
 0x5fc   : > { %7594 = vmatprep.subr.bf16.mxu1 %v8179_v51 }
 0x5fd   : > { %7621 = vmatpush3.bf16.msra.mxu0 %v8207_v54  ;;  %v8216_v54 = vld [vmem:[%s9853_s9 + $0x130] sm:$0xff]  }
 0x5fe   : > { %7622 = vmatprep.subr.bf16.mxu0 %v8209_v42  ;;  %v8217_v42 = vld [vmem:[%s9853_s9 + $0x168] sm:$0xff]  }
 0x5ff   : > { %7595 = vmatpush3.bf16.msra.mxu1 %v8180_v21 }
 0x600   : > { %7636 = vmatprep.subr.bf16.mxu1 %v8182_v57 }
 0x601   : > { %7623 = vmatpush3.bf16.msra.mxu0 %v8211_v56 }
 0x602   : > { %5634 = vmatmul.mubr.bf16.vlgmr.msra.gmra.mxu1 %v5114_v36  ;;  %7664 = vmatprep.subr.bf16.mxu0 %v8213_v39 }
 0x603   : > { %5641 = vmatprep.mubr.bf16.mxu1 %v5120_v9  ;;  %7637 = vmatpush3.bf16.msra.mxu1 %v8184_v49 }
 0x604   : > { %7638 = vmatprep.subr.bf16.mxu1 %v8186_v28 }
 0x607   : > { %7639 = vmatpush3.bf16.msra.mxu1 %v8188_v16 }
 0x608   : > { %7640 = vmatprep.subr.bf16.mxu1 %v8190_v48 }
 0x60a   : > { %5642 = vmatmul.mubr.bf16.gmra.mxu1 %v5115_v60 }
 0x60b   : > { %7641 = vmatpush3.bf16.msra.mxu1 %v8192_v26 }
 0x60c   : > { %7642 = vmatprep.subr.bf16.mxu1 %v8194_v61 }
 0x60f   : > { %7643 = vmatpush3.bf16.msra.mxu1 %v8196_v47 }
 0x610   : > { %7644 = vmatprep.subr.bf16.mxu1 %v8198_v63 }
 0x613   : > { %7645 = vmatpush3.bf16.msra.mxu1 %v8200_v45 }
 0x614   : > { %7646 = vmatprep.subr.bf16.mxu1 %v8202_v18 }
 0x617   : > { %7647 = vmatpush3.bf16.msra.mxu1 %v8204_v46  ;;  %v8215_v46 = vld [vmem:[%s9853_s9 + $0x170] sm:$0xff]  }
 0x618   : > { %7648 = vmatprep.subr.bf16.mxu1 %v8206_v37 }
 0x61b   : > { %7649 = vmatpush3.bf16.msra.mxu1 %v8208_v40 }
 0x61c   : > { %7650 = vmatprep.subr.bf16.mxu1 %v8210_v59 }
 0x61f   : > { %7651 = vmatpush3.bf16.msra.mxu1 %v8212_v38  ;;  %v8218_v38 = vld [vmem:[%s9853_s9 + $0x128] sm:$0xff]  }
 0x620   : > { %7772 = vmatprep.subr.bf16.mxu1 %v8213_v39 }
 0x6a2   : > { %v7540_v62 = vpop.f32.mrf.mxu1 }
 0x6a3   : > { %v7568_v55 = vpop.f32.mrf.mxu0 }
 0x6a4   : > { %v7541_v3 = vpop.f32.mrf.mxu1 }
 0x6a5   : > { %v7569_v43 = vpop.f32.mrf.mxu0  ;;  %v7542_v34 = vadd.f32 %v7541_v3, %v7540_v62 }
 0x6a6   : > { %v7543_v25 = vpop.f32.mrf.mxu1  ;;  %v7570_v53 = vadd.f32 %v7569_v43, %v7568_v55  ;;  %v5682_v55 = vld [vmem:[#allocation4 + $0x15] sm:$0x3] }
 0x6a7   : > { %v7571_v6 = vpop.f32.mrf.mxu0 }
 0x6a8   : > { %v7544_v23 = vpop.f32.mrf.mxu1  ;;  %v5588_v51 = vadd.f32 %v7570_v53, %v7542_v34  ;;  %v5677_v34 = vld [vmem:[#allocation4 + $0x14] sm:$0x3] }
 0x6a9   : > { %v7572_v44 = vpop.f32.mrf.mxu0  ;;  %v7545_v41 = vadd.f32 %v7544_v23, %v7543_v25  ;;  %v8220_v23 = vld [vmem:[%s9853_s9 + $0x120] sm:$0xff]  }
 0x6aa   : > { %v7546_v5 = vpop.f32.mrf.mxu1  ;;  %v7573_v17 = vadd.f32 %v7572_v44, %v7571_v6  ;;  %v8219_v6 = vld [vmem:[%s9853_s9 + $0x160] sm:$0xff]   ;;  %v5684_v44 = vpack.c.bf16 %v5682_v55, %v5682_v55 }
 0x6ab   : > { %v7574_v4 = vpop.f32.mrf.mxu0 }
 0x6ac   : > { %v7547_v24 = vpop.f32.mrf.mxu1  ;;  %v5591_v52 = vadd.f32 %v7573_v17, %v7545_v41 }
 0x6ad   : > { %v7575_v30 = vpop.f32.mrf.mxu0  ;;  %v7548_v36 = vadd.f32 %v7547_v24, %v7546_v5  ;;  %v8222_v5 = vld [vmem:[%s9853_s9 + $0x118] sm:$0xff]   ;;  %v8224_v24 = vld [vmem:[%s9853_s9 + $0x110] sm:$0xff]  }
 0x6ae   : > { %v7549_v11 = vpop.f32.mrf.mxu1  ;;  %v7576_v12 = vadd.f32 %v7575_v30, %v7574_v4  ;;  %v8221_v4 = vld [vmem:[%s9853_s9 + $0x158] sm:$0xff]   ;;  %v8223_v30 = vld [vmem:[%s9853_s9 + $0x150] sm:$0xff]  }
 0x6af   : > { %v7577_v0 = vpop.f32.mrf.mxu0  ;;  %v8226_v11 = vld [vmem:[%s9853_s9 + $0x108] sm:$0xff]  }
 0x6b0   : > { %v7550_v50 = vpop.f32.mrf.mxu1  ;;  %v5596_v22 = vadd.f32 %v7576_v12, %v7548_v36  ;;  %v8225_v0 = vld [vmem:[%s9853_s9 + $0x148] sm:$0xff]  }
 0x6b1   : > { %v7578_v14 = vpop.f32.mrf.mxu0  ;;  %v8228_v50 = vld [vmem:[%s9853_s9 + $0x100] sm:$0xff]  }
 0x6b2   : > { %v8227_v14 = vld [vmem:[%s9853_s9 + $0x140] sm:$0xff]  }
 0x6c2   : > { %v7596_v13 = vpop.f32.mrf.mxu1 }
 0x6c4   : > { %v7597_v2 = vpop.f32.mrf.mxu1 }
 0x6c5   : > { %v7598_v21 = vadd.f32 %v7597_v2, %v7596_v13  ;;  %v5679_v13 = vpack.c.bf16 %v5677_v34, %v5677_v34 }
 0x6c6   : > { %v7599_v32 = vpop.f32.mrf.mxu1 }
 0x6c7   : > { %v5636_v20 = vadd.f32 %v7598_v21, %v5588_v51 }
 0x6c8   : > { %v7600_v9 = vpop.f32.mrf.mxu1 }
 0x6c9   : > { %v5649_v60 = vmax.f32 %v5636_v20, 0.0  ;;  %v7601_v10 = vadd.f32 %v7600_v9, %v7599_v32 }
 0x6ca   : > { %v7602_v57 = vpop.f32.mrf.mxu1 }
 0x6cb   : > { %5652 = vst [vmem:[#allocation4 + $0x3] sm:$0xff] %v5649_v60  ;;  %v5639_v15 = vadd.f32 %v7601_v10, %v5591_v52 }
 0x6cc   : > { %v7603_v49 = vpop.f32.mrf.mxu1 }
 0x6cd   : > { %v5650_v28 = vmax.f32 %v5639_v15, 0.0  ;;  %v7604_v31 = vadd.f32 %v7603_v49, %v7602_v57 }
 0x6ce   : > { %v7605_v16 = vpop.f32.mrf.mxu1 }
 0x6cf   : > { %5653 = vst [vmem:[#allocation4 + $0xb] sm:$0xff] %v5650_v28  ;;  %v5644_v27 = vadd.f32 %v7604_v31, %v5596_v22  ;;  %v5673_v48 = vpack.c.bf16 %v5650_v28, %v5649_v60 }
 0x6d0   : > { %v7606_v1 = vpop.f32.mrf.mxu1 }
 0x6d1   : > { %v5651_v26 = vmax.f32 %v5644_v27, 0.0  ;;  %6149 = vmatprep.mubr.bf16.mxu1 %v5673_v48 }
 0x6d2   : > { %v5660_v61 = vld [vmem:[#allocation4 + $0x1] sm:$0xff] }
 0x6d3   : > { %5654 = vst [vmem:[#allocation4 + $0x13] sm:$0x1] %v5651_v26  ;;  %v5655_v8 = vld [vmem:[#allocation4] sm:$0xff] }
 0x6d4   : > { %v5665_v47 = vld [vmem:[#allocation4 + $0x2] sm:$0xff] }
 0x6d6   : > { %v5661_v29 = vld [vmem:[#allocation4 + $0x9] sm:$0xff]  ;;  %v5662_v7 = vld [vmem:[#allocation4 + $0x11] sm:$0x3] }
 0x6d7   : > { %v5656_v63 = vld [vmem:[#allocation4 + $0x8] sm:$0xff]  ;;  %v5663_v45 = vpack.c.bf16 %v5661_v29, %v5660_v61  ;;  %v5664_v33 = vpack.c.bf16 %v5662_v7, %v5662_v7  ;;  %v5657_v56 = vld [vmem:[#allocation4 + $0x10] sm:$0x3] }
 0x6d8   : > { %v5666_v58 = vld [vmem:[#allocation4 + $0xa] sm:$0xff]  ;;  %v5658_v19 = vpack.c.bf16 %v5656_v63, %v5655_v8  ;;  %v5659_v43 = vpack.c.bf16 %v5657_v56, %v5657_v56 }
 0x6d9   : > { %v5668_v18 = vpack.c.bf16 %v5666_v58, %v5665_v47  ;;  %6101 = vmatprep.mubr.bf16.mxu0 %v5663_v45  ;;  %v5680_v3 = vld [vmem:[#allocation4 + $0x5] sm:$0xff] }
 0x6da   : > { %6102 = vmatmul.mubr.bf16.vlgmr.msra.gmra.mxu0 %v5658_v19  ;;  %v5672_v37 = vld [vmem:[#allocation4 + $0x13] sm:$0x3]  ;;  %v5675_v41 = vld [vmem:[#allocation4 + $0x4] sm:$0xff] }
 0x6db   : > { %6150 = vmatmul.mubr.bf16.vlgmr.msra.gmra.mxu1 %v5668_v18  ;;  %7665 = vmatpush3.bf16.msra.mxu0 %v8214_v35  ;;  %v5674_v40 = vpack.c.bf16 %v5672_v37, %v5672_v37  ;;  %v5667_v59 = vld [vmem:[#allocation4 + $0x12] sm:$0x3] }
 0x6dc   : > { %7780 = vmatpush3.bf16.msra.mxu1 %v8214_v35  ;;  %6109 = vmatprep.mubr.bf16.mxu0 %v5664_v33  ;;  %v5681_v39 = vld [vmem:[#allocation4 + $0xd] sm:$0xff]  ;;  %v5669_v62 = vpack.c.bf16 %v5667_v59, %v5667_v59 }
 0x6dd   : > { %7666 = vmatprep.subr.bf16.mxu0 %v8215_v46  ;;  %7773 = vmatprep.subr.bf16.mxu1 %v8215_v46  ;;  %v5683_v25 = vpack.c.bf16 %v5681_v39, %v5680_v3  ;;  %v5676_v53 = vld [vmem:[#allocation4 + $0xc] sm:$0xff] }
 0x6de   : > { %6157 = vmatprep.mubr.bf16.mxu1 %v5674_v40  ;;  %v5678_v17 = vpack.c.bf16 %v5676_v53, %v5675_v41 }
 0x6df   : > { %7667 = vmatpush3.bf16.msra.mxu0 %v8216_v54 }
 0x6e0   : > { %7781 = vmatpush3.bf16.msra.mxu1 %v8216_v54  ;;  %7668 = vmatprep.subr.bf16.mxu0 %v8217_v42 }
 0x6e1   : > { %7774 = vmatprep.subr.bf16.mxu1 %v8217_v42 }
 0x6e2   : > { %6110 = vmatmul.mubr.bf16.gmra.mxu0 %v5659_v43 }
 0x6e3   : > { %6158 = vmatmul.mubr.bf16.gmra.mxu1 %v5669_v62  ;;  %7669 = vmatpush3.bf16.msra.mxu0 %v8218_v38 }
 0x6e4   : > { %7782 = vmatpush3.bf16.msra.mxu1 %v8218_v38  ;;  %6197 = vmatprep.mubr.bf16.mxu0 %v5683_v25 }
 0x6e5   : > { %7670 = vmatprep.subr.bf16.mxu0 %v8219_v6  ;;  %7775 = vmatprep.subr.bf16.mxu1 %v8219_v6 }
 0x6e6   : > { %6205 = vmatprep.mubr.bf16.mxu1 %v5684_v44 }
 0x6e7   : > { %7671 = vmatpush3.bf16.msra.mxu0 %v8220_v23 }
 0x6e8   : > { %7783 = vmatpush3.bf16.msra.mxu1 %v8220_v23  ;;  %7672 = vmatprep.subr.bf16.mxu0 %v8221_v4 }
 0x6e9   : > { %7776 = vmatprep.subr.bf16.mxu1 %v8221_v4 }
 0x6eb   : > { %7673 = vmatpush3.bf16.msra.mxu0 %v8222_v5 }
 0x6ec   : > { %7784 = vmatpush3.bf16.msra.mxu1 %v8222_v5  ;;  %7674 = vmatprep.subr.bf16.mxu0 %v8223_v30 }
 0x6ed   : > { %7777 = vmatprep.subr.bf16.mxu1 %v8223_v30 }
 0x6ef   : > { %7675 = vmatpush3.bf16.msra.mxu0 %v8224_v24 }
 0x6f0   : > { %7785 = vmatpush3.bf16.msra.mxu1 %v8224_v24  ;;  %7676 = vmatprep.subr.bf16.mxu0 %v8225_v0 }
 0x6f1   : > { %7778 = vmatprep.subr.bf16.mxu1 %v8225_v0 }
 0x6f3   : > { %7677 = vmatpush3.bf16.msra.mxu0 %v8226_v11 }
 0x6f4   : > { %7786 = vmatpush3.bf16.msra.mxu1 %v8226_v11  ;;  %7678 = vmatprep.subr.bf16.mxu0 %v8227_v14 }
 0x6f5   : > { %7779 = vmatprep.subr.bf16.mxu1 %v8227_v14 }
 0x6f7   : > { %7679 = vmatpush3.bf16.msra.mxu0 %v8228_v50 }
 0x6f8   : > { %7787 = vmatpush3.bf16.msra.mxu1 %v8228_v50 }
 0x6fa   : > { %6198 = vmatmul.mubr.bf16.vlgmr.msra.gmra.mxu0 %v5678_v17 }
 0x6fb   : > { %6206 = vmatmul.mubr.bf16.vlgmr.msra.gmra.mxu1 %v5679_v13 }
 0x79a   : > { %v7624_v51 = vpop.f32.mrf.mxu0 }
 0x79b   : > { %v7652_v2 = vpop.f32.mrf.mxu1 }
 0x79c   : > { %v7625_v32 = vpop.f32.mrf.mxu0 }
 0x79d   : > { %v7653_v21 = vpop.f32.mrf.mxu1  ;;  %v7626_v27 = vadd.f32 %v7625_v32, %v7624_v51 }
 0x79e   : > { %v7627_v52 = vpop.f32.mrf.mxu0  ;;  %v7654_v48 = vadd.f32 %v7653_v21, %v7652_v2 }
 0x79f   : > { %v7655_v20 = vpop.f32.mrf.mxu1 }
 0x7a0   : > { %v7628_v36 = vpop.f32.mrf.mxu0  ;;  %v6152_v29 = vadd.f32 %v7654_v48, %v7626_v27 }
 0x7a1   : > { %v7656_v9 = vpop.f32.mrf.mxu1  ;;  %v7629_v45 = vadd.f32 %v7628_v36, %v7627_v52 }
 0x7a2   : > { %v7630_v60 = vpop.f32.mrf.mxu0  ;;  %v7657_v19 = vadd.f32 %v7656_v9, %v7655_v20 }
 0x7a3   : > { %v7658_v12 = vpop.f32.mrf.mxu1 }
 0x7a4   : > { %v7631_v57 = vpop.f32.mrf.mxu0  ;;  %v6155_v59 = vadd.f32 %v7657_v19, %v7629_v45 }
 0x7a5   : > { %v7659_v10 = vpop.f32.mrf.mxu1  ;;  %v7632_v31 = vadd.f32 %v7631_v57, %v7630_v60 }
 0x7a6   : > { %v7633_v49 = vpop.f32.mrf.mxu0  ;;  %v7660_v16 = vadd.f32 %v7659_v10, %v7658_v12 }
 0x7a7   : > { %v7661_v15 = vpop.f32.mrf.mxu1 }
 0x7a8   : > { %v7634_v28 = vpop.f32.mrf.mxu0  ;;  %v6160_v61 = vadd.f32 %v7660_v16, %v7632_v31 }
 0x7a9   : > { %v7662_v22 = vpop.f32.mrf.mxu1 }
 0x7ba   : > { %v7680_v26 = vpop.f32.mrf.mxu0 }
 0x7bb   : > { %v7686_v1 = vpop.f32.mrf.mxu1 }
 0x7bc   : > { %v7681_v8 = vpop.f32.mrf.mxu0 }
 0x7bd   : > { %v7687_v35 = vpop.f32.mrf.mxu1  ;;  %v7682_v63 = vadd.f32 %v7681_v8, %v7680_v26 }
 0x7be   : > { %v7688_v47 = vadd.f32 %v7687_v35, %v7686_v1  ;;  %v7683_v7 = vpop.f32.mrf.mxu0 }
 0x7bf   : > { %v7689_v58 = vpop.f32.mrf.mxu1  ;;  %v6200_v46 = vadd.f32 %v7682_v63, %v6152_v29 }
 0x7c0   : > { %v6208_v18 = vadd.f32 %v7688_v47, %v6160_v61  ;;  %v7684_v54 = vpop.f32.mrf.mxu0 }
 0x7c1   : > { %v7690_v33 = vpop.f32.mrf.mxu1  ;;  %v6213_v40 = vmax.f32 %v6200_v46, 0.0  ;;  %v7685_v42 = vadd.f32 %v7684_v54, %v7683_v7 }
 0x7c2   : > { %v6215_v37 = vmax.f32 %v6208_v18, 0.0 }
 0x7c3   : > { %v6216_v38 = vsel %vm4032_vm3, %v6213_v40, -inf  ;;  %v6224_v39 = vsel %vm6223_vm8, %v6213_v40, -inf  ;;  %v6232_v55 = vsel %vm6231_vm9, %v6213_v40, -inf  ;;  %v6240_v62 = vsel %vm6239_vm10, %v6213_v40, -inf }
 0x7c4   : > { %v6275_v56 = vsel %vm4032_vm3, %v6215_v37, -inf  ;;  %v6217_v43 = vrot.slane %v6216_v38, 4  ;;  %v6225_v3 = vrot.slane %v6224_v39, 4  ;;  %v6233_v6 = vrot.slane %v6232_v55, 4 }
 0x7c5   : > { %v6241_v25 = vrot.slane %v6240_v62, 4  ;;  %v6276_v44 = vrot.slane %v6275_v56, 4  ;;  %v6203_v23 = vadd.f32 %v7685_v42, %v6155_v59 }
 0x7c6   : > { %v6218_v4 = vmax.f32 %v6216_v38, %v6217_v43  ;;  %v6226_v5 = vmax.f32 %v6224_v39, %v6225_v3  ;;  %v6234_v30 = vmax.f32 %v6232_v55, %v6233_v6 }
 0x7c7   : > { %v6242_v24 = vmax.f32 %v6240_v62, %v6241_v25  ;;  %v6277_v0 = vmax.f32 %v6275_v56, %v6276_v44  ;;  %v6214_v11 = vmax.f32 %v6203_v23, 0.0 }
 0x7c8   : > { %v6219_v14 = vrot.slane %v6218_v4, 2  ;;  %v6227_v50 = vrot.slane %v6226_v5, 2  ;;  %v6235_v34 = vrot.slane %v6234_v30, 2 }
 0x7c9   : > { %v6243_v53 = vrot.slane %v6242_v24, 2  ;;  %v6278_v13 = vrot.slane %v6277_v0, 2  ;;  %v6247_v41 = vsel %vm4032_vm3, %v6214_v11, -inf  ;;  %v6254_v17 = vsel %vm6223_vm8, %v6214_v11, -inf }
 0x7ca   : > { %v6261_v2 = vsel %vm6231_vm9, %v6214_v11, -inf  ;;  %v6220_v51 = vmax.f32 %v6218_v4, %v6219_v14  ;;  %v6228_v21 = vmax.f32 %v6226_v5, %v6227_v50  ;;  %v6236_v32 = vmax.f32 %v6234_v30, %v6235_v34 }
 0x7cb   : > { %v6244_v20 = vmax.f32 %v6242_v24, %v6243_v53  ;;  %v6279_v52 = vmax.f32 %v6277_v0, %v6278_v13  ;;  %v6248_v9 = vrot.slane %v6247_v41, 4  ;;  %v6255_v36 = vrot.slane %v6254_v17, 4 }
 0x7cc   : > { %v6262_v12 = vrot.slane %v6261_v2, 4  ;;  %v6221_v60 = vrot.slane %v6220_v51, 1  ;;  %v6229_v10 = vrot.slane %v6228_v21, 1  ;;  %v6237_v57 = vrot.slane %v6236_v32, 1 }
 0x7cd   : > { %v6280_v15 = vrot.slane %v6279_v52, 1  ;;  %v6249_v49 = vmax.f32 %v6247_v41, %v6248_v9  ;;  %v6256_v22 = vmax.f32 %v6254_v17, %v6255_v36  ;;  %v6245_v48 = vrot.slane %v6244_v20, 1 }
 0x7ce   : > { %v6263_v28 = vmax.f32 %v6261_v2, %v6262_v12  ;;  %v6222_v31 = vmax.f32 %v6220_v51, %v6221_v60  ;;  %v6230_v16 = vmax.f32 %v6228_v21, %v6229_v10  ;;  %v6238_v27 = vmax.f32 %v6236_v32, %v6237_v57 }
 0x7cf   : > { %v6281_v1 = vmax.f32 %v6279_v52, %v6280_v15  ;;  %v6250_v26 = vrot.slane %v6249_v49, 2  ;;  %v6257_v35 = vrot.slane %v6256_v22, 2  ;;  %v6268_v47 = vsel %vm6239_vm10, %v6214_v11, -inf }
 0x7d0   : > { %v6264_v61 = vrot.slane %v6263_v28, 2  ;;  %v6282_v8 = vsel %vm4030_vm2, %v6222_v31, %v6230_v16  ;;  %v6246_v19 = vmax.f32 %v6244_v20, %v6245_v48  ;;  %v6269_v18 = vrot.slane %v6268_v47, 4 }
 0x7d1   : > { %v6283_v29 = vsel %vm4032_vm3, %v6282_v8, %v6238_v27  ;;  %6290 = vst [vmem:[%s419_s24 + $0x8] sm:$0x1] %v6281_v1  ;;  %v6251_v63 = vmax.f32 %v6249_v49, %v6250_v26  ;;  %v6258_v58 = vmax.f32 %v6256_v22, %v6257_v35 }
 0x7d2   : > { %v6265_v45 = vmax.f32 %v6263_v28, %v6264_v61  ;;  %v6284_v33 = vsel %vm4034_vm4, %v6283_v29, %v6246_v19  ;;  %v6270_v37 = vmax.f32 %v6268_v47, %v6269_v18 }
 0x7d3   : > { %v6252_v7 = vrot.slane %v6251_v63, 1  ;;  %v6259_v46 = vrot.slane %v6258_v58, 1 }
 0x7d4   : > { %v6266_v42 = vrot.slane %v6265_v45, 1  ;;  %v6271_v59 = vrot.slane %v6270_v37, 2 }
 0x7d5   : > { %v6253_v54 = vmax.f32 %v6251_v63, %v6252_v7  ;;  %v6260_v40 = vmax.f32 %v6258_v58, %v6259_v46 }
 0x7d6   : > { %v6272_v38 = vmax.f32 %v6270_v37, %v6271_v59  ;;  %v6267_v55 = vmax.f32 %v6265_v45, %v6266_v42 }
 0x7d7   : > { %v6285_v56 = vsel %vm3916_vm0, %v6284_v33, %v6253_v54 }
 0x7d8   : > { %v6286_v39 = vsel %vm4037_vm5, %v6285_v56, %v6260_v40  ;;  %v6273_v62 = vrot.slane %v6272_v38, 1 }
 0x7d9   : > { %v6287_v43 = vsel %vm4039_vm6, %v6286_v39, %v6267_v55 }
 0x7da   : > { %v6274_v3 = vmax.f32 %v6272_v38, %v6273_v62 }
 0x7dc   : > { %v6288_v6 = vsel %vm4041_vm7, %v6287_v43, %v6274_v3 }
 0x7dd   : > { %6289 = vst [vmem:[%s419_s24] sm:$0xff] %v6288_v6 }
 0x7de PF: > { %s22_s17 = sadd.s32 1, %s8235_s17  }
 0x7df   : > { %p19_p4 = scmp.ge.s32.totalorder %s22_s17, 4  }
 0x7e1   :  { %21 = sbr.rel (!%p19_p4) target bundleno = 1 (0x1), region = 105 }

</bundles_post_ra>
